<compile_context>
chip_gen: v7x
topology: tpu7x:2x2x1
jax: 0.10.0
libtpu: 0.0.40
codegen_flags: <defaults>
</compile_context>

<pallas_src>
import jax
import jax.numpy as jnp
import numpy as np
from jax.experimental import pallas as pl
from jax.experimental.pallas import tpu as pltpu

SPATIAL = 11               # fixed by fc1: 11 * 11 * 16
PH = SPATIAL + 2           # padded spatial extent (zero ring) = 13
CONV_CH = 16
OUT_PW = 16                # lane axis padded: pw runs 0..15 (13 real + 3 pad)
L_OUT = OUT_PW * CONV_CH   # 256 lanes: pw*16 + c (lane-dense, native MXU tile)


def _sigmoid(x):
    # exp and the approx reciprocal both land on the EUP slot (no VALU divide).
    return pl.reciprocal(1.0 + jnp.exp(-x), approx=True)


# ---------------------------------------------------------------------------
# Fused Pallas kernel: conv stack + fc1 + GRUCell + fc2, VMEM resident.
# ---------------------------------------------------------------------------
def _fused_actor_kernel(x_ref, dop_ref, h_ref,
                        c0w_ref, c1w_ref, c2w_ref, c3w_ref, cb_ref,
                        w1a_ref, w1b_ref, b1_ref,
                        wi_ref, wh_ref, bi_ref, bhn_ref,
                        w2_ref, b2_ref,
                        q_ref, hout_ref,
                        buf_a, buf_b):
    tb = h_ref.shape[0]                 # batch-tile rows (multiple of 16)
    hid = h_ref.shape[1]
    mi = (PH - 2) * tb                  # 11*tb interior rows actually computed

    # Zero the ph-ring rows of both scratch buffers: they act as the zero-padding
    # ring for the next conv layer and are never written by the conv data path.
    # Done unconditionally every step so it is megacore-safe (scratch is per-core
    # and starts uninitialized on whichever core runs its first grid iteration).
    zrow = jnp.zeros((tb, L_OUT), jnp.bfloat16)
    buf_a[0:tb, :] = zrow
    buf_a[(PH - 1) * tb:PH * tb, :] = zrow
    buf_b[0:tb, :] = zrow
    buf_b[(PH - 1) * tb:PH * tb, :] = zrow

    def conv_layer(src, dst, w_ref, layer):
        acc = jnp.zeros((mi, L_OUT), jnp.float32)
        for dy in range(3):             # 16-aligned sublane-shifted static slices
            a = src[dy * tb:dy * tb + mi, :]
            acc = acc + jnp.dot(a, w_ref[dy], preferred_element_type=jnp.float32)
        # Ring/pad output lanes have zero weight columns AND zero bias, so ReLU
        # already yields exact 0 there: no interior mask needed.
        y = jnp.maximum(acc + cb_ref[layer:layer + 1, :], 0.0)
        dst[tb:tb + mi, :] = y.astype(dst.dtype)   # interior rows only; ring stays 0

    conv_layer(x_ref, buf_a, c0w_ref, 0)
    conv_layer(buf_a, buf_b, c1w_ref, 1)
    conv_layer(buf_b, buf_a, c2w_ref, 2)
    conv_layer(buf_a, buf_b, c3w_ref, 3)

    # fc1: dop part + 11 per-spatial-row matmuls (NCHW flatten folded into w1a).
    x1 = jnp.dot(dop_ref[...].astype(jnp.bfloat16), w1b_ref[...],
                 preferred_element_type=jnp.float32)
    for p in range(1, PH - 1):
        feat = buf_b[p * tb:(p + 1) * tb, :]
        x1 = x1 + jnp.dot(feat, w1a_ref[p], preferred_element_type=jnp.float32)
    x1 = jnp.maximum(x1 + b1_ref[...], 0.0)

    # GRUCell with packed gate weights (2 matmuls of N=3*hid), f32 elementwise math.
    h = h_ref[...]
    gi = jnp.dot(x1.astype(jnp.bfloat16), wi_ref[...],
                 preferred_element_type=jnp.float32) + bi_ref[...]
    gh = jnp.dot(h.astype(jnp.bfloat16), wh_ref[...],
                 preferred_element_type=jnp.float32)
    r = _sigmoid(gi[:, :hid] + gh[:, :hid])
    z = _sigmoid(gi[:, hid:2 * hid] + gh[:, hid:2 * hid])
    n = jnp.tanh(gi[:, 2 * hid:] + r * (gh[:, 2 * hid:] + bhn_ref[...]))
    h_new = (1.0 - z) * n + z * h

    # fc2: lane-dense 128-wide output; wrapper slices to n_actions.
    q_ref[...] = jnp.dot(h_new.astype(jnp.bfloat16), w2_ref[...],
                         preferred_element_type=jnp.float32) + b2_ref[...]

    # h_out padded to 128 lanes for an unmasked store; wrapper slices to hid.
    hpad = hout_ref.shape[1]
    if hpad > hid:
        hout_ref[...] = jnp.concatenate(
            [h_new, jnp.zeros((tb, hpad - hid), jnp.float32)], axis=-1)
    else:
        hout_ref[...] = h_new


# index maps
def _im_rows(i):
    return (i, 0)


def _im_w2(i):
    return (0, 0)


def _im_w3(i):
    return (0, 0, 0)


# ---------------------------------------------------------------------------
# Batch tiling: multiple of 16, cap 256, >=2 (even) tiles when b > 16.
# ---------------------------------------------------------------------------
def _batch_tiling(b):
    if b <= 16:
        return 16, 1
    best = None
    max_nt = 2 * ((b + 31) // 32)
    nt = 2
    while nt <= max_nt:
        tb = 16 * ((b + 16 * nt - 1) // (16 * nt))
        if tb <= 256:
            key = (nt * tb - b, nt)     # least padding waste, then fewest tiles
            if best is None or key < best[0]:
                best = (key, tb, nt)
        nt += 2
    return best[1], best[2]


# ---------------------------------------------------------------------------
# Wrapper: layout plumbing + the single pallas_call.
# ---------------------------------------------------------------------------
def ppo_actor_forward(params, s, dopobs, hidden_state, rnn_hidden_dim, n_actions):
    b, cin, hs, ws = s.shape
    assert hs == SPATIAL and ws == SPATIAL, "fc1 assumes an 11x11x16 feature map"
    hid = rnn_hidden_dim
    dop_dim = dopobs.shape[1]
    qpad = params["fc2_w"].shape[1]
    hpad = ((hid + 127) // 128) * 128
    lc0 = PH * cin

    tb, nt = _batch_tiling(b)
    bp = tb * nt
    m = PH * tb

    # --- layout plumbing (small, one time): NCHW -> padded-row layout, bf16 ---
    x = jnp.transpose(s.astype(jnp.float32), (0, 2, 3, 1))        # NHWC
    x = jnp.pad(x, ((0, bp - b), (1, 1), (1, 1), (0, 0)))         # zero ring + batch pad
    x = x.reshape(bp, PH, lc0)                                    # lanes = pw*cin + ci
    x = x.reshape(nt, tb, PH, lc0).transpose(0, 2, 1, 3)          # rows = (tile, ph, b)
    x = x.reshape(nt * m, lc0).astype(jnp.bfloat16)

    dop = jnp.pad(dopobs.astype(jnp.float32), ((0, bp - b), (0, 0)))
    h_in = hidden_state.reshape(-1, hid).astype(jnp.float32)
    h_in = jnp.pad(h_in, ((0, bp - h_in.shape[0]), (0, 0)))

    grid_spec = pltpu.PrefetchScalarGridSpec(
        num_scalar_prefetch=0,
        grid=(nt,),
        in_specs=[
            pl.BlockSpec((m, lc0), _im_rows),              # x (padded-row layout)
            pl.BlockSpec((tb, dop_dim), _im_rows),         # dopobs
            pl.BlockSpec((tb, hid), _im_rows),             # hidden state
            pl.BlockSpec((3, lc0, L_OUT), _im_w3),         # conv0 block-tridiag weight
            pl.BlockSpec((3, L_OUT, L_OUT), _im_w3),       # conv1
            pl.BlockSpec((3, L_OUT, L_OUT), _im_w3),       # conv2
            pl.BlockSpec((3, L_OUT, L_OUT), _im_w3),       # conv3
            pl.BlockSpec((4, L_OUT), _im_w2),              # conv biases (ring lanes = 0)
            pl.BlockSpec((PH, L_OUT, hid), _im_w3),        # fc1 conv-part weight
            pl.BlockSpec((dop_dim, hid), _im_w2),          # fc1 dop-part weight
            pl.BlockSpec((1, hid), _im_w2),                # fc1 bias
            pl.BlockSpec((hid, 3 * hid), _im_w2),          # GRU W_ih packed
            pl.BlockSpec((hid, 3 * hid), _im_w2),          # GRU W_hh packed
            pl.BlockSpec((1, 3 * hid), _im_w2),            # GRU folded biases [r|z|n]
            pl.BlockSpec((1, hid), _im_w2),                # GRU b_hn
            pl.BlockSpec((hid, qpad), _im_w2),             # fc2 weight (lane padded)
            pl.BlockSpec((1, qpad), _im_w2),               # fc2 bias  (lane padded)
        ],
        out_specs=[
            pl.BlockSpec((tb, qpad), _im_rows),            # q (lane-dense 128 wide)
            pl.BlockSpec((tb, hpad), _im_rows),            # h_out (lane-dense 128 wide)
        ],
        scratch_shapes=[
            pltpu.VMEM((PH * tb, L_OUT), jnp.bfloat16),
            pltpu.VMEM((PH * tb, L_OUT), jnp.bfloat16),
        ],
    )

    q_full, h_full = pl.pallas_call(
        _fused_actor_kernel,
        out_shape=(jax.ShapeDtypeStruct((bp, qpad), jnp.float32),
                   jax.ShapeDtypeStruct((bp, hpad), jnp.float32)),
        grid_spec=grid_spec,
        compiler_params=pltpu.CompilerParams(
            dimension_semantics=("parallel",)),   # v7x: batch tiles over both TCs
    )(x, dop, h_in,
      params["conv0_w"], params["conv1_w"], params["conv2_w"], params["conv3_w"],
      params["conv_b"],
      params["fc1_wa"], params["fc1_wb"], params["fc1_b"],
      params["gru_wi"], params["gru_wh"], params["gru_bi"], params["gru_bhn"],
      params["fc2_w"], params["fc2_b"])

    # torch.unsqueeze(h.detach(), 1): detach is a no-op for forward numerics.
    return q_full[:b, :n_actions], h_full[:b, None, :hid]


# ---------------------------------------------------------------------------
# Parameter init (torch layout) and packing into the kernel layouts.
# ---------------------------------------------------------------------------
def init_torch_params(key, in_ch, dop_dim, hid, n_actions):
    def uni(k, fan_in, shape):
        bound = 1.0 / float(fan_in) ** 0.5
        return jax.random.uniform(k, shape, jnp.float32, -bound, bound)

    keys = iter(jax.random.split(key, 24))
    p = {}
    c = in_ch
    for i in range(4):
        p[f"conv{i}_w"] = uni(next(keys), c * 9, (CONV_CH, c, 3, 3))   # OIHW
        p[f"conv{i}_b"] = uni(next(keys), c * 9, (CONV_CH,))
        c = CONV_CH
    fc1_in = CONV_CH * SPATIAL * SPATIAL + dop_dim
    p["fc1_w"] = uni(next(keys), fc1_in, (hid, fc1_in))                # (out, in)
    p["fc1_b"] = uni(next(keys), fc1_in, (hid,))
    p["w_ih"] = uni(next(keys), hid, (3 * hid, hid))                   # gates [r; z; n]
    p["w_hh"] = uni(next(keys), hid, (3 * hid, hid))
    p["b_ih"] = uni(next(keys), hid, (3 * hid,))
    p["b_hh"] = uni(next(keys), hid, (3 * hid,))
    p["fc2_w"] = uni(next(keys), hid, (n_actions, hid))
    p["fc2_b"] = uni(next(keys), hid, (n_actions,))
    return p


def prepare_params(tp, hid, n_actions):
    """Pack torch-layout weights into the fused-kernel layouts (host-side, numpy)."""
    kp = {}
    # --- conv layers: block-tridiagonal (3, K, 256) weights; biases only on the
    #     interior output lanes (ring / pad lanes stay exactly zero) ---
    cb = np.zeros((4, L_OUT), np.float32)
    for l in range(4):
        w = np.asarray(tp[f"conv{l}_w"], np.float32)          # (16, Cin, 3, 3)
        ci_n = w.shape[1]
        pw_in = PH if l == 0 else OUT_PW                      # input lane groups
        wk = np.zeros((3, pw_in, ci_n, OUT_PW, CONV_CH), np.float32)
        for dy in range(3):
            for dx in range(3):
                blk = w[:, :, dy, dx].T                        # (ci, co)
                for pwo in range(1, PH - 1):                   # interior output cols only
                    wk[dy, pwo + dx - 1, :, pwo, :] = blk
        kp[f"conv{l}_w"] = jnp.asarray(wk.reshape(3, pw_in * ci_n, L_OUT), jnp.bfloat16)
        bias = np.asarray(tp[f"conv{l}_b"], np.float32)
        for pw in range(1, PH - 1):
            cb[l, pw * CONV_CH:(pw + 1) * CONV_CH] = bias
    kp["conv_b"] = jnp.asarray(cb)

    # --- fc1: fold the NCHW flatten into the weight layout (13, 256, hid) ---
    feat = CONV_CH * SPATIAL * SPATIAL
    w1 = np.asarray(tp["fc1_w"], np.float32)
    w1a = w1[:, :feat].reshape(hid, CONV_CH, SPATIAL, SPATIAL)   # [j, c, h, w]
    w1ak = np.zeros((PH, OUT_PW, CONV_CH, hid), np.float32)
    w1ak[1:PH - 1, 1:PH - 1] = np.transpose(w1a, (2, 3, 1, 0))   # [h, w, c, j]
    kp["fc1_wa"] = jnp.asarray(w1ak.reshape(PH, L_OUT, hid), jnp.bfloat16)
    kp["fc1_wb"] = jnp.asarray(w1[:, feat:].T, jnp.bfloat16)
    kp["fc1_b"] = jnp.asarray(np.asarray(tp["fc1_b"], np.float32).reshape(1, hid))

    # --- GRUCell: packed gate weights, folded r/z biases, separate b_hn ---
    wih = np.asarray(tp["w_ih"], np.float32)
    whh = np.asarray(tp["w_hh"], np.float32)
    bih = np.asarray(tp["b_ih"], np.float32)
    bhh = np.asarray(tp["b_hh"], np.float32)
    kp["gru_wi"] = jnp.asarray(wih.T, jnp.bfloat16)              # (hid, 3*hid) [r|z|n]
    kp["gru_wh"] = jnp.asarray(whh.T, jnp.bfloat16)
    bi = np.concatenate([bih[:hid] + bhh[:hid],
                         bih[hid:2 * hid] + bhh[hid:2 * hid],
                         bih[2 * hid:]])
    kp["gru_bi"] = jnp.asarray(bi.reshape(1, 3 * hid))
    kp["gru_bhn"] = jnp.asarray(bhh[2 * hid:].reshape(1, hid))

    # --- fc2: pad output lanes to a multiple of 128 for a dense store ---
    qpad = ((n_actions + 127) // 128) * 128
    w2 = np.asarray(tp["fc2_w"], np.float32)
    b2 = np.asarray(tp["fc2_b"], np.float32)
    w2p = np.zeros((hid, qpad), np.float32)
    w2p[:, :n_actions] = w2.T
    b2p = np.zeros((1, qpad), np.float32)
    b2p[0, :n_actions] = b2
    kp["fc2_w"] = jnp.asarray(w2p, jnp.bfloat16)
    kp["fc2_b"] = jnp.asarray(b2p)
    return kp


# ---------------------------------------------------------------------------
# Pure-JAX reference (mirrors the PyTorch module exactly) for a numerical check.
# ---------------------------------------------------------------------------
def ppo_actor_reference(tp, s, dopobs, hidden_state, hid):
    x = s.astype(jnp.float32)
    for i in range(4):
        x = jax.lax.conv_general_dilated(
            x, tp[f"conv{i}_w"], (1, 1), ((1, 1), (1, 1)),
            dimension_numbers=("NCHW", "OIHW", "NCHW"))
        x = jnp.maximum(x + tp[f"conv{i}_b"][None, :, None, None], 0.0)
    aa = x.reshape(x.shape[0], -1)
    inp = jnp.concatenate([aa, dopobs.astype(jnp.float32)], axis=1)
    x1 = jnp.maximum(inp @ tp["fc1_w"].T + tp["fc1_b"], 0.0)
    h = hidden_state.reshape(-1, hid).astype(jnp.float32)
    gi = x1 @ tp["w_ih"].T + tp["b_ih"]
    gh = h @ tp["w_hh"].T + tp["b_hh"]
    r = jax.nn.sigmoid(gi[:, :hid] + gh[:, :hid])
    z = jax.nn.sigmoid(gi[:, hid:2 * hid] + gh[:, hid:2 * hid])
    n = jnp.tanh(gi[:, 2 * hid:] + r * gh[:, 2 * hid:])
    h_new = (1.0 - z) * n + z * h
    q = h_new @ tp["fc2_w"].T + tp["fc2_b"]
    return q, h_new[:, None, :]


# ---------------------------------------------------------------------------
if __name__ == "__main__":
    B = 2
    IN_CH = 4            # conv in-channels (input_shape)
    DOP = 8              # dop_input_shape
    HID = 32             # rnn_hidden_dim
    N_ACTIONS = 5

    key = jax.random.PRNGKey(0)
    k_p, k_s, k_d, k_h = jax.random.split(key, 4)

    torch_params = init_torch_params(k_p, IN_CH, DOP, HID, N_ACTIONS)
    params = prepare_params(torch_params, HID, N_ACTIONS)

    s = jax.random.normal(k_s, (B, IN_CH, SPATIAL, SPATIAL), jnp.float32)   # NCHW
    dopobs = jax.random.normal(k_d, (B, DOP), jnp.float32)
    hidden_state = jax.random.normal(k_h, (B, 1, HID), jnp.float32)

    fwd = jax.jit(ppo_actor_forward, static_argnames=("rnn_hidden_dim", "n_actions"))
    q, h_out = fwd(params, s, dopobs, hidden_state,
                   rnn_hidden_dim=HID, n_actions=N_ACTIONS)
    q = jax.block_until_ready(q)
    h_out = jax.block_until_ready(h_out)

    q_ref, h_ref = ppo_actor_reference(torch_params, s, dopobs, hidden_state, HID)

    assert q.shape == (B, N_ACTIONS) and q.dtype == jnp.float32
    assert h_out.shape == (B, 1, HID) and h_out.dtype == jnp.float32
    assert bool(jnp.all(jnp.isfinite(q))) and bool(jnp.all(jnp.isfinite(h_out)))
    # bf16 MXU inputs with f32 accumulation: generous but bug-catching tolerance.
    assert float(jnp.max(jnp.abs(q - q_ref))) < 5e-2
    assert float(jnp.max(jnp.abs(h_out - h_ref))) < 5e-2
    print("KERNEL_OK")
</pallas_src>

<mosaic_0001>
module attributes {stable_mosaic.version = 11 : i64} {
  func.func @_fused_actor_kernel(%arg0: i32, %arg1: memref<208x52xbf16, #tpu.memory_space<vmem>>, %arg2: memref<16x8xf32, #tpu.memory_space<vmem>>, %arg3: memref<16x32xf32, #tpu.memory_space<vmem>>, %arg4: memref<3x52x256xbf16, #tpu.memory_space<vmem>>, %arg5: memref<3x256x256xbf16, #tpu.memory_space<vmem>>, %arg6: memref<3x256x256xbf16, #tpu.memory_space<vmem>>, %arg7: memref<3x256x256xbf16, #tpu.memory_space<vmem>>, %arg8: memref<4x256xf32, #tpu.memory_space<vmem>>, %arg9: memref<13x256x32xbf16, #tpu.memory_space<vmem>>, %arg10: memref<8x32xbf16, #tpu.memory_space<vmem>>, %arg11: memref<1x32xf32, #tpu.memory_space<vmem>>, %arg12: memref<32x96xbf16, #tpu.memory_space<vmem>>, %arg13: memref<32x96xbf16, #tpu.memory_space<vmem>>, %arg14: memref<1x96xf32, #tpu.memory_space<vmem>>, %arg15: memref<1x32xf32, #tpu.memory_space<vmem>>, %arg16: memref<32x128xbf16, #tpu.memory_space<vmem>>, %arg17: memref<1x128xf32, #tpu.memory_space<vmem>>, %arg18: memref<16x128xf32, #tpu.memory_space<vmem>>, %arg19: memref<16x128xf32, #tpu.memory_space<vmem>>, %arg20: memref<208x256xbf16, #tpu.memory_space<vmem>>, %arg21: memref<208x256xbf16, #tpu.memory_space<vmem>>) attributes {dimension_semantics = [#tpu.dimension_semantics<parallel>], iteration_bounds = array<i64: 1>, scalar_prefetch = 0 : i64, scratch_operands = 2 : i64, tpu.core_type = #tpu.core_type<tc>, window_params = [{transform_indices = @transform_0, window_bounds = array<i64: 208, 52>}, {transform_indices = @transform_1, window_bounds = array<i64: 16, 8>}, {transform_indices = @transform_2, window_bounds = array<i64: 16, 32>}, {pipeline_mode = #tpu.pipeline_mode<synchronous>, transform_indices = @transform_3, window_bounds = array<i64: 3, 52, 256>}, {pipeline_mode = #tpu.pipeline_mode<synchronous>, transform_indices = @transform_4, window_bounds = array<i64: 3, 256, 256>}, {pipeline_mode = #tpu.pipeline_mode<synchronous>, transform_indices = @transform_5, window_bounds = array<i64: 3, 256, 256>}, {pipeline_mode = #tpu.pipeline_mode<synchronous>, transform_indices = @transform_6, window_bounds = array<i64: 3, 256, 256>}, {pipeline_mode = #tpu.pipeline_mode<synchronous>, transform_indices = @transform_7, window_bounds = array<i64: 4, 256>}, {pipeline_mode = #tpu.pipeline_mode<synchronous>, transform_indices = @transform_8, window_bounds = array<i64: 13, 256, 32>}, {pipeline_mode = #tpu.pipeline_mode<synchronous>, transform_indices = @transform_9, window_bounds = array<i64: 8, 32>}, {pipeline_mode = #tpu.pipeline_mode<synchronous>, transform_indices = @transform_10, window_bounds = array<i64: 1, 32>}, {pipeline_mode = #tpu.pipeline_mode<synchronous>, transform_indices = @transform_11, window_bounds = array<i64: 32, 96>}, {pipeline_mode = #tpu.pipeline_mode<synchronous>, transform_indices = @transform_12, window_bounds = array<i64: 32, 96>}, {pipeline_mode = #tpu.pipeline_mode<synchronous>, transform_indices = @transform_13, window_bounds = array<i64: 1, 96>}, {pipeline_mode = #tpu.pipeline_mode<synchronous>, transform_indices = @transform_14, window_bounds = array<i64: 1, 32>}, {pipeline_mode = #tpu.pipeline_mode<synchronous>, transform_indices = @transform_15, window_bounds = array<i64: 32, 128>}, {pipeline_mode = #tpu.pipeline_mode<synchronous>, transform_indices = @transform_16, window_bounds = array<i64: 1, 128>}, {transform_indices = @transform_17, window_bounds = array<i64: 16, 128>}, {transform_indices = @transform_18, window_bounds = array<i64: 16, 128>}]} {
    %cst = arith.constant 0.000000e+00 : bf16
    %0 = vector.broadcast %cst : bf16 to vector<16x256xbf16>
    %c0 = arith.constant 0 : index
    %c0_0 = arith.constant 0 : index
    %1 = vector.load %arg20[%c0, %c0_0] : memref<208x256xbf16, #tpu.memory_space<vmem>>, vector<16x256xbf16>
    tpu.vector_store %arg20[%c0, %c0_0], %0 {strides = array<i32>} : memref<208x256xbf16, #tpu.memory_space<vmem>>, vector<16x256xbf16>,
    %c192 = arith.constant 192 : index
    %c0_1 = arith.constant 0 : index
    %2 = vector.load %arg20[%c192, %c0_1] : memref<208x256xbf16, #tpu.memory_space<vmem>>, vector<16x256xbf16>
    tpu.vector_store %arg20[%c192, %c0_1], %0 {strides = array<i32>} : memref<208x256xbf16, #tpu.memory_space<vmem>>, vector<16x256xbf16>,
    %c0_2 = arith.constant 0 : index
    %c0_3 = arith.constant 0 : index
    %3 = vector.load %arg21[%c0_2, %c0_3] : memref<208x256xbf16, #tpu.memory_space<vmem>>, vector<16x256xbf16>
    tpu.vector_store %arg21[%c0_2, %c0_3], %0 {strides = array<i32>} : memref<208x256xbf16, #tpu.memory_space<vmem>>, vector<16x256xbf16>,
    %c192_4 = arith.constant 192 : index
    %c0_5 = arith.constant 0 : index
    %4 = vector.load %arg21[%c192_4, %c0_5] : memref<208x256xbf16, #tpu.memory_space<vmem>>, vector<16x256xbf16>
    tpu.vector_store %arg21[%c192_4, %c0_5], %0 {strides = array<i32>} : memref<208x256xbf16, #tpu.memory_space<vmem>>, vector<16x256xbf16>,
    %cst_6 = arith.constant 0.000000e+00 : f32
    %5 = vector.broadcast %cst_6 : f32 to vector<176x256xf32>
    %c0_7 = arith.constant 0 : index
    %c0_8 = arith.constant 0 : index
    %6 = vector.load %arg1[%c0_7, %c0_8] : memref<208x52xbf16, #tpu.memory_space<vmem>>, vector<176x52xbf16>
    %c0_9 = arith.constant 0 : index
    %c0_10 = arith.constant 0 : index
    %c0_11 = arith.constant 0 : index
    %7 = vector.load %arg4[%c0_9, %c0_10, %c0_11] : memref<3x52x256xbf16, #tpu.memory_space<vmem>>, vector<1x52x256xbf16>
    %8 = vector.shape_cast %7 : vector<1x52x256xbf16> to vector<52x256xbf16>
    %cst_12 = arith.constant dense<0.000000e+00> : vector<176x256xf32>
    %9 = tpu.matmul %6, %8, %cst_12 {dimension_numbers = #tpu.dot_dimension_numbers<[1], [0], [0], [1], [0, 0, 1, 1], [], []>} : vector<176x52xbf16>, vector<52x256xbf16>, vector<176x256xf32> -> vector<176x256xf32>
    %10 = arith.addf %5, %9 : vector<176x256xf32>
    %c16 = arith.constant 16 : index
    %c0_13 = arith.constant 0 : index
    %11 = vector.load %arg1[%c16, %c0_13] : memref<208x52xbf16, #tpu.memory_space<vmem>>, vector<176x52xbf16>
    %c1 = arith.constant 1 : index
    %c0_14 = arith.constant 0 : index
    %c0_15 = arith.constant 0 : index
    %12 = vector.load %arg4[%c1, %c0_14, %c0_15] : memref<3x52x256xbf16, #tpu.memory_space<vmem>>, vector<1x52x256xbf16>
    %13 = vector.shape_cast %12 : vector<1x52x256xbf16> to vector<52x256xbf16>
    %cst_16 = arith.constant dense<0.000000e+00> : vector<176x256xf32>
    %14 = tpu.matmul %11, %13, %cst_16 {dimension_numbers = #tpu.dot_dimension_numbers<[1], [0], [0], [1], [0, 0, 1, 1], [], []>} : vector<176x52xbf16>, vector<52x256xbf16>, vector<176x256xf32> -> vector<176x256xf32>
    %15 = arith.addf %10, %14 : vector<176x256xf32>
    %c32 = arith.constant 32 : index
    %c0_17 = arith.constant 0 : index
    %16 = vector.load %arg1[%c32, %c0_17] : memref<208x52xbf16, #tpu.memory_space<vmem>>, vector<176x52xbf16>
    %c2 = arith.constant 2 : index
    %c0_18 = arith.constant 0 : index
    %c0_19 = arith.constant 0 : index
    %17 = vector.load %arg4[%c2, %c0_18, %c0_19] : memref<3x52x256xbf16, #tpu.memory_space<vmem>>, vector<1x52x256xbf16>
    %18 = vector.shape_cast %17 : vector<1x52x256xbf16> to vector<52x256xbf16>
    %cst_20 = arith.constant dense<0.000000e+00> : vector<176x256xf32>
    %19 = tpu.matmul %16, %18, %cst_20 {dimension_numbers = #tpu.dot_dimension_numbers<[1], [0], [0], [1], [0, 0, 1, 1], [], []>} : vector<176x52xbf16>, vector<52x256xbf16>, vector<176x256xf32> -> vector<176x256xf32>
    %20 = arith.addf %15, %19 : vector<176x256xf32>
    %c0_21 = arith.constant 0 : index
    %c0_22 = arith.constant 0 : index
    %21 = vector.load %arg8[%c0_21, %c0_22] : memref<4x256xf32, #tpu.memory_space<vmem>>, vector<1x256xf32>
    %22 = vector.broadcast %21 : vector<1x256xf32> to vector<176x256xf32>
    %23 = arith.addf %20, %22 : vector<176x256xf32>
    %cst_23 = arith.constant 0.000000e+00 : f32
    %24 = vector.broadcast %cst_23 : f32 to vector<176x256xf32>
    %25 = arith.maximumf %23, %24 : vector<176x256xf32>
    %26 = arith.truncf %25 : vector<176x256xf32> to vector<176x256xbf16>
    %c16_24 = arith.constant 16 : index
    %c0_25 = arith.constant 0 : index
    %27 = vector.load %arg20[%c16_24, %c0_25] : memref<208x256xbf16, #tpu.memory_space<vmem>>, vector<176x256xbf16>
    tpu.vector_store %arg20[%c16_24, %c0_25], %26 {strides = array<i32>} : memref<208x256xbf16, #tpu.memory_space<vmem>>, vector<176x256xbf16>,
    %cst_26 = arith.constant 0.000000e+00 : f32
    %28 = vector.broadcast %cst_26 : f32 to vector<176x256xf32>
    %c0_27 = arith.constant 0 : index
    %c0_28 = arith.constant 0 : index
    %29 = vector.load %arg20[%c0_27, %c0_28] : memref<208x256xbf16, #tpu.memory_space<vmem>>, vector<176x256xbf16>
    %c0_29 = arith.constant 0 : index
    %c0_30 = arith.constant 0 : index
    %c0_31 = arith.constant 0 : index
    %30 = vector.load %arg5[%c0_29, %c0_30, %c0_31] : memref<3x256x256xbf16, #tpu.memory_space<vmem>>, vector<1x256x256xbf16>
    %31 = vector.shape_cast %30 : vector<1x256x256xbf16> to vector<256x256xbf16>
    %cst_32 = arith.constant dense<0.000000e+00> : vector<176x256xf32>
    %32 = tpu.matmul %29, %31, %cst_32 {dimension_numbers = #tpu.dot_dimension_numbers<[1], [0], [0], [1], [0, 0, 1, 1], [], []>} : vector<176x256xbf16>, vector<256x256xbf16>, vector<176x256xf32> -> vector<176x256xf32>
    %33 = arith.addf %28, %32 : vector<176x256xf32>
    %c16_33 = arith.constant 16 : index
    %c0_34 = arith.constant 0 : index
    %34 = vector.load %arg20[%c16_33, %c0_34] : memref<208x256xbf16, #tpu.memory_space<vmem>>, vector<176x256xbf16>
    %c1_35 = arith.constant 1 : index
    %c0_36 = arith.constant 0 : index
    %c0_37 = arith.constant 0 : index
    %35 = vector.load %arg5[%c1_35, %c0_36, %c0_37] : memref<3x256x256xbf16, #tpu.memory_space<vmem>>, vector<1x256x256xbf16>
    %36 = vector.shape_cast %35 : vector<1x256x256xbf16> to vector<256x256xbf16>
    %cst_38 = arith.constant dense<0.000000e+00> : vector<176x256xf32>
    %37 = tpu.matmul %34, %36, %cst_38 {dimension_numbers = #tpu.dot_dimension_numbers<[1], [0], [0], [1], [0, 0, 1, 1], [], []>} : vector<176x256xbf16>, vector<256x256xbf16>, vector<176x256xf32> -> vector<176x256xf32>
    %38 = arith.addf %33, %37 : vector<176x256xf32>
    %c32_39 = arith.constant 32 : index
    %c0_40 = arith.constant 0 : index
    %39 = vector.load %arg20[%c32_39, %c0_40] : memref<208x256xbf16, #tpu.memory_space<vmem>>, vector<176x256xbf16>
    %c2_41 = arith.constant 2 : index
    %c0_42 = arith.constant 0 : index
    %c0_43 = arith.constant 0 : index
    %40 = vector.load %arg5[%c2_41, %c0_42, %c0_43] : memref<3x256x256xbf16, #tpu.memory_space<vmem>>, vector<1x256x256xbf16>
    %41 = vector.shape_cast %40 : vector<1x256x256xbf16> to vector<256x256xbf16>
    %cst_44 = arith.constant dense<0.000000e+00> : vector<176x256xf32>
    %42 = tpu.matmul %39, %41, %cst_44 {dimension_numbers = #tpu.dot_dimension_numbers<[1], [0], [0], [1], [0, 0, 1, 1], [], []>} : vector<176x256xbf16>, vector<256x256xbf16>, vector<176x256xf32> -> vector<176x256xf32>
    %43 = arith.addf %38, %42 : vector<176x256xf32>
    %c1_45 = arith.constant 1 : index
    %c0_46 = arith.constant 0 : index
    %44 = vector.load %arg8[%c1_45, %c0_46] : memref<4x256xf32, #tpu.memory_space<vmem>>, vector<1x256xf32>
    %45 = vector.broadcast %44 : vector<1x256xf32> to vector<176x256xf32>
    %46 = arith.addf %43, %45 : vector<176x256xf32>
    %cst_47 = arith.constant 0.000000e+00 : f32
    %47 = vector.broadcast %cst_47 : f32 to vector<176x256xf32>
    %48 = arith.maximumf %46, %47 : vector<176x256xf32>
    %49 = arith.truncf %48 : vector<176x256xf32> to vector<176x256xbf16>
    %c16_48 = arith.constant 16 : index
    %c0_49 = arith.constant 0 : index
    %50 = vector.load %arg21[%c16_48, %c0_49] : memref<208x256xbf16, #tpu.memory_space<vmem>>, vector<176x256xbf16>
    tpu.vector_store %arg21[%c16_48, %c0_49], %49 {strides = array<i32>} : memref<208x256xbf16, #tpu.memory_space<vmem>>, vector<176x256xbf16>,
    %cst_50 = arith.constant 0.000000e+00 : f32
    %51 = vector.broadcast %cst_50 : f32 to vector<176x256xf32>
    %c0_51 = arith.constant 0 : index
    %c0_52 = arith.constant 0 : index
    %52 = vector.load %arg21[%c0_51, %c0_52] : memref<208x256xbf16, #tpu.memory_space<vmem>>, vector<176x256xbf16>
    %c0_53 = arith.constant 0 : index
    %c0_54 = arith.constant 0 : index
    %c0_55 = arith.constant 0 : index
    %53 = vector.load %arg6[%c0_53, %c0_54, %c0_55] : memref<3x256x256xbf16, #tpu.memory_space<vmem>>, vector<1x256x256xbf16>
    %54 = vector.shape_cast %53 : vector<1x256x256xbf16> to vector<256x256xbf16>
    %cst_56 = arith.constant dense<0.000000e+00> : vector<176x256xf32>
    %55 = tpu.matmul %52, %54, %cst_56 {dimension_numbers = #tpu.dot_dimension_numbers<[1], [0], [0], [1], [0, 0, 1, 1], [], []>} : vector<176x256xbf16>, vector<256x256xbf16>, vector<176x256xf32> -> vector<176x256xf32>
    %56 = arith.addf %51, %55 : vector<176x256xf32>
    %c16_57 = arith.constant 16 : index
    %c0_58 = arith.constant 0 : index
    %57 = vector.load %arg21[%c16_57, %c0_58] : memref<208x256xbf16, #tpu.memory_space<vmem>>, vector<176x256xbf16>
    %c1_59 = arith.constant 1 : index
    %c0_60 = arith.constant 0 : index
    %c0_61 = arith.constant 0 : index
    %58 = vector.load %arg6[%c1_59, %c0_60, %c0_61] : memref<3x256x256xbf16, #tpu.memory_space<vmem>>, vector<1x256x256xbf16>
    %59 = vector.shape_cast %58 : vector<1x256x256xbf16> to vector<256x256xbf16>
    %cst_62 = arith.constant dense<0.000000e+00> : vector<176x256xf32>
    %60 = tpu.matmul %57, %59, %cst_62 {dimension_numbers = #tpu.dot_dimension_numbers<[1], [0], [0], [1], [0, 0, 1, 1], [], []>} : vector<176x256xbf16>, vector<256x256xbf16>, vector<176x256xf32> -> vector<176x256xf32>
    %61 = arith.addf %56, %60 : vector<176x256xf32>
    %c32_63 = arith.constant 32 : index
    %c0_64 = arith.constant 0 : index
    %62 = vector.load %arg21[%c32_63, %c0_64] : memref<208x256xbf16, #tpu.memory_space<vmem>>, vector<176x256xbf16>
    %c2_65 = arith.constant 2 : index
    %c0_66 = arith.constant 0 : index
    %c0_67 = arith.constant 0 : index
    %63 = vector.load %arg6[%c2_65, %c0_66, %c0_67] : memref<3x256x256xbf16, #tpu.memory_space<vmem>>, vector<1x256x256xbf16>
    %64 = vector.shape_cast %63 : vector<1x256x256xbf16> to vector<256x256xbf16>
    %cst_68 = arith.constant dense<0.000000e+00> : vector<176x256xf32>
    %65 = tpu.matmul %62, %64, %cst_68 {dimension_numbers = #tpu.dot_dimension_numbers<[1], [0], [0], [1], [0, 0, 1, 1], [], []>} : vector<176x256xbf16>, vector<256x256xbf16>, vector<176x256xf32> -> vector<176x256xf32>
    %66 = arith.addf %61, %65 : vector<176x256xf32>
    %c2_69 = arith.constant 2 : index
    %c0_70 = arith.constant 0 : index
    %67 = vector.load %arg8[%c2_69, %c0_70] : memref<4x256xf32, #tpu.memory_space<vmem>>, vector<1x256xf32>
    %68 = vector.broadcast %67 : vector<1x256xf32> to vector<176x256xf32>
    %69 = arith.addf %66, %68 : vector<176x256xf32>
    %cst_71 = arith.constant 0.000000e+00 : f32
    %70 = vector.broadcast %cst_71 : f32 to vector<176x256xf32>
    %71 = arith.maximumf %69, %70 : vector<176x256xf32>
    %72 = arith.truncf %71 : vector<176x256xf32> to vector<176x256xbf16>
    %c16_72 = arith.constant 16 : index
    %c0_73 = arith.constant 0 : index
    %73 = vector.load %arg20[%c16_72, %c0_73] : memref<208x256xbf16, #tpu.memory_space<vmem>>, vector<176x256xbf16>
    tpu.vector_store %arg20[%c16_72, %c0_73], %72 {strides = array<i32>} : memref<208x256xbf16, #tpu.memory_space<vmem>>, vector<176x256xbf16>,
    %cst_74 = arith.constant 0.000000e+00 : f32
    %74 = vector.broadcast %cst_74 : f32 to vector<176x256xf32>
    %c0_75 = arith.constant 0 : index
    %c0_76 = arith.constant 0 : index
    %75 = vector.load %arg20[%c0_75, %c0_76] : memref<208x256xbf16, #tpu.memory_space<vmem>>, vector<176x256xbf16>
    %c0_77 = arith.constant 0 : index
    %c0_78 = arith.constant 0 : index
    %c0_79 = arith.constant 0 : index
    %76 = vector.load %arg7[%c0_77, %c0_78, %c0_79] : memref<3x256x256xbf16, #tpu.memory_space<vmem>>, vector<1x256x256xbf16>
    %77 = vector.shape_cast %76 : vector<1x256x256xbf16> to vector<256x256xbf16>
    %cst_80 = arith.constant dense<0.000000e+00> : vector<176x256xf32>
    %78 = tpu.matmul %75, %77, %cst_80 {dimension_numbers = #tpu.dot_dimension_numbers<[1], [0], [0], [1], [0, 0, 1, 1], [], []>} : vector<176x256xbf16>, vector<256x256xbf16>, vector<176x256xf32> -> vector<176x256xf32>
    %79 = arith.addf %74, %78 : vector<176x256xf32>
    %c16_81 = arith.constant 16 : index
    %c0_82 = arith.constant 0 : index
    %80 = vector.load %arg20[%c16_81, %c0_82] : memref<208x256xbf16, #tpu.memory_space<vmem>>, vector<176x256xbf16>
    %c1_83 = arith.constant 1 : index
    %c0_84 = arith.constant 0 : index
    %c0_85 = arith.constant 0 : index
    %81 = vector.load %arg7[%c1_83, %c0_84, %c0_85] : memref<3x256x256xbf16, #tpu.memory_space<vmem>>, vector<1x256x256xbf16>
    %82 = vector.shape_cast %81 : vector<1x256x256xbf16> to vector<256x256xbf16>
    %cst_86 = arith.constant dense<0.000000e+00> : vector<176x256xf32>
    %83 = tpu.matmul %80, %82, %cst_86 {dimension_numbers = #tpu.dot_dimension_numbers<[1], [0], [0], [1], [0, 0, 1, 1], [], []>} : vector<176x256xbf16>, vector<256x256xbf16>, vector<176x256xf32> -> vector<176x256xf32>
    %84 = arith.addf %79, %83 : vector<176x256xf32>
    %c32_87 = arith.constant 32 : index
    %c0_88 = arith.constant 0 : index
    %85 = vector.load %arg20[%c32_87, %c0_88] : memref<208x256xbf16, #tpu.memory_space<vmem>>, vector<176x256xbf16>
    %c2_89 = arith.constant 2 : index
    %c0_90 = arith.constant 0 : index
    %c0_91 = arith.constant 0 : index
    %86 = vector.load %arg7[%c2_89, %c0_90, %c0_91] : memref<3x256x256xbf16, #tpu.memory_space<vmem>>, vector<1x256x256xbf16>
    %87 = vector.shape_cast %86 : vector<1x256x256xbf16> to vector<256x256xbf16>
    %cst_92 = arith.constant dense<0.000000e+00> : vector<176x256xf32>
    %88 = tpu.matmul %85, %87, %cst_92 {dimension_numbers = #tpu.dot_dimension_numbers<[1], [0], [0], [1], [0, 0, 1, 1], [], []>} : vector<176x256xbf16>, vector<256x256xbf16>, vector<176x256xf32> -> vector<176x256xf32>
    %89 = arith.addf %84, %88 : vector<176x256xf32>
    %c3 = arith.constant 3 : index
    %c0_93 = arith.constant 0 : index
    %90 = vector.load %arg8[%c3, %c0_93] : memref<4x256xf32, #tpu.memory_space<vmem>>, vector<1x256xf32>
    %91 = vector.broadcast %90 : vector<1x256xf32> to vector<176x256xf32>
    %92 = arith.addf %89, %91 : vector<176x256xf32>
    %cst_94 = arith.constant 0.000000e+00 : f32
    %93 = vector.broadcast %cst_94 : f32 to vector<176x256xf32>
    %94 = arith.maximumf %92, %93 : vector<176x256xf32>
    %95 = arith.truncf %94 : vector<176x256xf32> to vector<176x256xbf16>
    %c16_95 = arith.constant 16 : index
    %c0_96 = arith.constant 0 : index
    %96 = vector.load %arg21[%c16_95, %c0_96] : memref<208x256xbf16, #tpu.memory_space<vmem>>, vector<176x256xbf16>
    tpu.vector_store %arg21[%c16_95, %c0_96], %95 {strides = array<i32>} : memref<208x256xbf16, #tpu.memory_space<vmem>>, vector<176x256xbf16>,
    %c0_97 = arith.constant 0 : index
    %c0_98 = arith.constant 0 : index
    %97 = vector.load %arg2[%c0_97, %c0_98] : memref<16x8xf32, #tpu.memory_space<vmem>>, vector<16x8xf32>
    %98 = arith.truncf %97 : vector<16x8xf32> to vector<16x8xbf16>
    %c0_99 = arith.constant 0 : index
    %c0_100 = arith.constant 0 : index
    %99 = vector.load %arg10[%c0_99, %c0_100] : memref<8x32xbf16, #tpu.memory_space<vmem>>, vector<8x32xbf16>
    %cst_101 = arith.constant dense<0.000000e+00> : vector<16x32xf32>
    %100 = tpu.matmul %98, %99, %cst_101 {dimension_numbers = #tpu.dot_dimension_numbers<[1], [0], [0], [1], [0, 0, 1, 1], [], []>} : vector<16x8xbf16>, vector<8x32xbf16>, vector<16x32xf32> -> vector<16x32xf32>
    %c16_102 = arith.constant 16 : index
    %c0_103 = arith.constant 0 : index
    %101 = vector.load %arg21[%c16_102, %c0_103] : memref<208x256xbf16, #tpu.memory_space<vmem>>, vector<16x256xbf16>
    %c1_104 = arith.constant 1 : index
    %c0_105 = arith.constant 0 : index
    %c0_106 = arith.constant 0 : index
    %102 = vector.load %arg9[%c1_104, %c0_105, %c0_106] : memref<13x256x32xbf16, #tpu.memory_space<vmem>>, vector<1x256x32xbf16>
    %103 = vector.shape_cast %102 : vector<1x256x32xbf16> to vector<256x32xbf16>
    %cst_107 = arith.constant dense<0.000000e+00> : vector<16x32xf32>
    %104 = tpu.matmul %101, %103, %cst_107 {dimension_numbers = #tpu.dot_dimension_numbers<[1], [0], [0], [1], [0, 0, 1, 1], [], []>} : vector<16x256xbf16>, vector<256x32xbf16>, vector<16x32xf32> -> vector<16x32xf32>
    %105 = arith.addf %100, %104 : vector<16x32xf32>
    %c32_108 = arith.constant 32 : index
    %c0_109 = arith.constant 0 : index
    %106 = vector.load %arg21[%c32_108, %c0_109] : memref<208x256xbf16, #tpu.memory_space<vmem>>, vector<16x256xbf16>
    %c2_110 = arith.constant 2 : index
    %c0_111 = arith.constant 0 : index
    %c0_112 = arith.constant 0 : index
    %107 = vector.load %arg9[%c2_110, %c0_111, %c0_112] : memref<13x256x32xbf16, #tpu.memory_space<vmem>>, vector<1x256x32xbf16>
    %108 = vector.shape_cast %107 : vector<1x256x32xbf16> to vector<256x32xbf16>
    %cst_113 = arith.constant dense<0.000000e+00> : vector<16x32xf32>
    %109 = tpu.matmul %106, %108, %cst_113 {dimension_numbers = #tpu.dot_dimension_numbers<[1], [0], [0], [1], [0, 0, 1, 1], [], []>} : vector<16x256xbf16>, vector<256x32xbf16>, vector<16x32xf32> -> vector<16x32xf32>
    %110 = arith.addf %105, %109 : vector<16x32xf32>
    %c48 = arith.constant 48 : index
    %c0_114 = arith.constant 0 : index
    %111 = vector.load %arg21[%c48, %c0_114] : memref<208x256xbf16, #tpu.memory_space<vmem>>, vector<16x256xbf16>
    %c3_115 = arith.constant 3 : index
    %c0_116 = arith.constant 0 : index
    %c0_117 = arith.constant 0 : index
    %112 = vector.load %arg9[%c3_115, %c0_116, %c0_117] : memref<13x256x32xbf16, #tpu.memory_space<vmem>>, vector<1x256x32xbf16>
    %113 = vector.shape_cast %112 : vector<1x256x32xbf16> to vector<256x32xbf16>
    %cst_118 = arith.constant dense<0.000000e+00> : vector<16x32xf32>
    %114 = tpu.matmul %111, %113, %cst_118 {dimension_numbers = #tpu.dot_dimension_numbers<[1], [0], [0], [1], [0, 0, 1, 1], [], []>} : vector<16x256xbf16>, vector<256x32xbf16>, vector<16x32xf32> -> vector<16x32xf32>
    %115 = arith.addf %110, %114 : vector<16x32xf32>
    %c64 = arith.constant 64 : index
    %c0_119 = arith.constant 0 : index
    %116 = vector.load %arg21[%c64, %c0_119] : memref<208x256xbf16, #tpu.memory_space<vmem>>, vector<16x256xbf16>
    %c4 = arith.constant 4 : index
    %c0_120 = arith.constant 0 : index
    %c0_121 = arith.constant 0 : index
    %117 = vector.load %arg9[%c4, %c0_120, %c0_121] : memref<13x256x32xbf16, #tpu.memory_space<vmem>>, vector<1x256x32xbf16>
    %118 = vector.shape_cast %117 : vector<1x256x32xbf16> to vector<256x32xbf16>
    %cst_122 = arith.constant dense<0.000000e+00> : vector<16x32xf32>
    %119 = tpu.matmul %116, %118, %cst_122 {dimension_numbers = #tpu.dot_dimension_numbers<[1], [0], [0], [1], [0, 0, 1, 1], [], []>} : vector<16x256xbf16>, vector<256x32xbf16>, vector<16x32xf32> -> vector<16x32xf32>
    %120 = arith.addf %115, %119 : vector<16x32xf32>
    %c80 = arith.constant 80 : index
    %c0_123 = arith.constant 0 : index
    %121 = vector.load %arg21[%c80, %c0_123] : memref<208x256xbf16, #tpu.memory_space<vmem>>, vector<16x256xbf16>
    %c5 = arith.constant 5 : index
    %c0_124 = arith.constant 0 : index
    %c0_125 = arith.constant 0 : index
    %122 = vector.load %arg9[%c5, %c0_124, %c0_125] : memref<13x256x32xbf16, #tpu.memory_space<vmem>>, vector<1x256x32xbf16>
    %123 = vector.shape_cast %122 : vector<1x256x32xbf16> to vector<256x32xbf16>
    %cst_126 = arith.constant dense<0.000000e+00> : vector<16x32xf32>
    %124 = tpu.matmul %121, %123, %cst_126 {dimension_numbers = #tpu.dot_dimension_numbers<[1], [0], [0], [1], [0, 0, 1, 1], [], []>} : vector<16x256xbf16>, vector<256x32xbf16>, vector<16x32xf32> -> vector<16x32xf32>
    %125 = arith.addf %120, %124 : vector<16x32xf32>
    %c96 = arith.constant 96 : index
    %c0_127 = arith.constant 0 : index
    %126 = vector.load %arg21[%c96, %c0_127] : memref<208x256xbf16, #tpu.memory_space<vmem>>, vector<16x256xbf16>
    %c6 = arith.constant 6 : index
    %c0_128 = arith.constant 0 : index
    %c0_129 = arith.constant 0 : index
    %127 = vector.load %arg9[%c6, %c0_128, %c0_129] : memref<13x256x32xbf16, #tpu.memory_space<vmem>>, vector<1x256x32xbf16>
    %128 = vector.shape_cast %127 : vector<1x256x32xbf16> to vector<256x32xbf16>
    %cst_130 = arith.constant dense<0.000000e+00> : vector<16x32xf32>
    %129 = tpu.matmul %126, %128, %cst_130 {dimension_numbers = #tpu.dot_dimension_numbers<[1], [0], [0], [1], [0, 0, 1, 1], [], []>} : vector<16x256xbf16>, vector<256x32xbf16>, vector<16x32xf32> -> vector<16x32xf32>
    %130 = arith.addf %125, %129 : vector<16x32xf32>
    %c112 = arith.constant 112 : index
    %c0_131 = arith.constant 0 : index
    %131 = vector.load %arg21[%c112, %c0_131] : memref<208x256xbf16, #tpu.memory_space<vmem>>, vector<16x256xbf16>
    %c7 = arith.constant 7 : index
    %c0_132 = arith.constant 0 : index
    %c0_133 = arith.constant 0 : index
    %132 = vector.load %arg9[%c7, %c0_132, %c0_133] : memref<13x256x32xbf16, #tpu.memory_space<vmem>>, vector<1x256x32xbf16>
    %133 = vector.shape_cast %132 : vector<1x256x32xbf16> to vector<256x32xbf16>
    %cst_134 = arith.constant dense<0.000000e+00> : vector<16x32xf32>
    %134 = tpu.matmul %131, %133, %cst_134 {dimension_numbers = #tpu.dot_dimension_numbers<[1], [0], [0], [1], [0, 0, 1, 1], [], []>} : vector<16x256xbf16>, vector<256x32xbf16>, vector<16x32xf32> -> vector<16x32xf32>
    %135 = arith.addf %130, %134 : vector<16x32xf32>
    %c128 = arith.constant 128 : index
    %c0_135 = arith.constant 0 : index
    %136 = vector.load %arg21[%c128, %c0_135] : memref<208x256xbf16, #tpu.memory_space<vmem>>, vector<16x256xbf16>
    %c8 = arith.constant 8 : index
    %c0_136 = arith.constant 0 : index
    %c0_137 = arith.constant 0 : index
    %137 = vector.load %arg9[%c8, %c0_136, %c0_137] : memref<13x256x32xbf16, #tpu.memory_space<vmem>>, vector<1x256x32xbf16>
    %138 = vector.shape_cast %137 : vector<1x256x32xbf16> to vector<256x32xbf16>
    %cst_138 = arith.constant dense<0.000000e+00> : vector<16x32xf32>
    %139 = tpu.matmul %136, %138, %cst_138 {dimension_numbers = #tpu.dot_dimension_numbers<[1], [0], [0], [1], [0, 0, 1, 1], [], []>} : vector<16x256xbf16>, vector<256x32xbf16>, vector<16x32xf32> -> vector<16x32xf32>
    %140 = arith.addf %135, %139 : vector<16x32xf32>
    %c144 = arith.constant 144 : index
    %c0_139 = arith.constant 0 : index
    %141 = vector.load %arg21[%c144, %c0_139] : memref<208x256xbf16, #tpu.memory_space<vmem>>, vector<16x256xbf16>
    %c9 = arith.constant 9 : index
    %c0_140 = arith.constant 0 : index
    %c0_141 = arith.constant 0 : index
    %142 = vector.load %arg9[%c9, %c0_140, %c0_141] : memref<13x256x32xbf16, #tpu.memory_space<vmem>>, vector<1x256x32xbf16>
    %143 = vector.shape_cast %142 : vector<1x256x32xbf16> to vector<256x32xbf16>
    %cst_142 = arith.constant dense<0.000000e+00> : vector<16x32xf32>
    %144 = tpu.matmul %141, %143, %cst_142 {dimension_numbers = #tpu.dot_dimension_numbers<[1], [0], [0], [1], [0, 0, 1, 1], [], []>} : vector<16x256xbf16>, vector<256x32xbf16>, vector<16x32xf32> -> vector<16x32xf32>
    %145 = arith.addf %140, %144 : vector<16x32xf32>
    %c160 = arith.constant 160 : index
    %c0_143 = arith.constant 0 : index
    %146 = vector.load %arg21[%c160, %c0_143] : memref<208x256xbf16, #tpu.memory_space<vmem>>, vector<16x256xbf16>
    %c10 = arith.constant 10 : index
    %c0_144 = arith.constant 0 : index
    %c0_145 = arith.constant 0 : index
    %147 = vector.load %arg9[%c10, %c0_144, %c0_145] : memref<13x256x32xbf16, #tpu.memory_space<vmem>>, vector<1x256x32xbf16>
    %148 = vector.shape_cast %147 : vector<1x256x32xbf16> to vector<256x32xbf16>
    %cst_146 = arith.constant dense<0.000000e+00> : vector<16x32xf32>
    %149 = tpu.matmul %146, %148, %cst_146 {dimension_numbers = #tpu.dot_dimension_numbers<[1], [0], [0], [1], [0, 0, 1, 1], [], []>} : vector<16x256xbf16>, vector<256x32xbf16>, vector<16x32xf32> -> vector<16x32xf32>
    %150 = arith.addf %145, %149 : vector<16x32xf32>
    %c176 = arith.constant 176 : index
    %c0_147 = arith.constant 0 : index
    %151 = vector.load %arg21[%c176, %c0_147] : memref<208x256xbf16, #tpu.memory_space<vmem>>, vector<16x256xbf16>
    %c11 = arith.constant 11 : index
    %c0_148 = arith.constant 0 : index
    %c0_149 = arith.constant 0 : index
    %152 = vector.load %arg9[%c11, %c0_148, %c0_149] : memref<13x256x32xbf16, #tpu.memory_space<vmem>>, vector<1x256x32xbf16>
    %153 = vector.shape_cast %152 : vector<1x256x32xbf16> to vector<256x32xbf16>
    %cst_150 = arith.constant dense<0.000000e+00> : vector<16x32xf32>
    %154 = tpu.matmul %151, %153, %cst_150 {dimension_numbers = #tpu.dot_dimension_numbers<[1], [0], [0], [1], [0, 0, 1, 1], [], []>} : vector<16x256xbf16>, vector<256x32xbf16>, vector<16x32xf32> -> vector<16x32xf32>
    %155 = arith.addf %150, %154 : vector<16x32xf32>
    %c0_151 = arith.constant 0 : index
    %c0_152 = arith.constant 0 : index
    %156 = vector.load %arg11[%c0_151, %c0_152] : memref<1x32xf32, #tpu.memory_space<vmem>>, vector<1x32xf32>
    %157 = vector.broadcast %156 : vector<1x32xf32> to vector<16x32xf32>
    %158 = arith.addf %155, %157 : vector<16x32xf32>
    %cst_153 = arith.constant 0.000000e+00 : f32
    %159 = vector.broadcast %cst_153 : f32 to vector<16x32xf32>
    %160 = arith.maximumf %158, %159 : vector<16x32xf32>
    %c0_154 = arith.constant 0 : index
    %c0_155 = arith.constant 0 : index
    %161 = vector.load %arg3[%c0_154, %c0_155] : memref<16x32xf32, #tpu.memory_space<vmem>>, vector<16x32xf32>
    %162 = arith.truncf %160 : vector<16x32xf32> to vector<16x32xbf16>
    %c0_156 = arith.constant 0 : index
    %c0_157 = arith.constant 0 : index
    %163 = vector.load %arg12[%c0_156, %c0_157] : memref<32x96xbf16, #tpu.memory_space<vmem>>, vector<32x96xbf16>
    %cst_158 = arith.constant dense<0.000000e+00> : vector<16x96xf32>
    %164 = tpu.matmul %162, %163, %cst_158 {dimension_numbers = #tpu.dot_dimension_numbers<[1], [0], [0], [1], [0, 0, 1, 1], [], []>} : vector<16x32xbf16>, vector<32x96xbf16>, vector<16x96xf32> -> vector<16x96xf32>
    %c0_159 = arith.constant 0 : index
    %c0_160 = arith.constant 0 : index
    %165 = vector.load %arg14[%c0_159, %c0_160] : memref<1x96xf32, #tpu.memory_space<vmem>>, vector<1x96xf32>
    %166 = vector.broadcast %165 : vector<1x96xf32> to vector<16x96xf32>
    %167 = arith.addf %164, %166 : vector<16x96xf32>
    %168 = arith.truncf %161 : vector<16x32xf32> to vector<16x32xbf16>
    %c0_161 = arith.constant 0 : index
    %c0_162 = arith.constant 0 : index
    %169 = vector.load %arg13[%c0_161, %c0_162] : memref<32x96xbf16, #tpu.memory_space<vmem>>, vector<32x96xbf16>
    %cst_163 = arith.constant dense<0.000000e+00> : vector<16x96xf32>
    %170 = tpu.matmul %168, %169, %cst_163 {dimension_numbers = #tpu.dot_dimension_numbers<[1], [0], [0], [1], [0, 0, 1, 1], [], []>} : vector<16x32xbf16>, vector<32x96xbf16>, vector<16x96xf32> -> vector<16x96xf32>
    %171 = vector.extract_strided_slice %167 {offsets = [0, 0], sizes = [16, 32], strides = [1, 1]} : vector<16x96xf32> to vector<16x32xf32>
    %172 = vector.extract_strided_slice %170 {offsets = [0, 0], sizes = [16, 32], strides = [1, 1]} : vector<16x96xf32> to vector<16x32xf32>
    %173 = arith.addf %171, %172 : vector<16x32xf32>
    %cst_164 = arith.constant 0.000000e+00 : f32
    %174 = vector.broadcast %cst_164 : f32 to vector<16x32xf32>
    %175 = arith.subf %174, %173 : vector<16x32xf32>
    %176 = math.exp %175 : vector<16x32xf32>
    %cst_165 = arith.constant 1.000000e+00 : f32
    %177 = vector.broadcast %cst_165 : f32 to vector<16x32xf32>
    %178 = arith.addf %177, %176 : vector<16x32xf32>
    %179 = tpu.reciprocal %178 {approx = true} : vector<16x32xf32> -> vector<16x32xf32>
    %180 = vector.extract_strided_slice %167 {offsets = [0, 32], sizes = [16, 32], strides = [1, 1]} : vector<16x96xf32> to vector<16x32xf32>
    %181 = vector.extract_strided_slice %170 {offsets = [0, 32], sizes = [16, 32], strides = [1, 1]} : vector<16x96xf32> to vector<16x32xf32>
    %182 = arith.addf %180, %181 : vector<16x32xf32>
    %cst_166 = arith.constant 0.000000e+00 : f32
    %183 = vector.broadcast %cst_166 : f32 to vector<16x32xf32>
    %184 = arith.subf %183, %182 : vector<16x32xf32>
    %185 = math.exp %184 : vector<16x32xf32>
    %cst_167 = arith.constant 1.000000e+00 : f32
    %186 = vector.broadcast %cst_167 : f32 to vector<16x32xf32>
    %187 = arith.addf %186, %185 : vector<16x32xf32>
    %188 = tpu.reciprocal %187 {approx = true} : vector<16x32xf32> -> vector<16x32xf32>
    %189 = vector.extract_strided_slice %167 {offsets = [0, 64], sizes = [16, 32], strides = [1, 1]} : vector<16x96xf32> to vector<16x32xf32>
    %190 = vector.extract_strided_slice %170 {offsets = [0, 64], sizes = [16, 32], strides = [1, 1]} : vector<16x96xf32> to vector<16x32xf32>
    %c0_168 = arith.constant 0 : index
    %c0_169 = arith.constant 0 : index
    %191 = vector.load %arg15[%c0_168, %c0_169] : memref<1x32xf32, #tpu.memory_space<vmem>>, vector<1x32xf32>
    %192 = vector.broadcast %191 : vector<1x32xf32> to vector<16x32xf32>
    %193 = arith.addf %190, %192 : vector<16x32xf32>
    %194 = arith.mulf %179, %193 : vector<16x32xf32>
    %195 = arith.addf %189, %194 : vector<16x32xf32>
    %196 = math.tanh %195 : vector<16x32xf32>
    %cst_170 = arith.constant 1.000000e+00 : f32
    %197 = vector.broadcast %cst_170 : f32 to vector<16x32xf32>
    %198 = arith.subf %197, %188 : vector<16x32xf32>
    %199 = arith.mulf %198, %196 : vector<16x32xf32>
    %200 = arith.mulf %188, %161 : vector<16x32xf32>
    %201 = arith.addf %199, %200 : vector<16x32xf32>
    %202 = arith.truncf %201 : vector<16x32xf32> to vector<16x32xbf16>
    %c0_171 = arith.constant 0 : index
    %c0_172 = arith.constant 0 : index
    %203 = vector.load %arg16[%c0_171, %c0_172] : memref<32x128xbf16, #tpu.memory_space<vmem>>, vector<32x128xbf16>
    %cst_173 = arith.constant dense<0.000000e+00> : vector<16x128xf32>
    %204 = tpu.matmul %202, %203, %cst_173 {dimension_numbers = #tpu.dot_dimension_numbers<[1], [0], [0], [1], [0, 0, 1, 1], [], []>} : vector<16x32xbf16>, vector<32x128xbf16>, vector<16x128xf32> -> vector<16x128xf32>
    %c0_174 = arith.constant 0 : index
    %c0_175 = arith.constant 0 : index
    %205 = vector.load %arg17[%c0_174, %c0_175] : memref<1x128xf32, #tpu.memory_space<vmem>>, vector<1x128xf32>
    %206 = vector.broadcast %205 : vector<1x128xf32> to vector<16x128xf32>
    %207 = arith.addf %204, %206 : vector<16x128xf32>
    %c0_176 = arith.constant 0 : index
    %c0_177 = arith.constant 0 : index
    %208 = vector.load %arg18[%c0_176, %c0_177] : memref<16x128xf32, #tpu.memory_space<vmem>>, vector<16x128xf32>
    tpu.vector_store %arg18[%c0_176, %c0_177], %207 {strides = array<i32>} : memref<16x128xf32, #tpu.memory_space<vmem>>, vector<16x128xf32>,
    %cst_178 = arith.constant 0.000000e+00 : f32
    %209 = vector.broadcast %cst_178 : f32 to vector<16x96xf32>
    %210 = tpu.concatenate %201, %209 in 1 : vector<16x32xf32>, vector<16x96xf32> -> vector<16x128xf32>
    %c0_179 = arith.constant 0 : index
    %c0_180 = arith.constant 0 : index
    %211 = vector.load %arg19[%c0_179, %c0_180] : memref<16x128xf32, #tpu.memory_space<vmem>>, vector<16x128xf32>
    tpu.vector_store %arg19[%c0_179, %c0_180], %210 {strides = array<i32>} : memref<16x128xf32, #tpu.memory_space<vmem>>, vector<16x128xf32>,
    return
  }
  func.func @transform_0(%arg0: i32) -> (i32, i32) {
    %c0_i32 = arith.constant 0 : i32
    %c0_i32_0 = arith.constant 0 : i32
    return %arg0, %c0_i32 : i32, i32
  }
  func.func @transform_1(%arg0: i32) -> (i32, i32) {
    %c0_i32 = arith.constant 0 : i32
    %c0_i32_0 = arith.constant 0 : i32
    return %arg0, %c0_i32 : i32, i32
  }
  func.func @transform_2(%arg0: i32) -> (i32, i32) {
    %c0_i32 = arith.constant 0 : i32
    %c0_i32_0 = arith.constant 0 : i32
    return %arg0, %c0_i32 : i32, i32
  }
  func.func @transform_3(%arg0: i32) -> (i32, i32, i32) {
    %c0_i32 = arith.constant 0 : i32
    %c0_i32_0 = arith.constant 0 : i32
    %c0_i32_1 = arith.constant 0 : i32
    %c0_i32_2 = arith.constant 0 : i32
    return %c0_i32, %c0_i32_0, %c0_i32_1 : i32, i32, i32
  }
  func.func @transform_4(%arg0: i32) -> (i32, i32, i32) {
    %c0_i32 = arith.constant 0 : i32
    %c0_i32_0 = arith.constant 0 : i32
    %c0_i32_1 = arith.constant 0 : i32
    %c0_i32_2 = arith.constant 0 : i32
    return %c0_i32, %c0_i32_0, %c0_i32_1 : i32, i32, i32
  }
  func.func @transform_5(%arg0: i32) -> (i32, i32, i32) {
    %c0_i32 = arith.constant 0 : i32
    %c0_i32_0 = arith.constant 0 : i32
    %c0_i32_1 = arith.constant 0 : i32
    %c0_i32_2 = arith.constant 0 : i32
    return %c0_i32, %c0_i32_0, %c0_i32_1 : i32, i32, i32
  }
  func.func @transform_6(%arg0: i32) -> (i32, i32, i32) {
    %c0_i32 = arith.constant 0 : i32
    %c0_i32_0 = arith.constant 0 : i32
    %c0_i32_1 = arith.constant 0 : i32
    %c0_i32_2 = arith.constant 0 : i32
    return %c0_i32, %c0_i32_0, %c0_i32_1 : i32, i32, i32
  }
  func.func @transform_7(%arg0: i32) -> (i32, i32) {
    %c0_i32 = arith.constant 0 : i32
    %c0_i32_0 = arith.constant 0 : i32
    %c0_i32_1 = arith.constant 0 : i32
    return %c0_i32, %c0_i32_0 : i32, i32
  }
  func.func @transform_8(%arg0: i32) -> (i32, i32, i32) {
    %c0_i32 = arith.constant 0 : i32
    %c0_i32_0 = arith.constant 0 : i32
    %c0_i32_1 = arith.constant 0 : i32
    %c0_i32_2 = arith.constant 0 : i32
    return %c0_i32, %c0_i32_0, %c0_i32_1 : i32, i32, i32
  }
  func.func @transform_9(%arg0: i32) -> (i32, i32) {
    %c0_i32 = arith.constant 0 : i32
    %c0_i32_0 = arith.constant 0 : i32
    %c0_i32_1 = arith.constant 0 : i32
    return %c0_i32, %c0_i32_0 : i32, i32
  }
  func.func @transform_10(%arg0: i32) -> (i32, i32) {
    %c0_i32 = arith.constant 0 : i32
    %c0_i32_0 = arith.constant 0 : i32
    %c0_i32_1 = arith.constant 0 : i32
    return %c0_i32, %c0_i32_0 : i32, i32
  }
  func.func @transform_11(%arg0: i32) -> (i32, i32) {
    %c0_i32 = arith.constant 0 : i32
    %c0_i32_0 = arith.constant 0 : i32
    %c0_i32_1 = arith.constant 0 : i32
    return %c0_i32, %c0_i32_0 : i32, i32
  }
  func.func @transform_12(%arg0: i32) -> (i32, i32) {
    %c0_i32 = arith.constant 0 : i32
    %c0_i32_0 = arith.constant 0 : i32
    %c0_i32_1 = arith.constant 0 : i32
    return %c0_i32, %c0_i32_0 : i32, i32
  }
  func.func @transform_13(%arg0: i32) -> (i32, i32) {
    %c0_i32 = arith.constant 0 : i32
    %c0_i32_0 = arith.constant 0 : i32
    %c0_i32_1 = arith.constant 0 : i32
    return %c0_i32, %c0_i32_0 : i32, i32
  }
  func.func @transform_14(%arg0: i32) -> (i32, i32) {
    %c0_i32 = arith.constant 0 : i32
    %c0_i32_0 = arith.constant 0 : i32
    %c0_i32_1 = arith.constant 0 : i32
    return %c0_i32, %c0_i32_0 : i32, i32
  }
  func.func @transform_15(%arg0: i32) -> (i32, i32) {
    %c0_i32 = arith.constant 0 : i32
    %c0_i32_0 = arith.constant 0 : i32
    %c0_i32_1 = arith.constant 0 : i32
    return %c0_i32, %c0_i32_0 : i32, i32
  }
  func.func @transform_16(%arg0: i32) -> (i32, i32) {
    %c0_i32 = arith.constant 0 : i32
    %c0_i32_0 = arith.constant 0 : i32
    %c0_i32_1 = arith.constant 0 : i32
    return %c0_i32, %c0_i32_0 : i32, i32
  }
  func.func @transform_17(%arg0: i32) -> (i32, i32) {
    %c0_i32 = arith.constant 0 : i32
    %c0_i32_0 = arith.constant 0 : i32
    return %arg0, %c0_i32 : i32, i32
  }
  func.func @transform_18(%arg0: i32) -> (i32, i32) {
    %c0_i32 = arith.constant 0 : i32
    %c0_i32_0 = arith.constant 0 : i32
    return %arg0, %c0_i32 : i32, i32
  }
}

</mosaic_0001>

<bundles_post_ra>
// kernel: ppo_actor_forward.1
= control target key start
LH: loop header
LB: loop body
LE: loop exit
PB: predicated region body
PF: predicated region fallthrough
CT: control target
= control target key end

     0   :  { %v9503_v1 = vmov 0   ;;  %vm230_vm0 = vcmask 1041408   ;;  %vm196_vm1 = vcmask 424960   ;;  %vm4968_vm2 = vcmask 1043456   ;;  %s9506_s26 = smov 64   ;;  %s9508_s20 = smov 32   ;;  %s11893_s3 = inlined_call_operand.vmem [shape: bf16[3,52,256], index: 3, kind: input, shape index: {}]   ;;  %s11894_s0 = inlined_call_operand.vmem [shape: bf16[208,52], index: 0, kind: input, shape index: {}]   ;;  %s11895_s4 = inlined_call_operand.vmem [shape: bf16[3,256,256], index: 4, kind: input, shape index: {}]   ;;  %s11896_s7 = inlined_call_operand.vmem [shape: f32[4,256], index: 7, kind: input, shape index: {}]   ;;  %s11897_s5 = inlined_call_operand.vmem [shape: bf16[3,256,256], index: 5, kind: input, shape index: {}]   ;;  %s11898_s6 = inlined_call_operand.vmem [shape: bf16[3,256,256], index: 6, kind: input, shape index: {}]   ;;  %s11899_s8 = inlined_call_operand.vmem [shape: bf16[13,256,32], index: 8, kind: input, shape index: {}]   ;;  %s11900_s9 = inlined_call_operand.vmem [shape: bf16[8,32], index: 9, kind: input, shape index: {}]   ;;  %s11901_s1 = inlined_call_operand.vmem [shape: f32[16,8], index: 1, kind: input, shape index: {}]   ;;  %s11902_s11 = inlined_call_operand.vmem [shape: bf16[32,96], index: 11, kind: input, shape index: {}]   ;;  %s11903_s12 = inlined_call_operand.vmem [shape: bf16[32,96], index: 12, kind: input, shape index: {}]   ;;  %s11904_s14 = inlined_call_operand.vmem [shape: f32[1,32], index: 14, kind: input, shape index: {}]   ;;  %s11905_s10 = inlined_call_operand.vmem [shape: f32[1,32], index: 10, kind: input, shape index: {}]   ;;  %s11906_s2 = inlined_call_operand.vmem [shape: f32[16,32], index: 2, kind: input, shape index: {}]   ;;  %s11907_s13 = inlined_call_operand.vmem [shape: f32[1,96], index: 13, kind: input, shape index: {}]   ;;  %s11908_s15 = inlined_call_operand.vmem [shape: bf16[32,128], index: 15, kind: input, shape index: {}]   ;;  %s11909_s18 = inlined_call_operand.vmem [shape: f32[16,128], index: 18, kind: output, shape index: {1}]   ;;  %s11910_s16 = inlined_call_operand.vmem [shape: f32[1,128], index: 16, kind: input, shape index: {}]   ;;  %s11911_s17 = inlined_call_operand.vmem [shape: f32[16,128], index: 17, kind: output, shape index: {0}]  }
   0x1   :  { %11915 = sst [smem:[#allocation4_spill]] %s11893_s3  ;;  %269 = vmatprep.mubr.bf16.mxu0 %v9503_v1  ;;  %vm9505_vm3 = vmmov 0   ;;  %vm4964_vm4 = vcmask 64512   ;;  %vm6790_vm5 = vcmask 261120  }
   0x2   :  { %11916 = sst [smem:[#allocation5_spill]] %s11894_s0  ;;  %s11918_s29 = sld [smem:[#allocation4_spill]] }
   0x3   :  { %11917 = sst [smem:[#allocation6_spill]] %s11895_s4  ;;  %s11919_s19 = sld [smem:[#allocation5_spill]] }
   0x4   :  { %s11920_s28 = sld [smem:[#allocation6_spill]] }
   0x8   :  { %v8821_v0 = vld [vmem:[%s11918_s29 + $0x3c] ss:$8 sps:$4 sm:$0xff]   ;;  %v8823_v2 = vld [vmem:[%s11918_s29 + $0x38] ss:$8 sps:$4 sm:$0xff]   ;;  %v8824_v3 = vld [vmem:[%s11918_s29 + $0x4c] ss:$8 sps:$4 sm:$0xff]  }
   0x9   :  { %237 = vmatprep.subr.bf16.mxu0 %v8821_v0  ;;  %v8826_v4 = vld [vmem:[%s11918_s29 + $0x48] ss:$8 sps:$4 sm:$0xff]   ;;  %v8827_v5 = vld [vmem:[%s11918_s29 + $0x5c] ss:$8 sps:$4 sm:$0xff]   ;;  %v8829_v7 = vld [vmem:[%s11918_s29 + $0x58] ss:$8 sps:$4 sm:$0xff]  }
   0xa   :  { %238 = vmatpush1.bf16.msra.mxu0 %v8823_v2  ;;  %v7064_v6 = vld [vmem:[%s11918_s29 + $0x68] sm:$0x33]  ;;  %v8840_v14 = vld [vmem:[%s11918_s29 + $0x14] ss:$8 sps:$4 sm:$0xff]   ;;  %v8838_v16 = vld [vmem:[%s11918_s29 + $0x10] ss:$8 sps:$4 sm:$0xff]  }
   0xb   :  { %239 = vmatprep.subr.bf16.mxu0 %v8824_v3  ;;  %v7083_v8 = vcombine.high %v7064_v6, %v7064_v6  ;;  %v7082_v9 = vcombine.low %v7064_v6, %v7064_v6  ;;  %v8835_v10 = vld [vmem:[%s11918_s29 + $0x4] ss:$8 sps:$4 sm:$0xff]   ;;  %v8833_v13 = vld [vmem:[%s11918_s29] ss:$8 sps:$4 sm:$0xff]   ;;  %v95_v15 = vld [vmem:[%s11918_s29 + $0x30] sm:$0x33] }
   0xc   :  { %v9634_v12 = vld [vmem:[%s11919_s19 + $0x8] sm:$0xff]   ;;  %v7103_v18 = vcombine.low %v95_v15, %v95_v15  ;;  %v8836_v19 = vld [vmem:[%s11919_s19 + $0x10] sm:$0xff]   ;;  %v7104_v21 = vcombine.high %v95_v15, %v95_v15  ;;  %v8837_v24 = vld [vmem:[%s11919_s19 + $0x18] sm:$0xff]  }
   0xd   :  { %v232_v11 = vsel %vm230_vm0, %v7082_v9, 0  ;;  %v8846_v17 = vld [vmem:[%s11918_s29 + $0x24] ss:$8 sps:$4 sm:$0xff]   ;;  %v8844_v20 = vld [vmem:[%s11918_s29 + $0x20] ss:$8 sps:$4 sm:$0xff]   ;;  %v8843_v27 = vld [vmem:[%s11919_s19 + $0x30] sm:$0xff]  }
   0xe   :  { %240 = vmatpush1.bf16.msra.mxu0 %v8826_v4  ;;  %v424_v22 = vsel %vm230_vm0, %v7103_v18, 0  ;;  %v8857_v23 = vld [vmem:[%s11918_s29 + $0x74] ss:$8 sps:$4 sm:$0xff]   ;;  %v8841_v25 = vld [vmem:[%s11919_s19 + $0x20] sm:$0xff]   ;;  %v8842_v26 = vld [vmem:[%s11919_s19 + $0x28] sm:$0xff]  }
   0xf   :  { %241 = vmatprep.subr.bf16.mxu0 %v8827_v5  ;;  %v9690_v28 = vld [vmem:[%s11919_s19 + $0x38] sm:$0xff]   ;;  %v9698_v29 = vld [vmem:[%s11919_s19 + $0x40] sm:$0xff]   ;;  %v9706_v30 = vld [vmem:[%s11919_s19 + $0x48] sm:$0xff]  }
  0x10   :  { %v9714_v31 = vld [vmem:[%s11919_s19 + $0x50] sm:$0xff]   ;;  %v8853_v32 = vld [vmem:[%s11919_s19 + $0x58] sm:$0xff]   ;;  %v8854_v33 = vld [vmem:[%s11919_s19] sm:$0xff]  }
  0x11   :  { %v8855_v34 = vld [vmem:[%s11918_s29 + $0x70] ss:$8 sps:$4 sm:$0xff]   ;;  %v8860_v35 = vld [vmem:[%s11918_s29 + $0x84] ss:$8 sps:$4 sm:$0xff]   ;;  %v8858_v36 = vld [vmem:[%s11918_s29 + $0x80] ss:$8 sps:$4 sm:$0xff]  }
  0x12   :  { %242 = vmatpush1.bf16.msra.mxu0 %v8829_v7  ;;  %v8863_v37 = vld [vmem:[%s11918_s29 + $0x94] ss:$8 sps:$4 sm:$0xff]   ;;  %v7123_v38 = vld [vmem:[%s11918_s29 + $0xa0] sm:$0x33]  ;;  %v8861_v39 = vld [vmem:[%s11918_s29 + $0x90] ss:$8 sps:$4 sm:$0xff]  }
  0x13   :  { %7084 = vmatprep.subr.msk.bf16.mxu0 %vm230_vm0, %v7083_v8  ;;  %v7142_v40 = vcombine.high %v7123_v38, %v7123_v38  ;;  %v7141_v41 = vcombine.low %v7123_v38, %v7123_v38  ;;  %v8877_v43 = vld [vmem:[%s11920_s28 + $0x104] ss:$8 sps:$4 sm:$0xff]   ;;  %v8879_v44 = vld [vmem:[%s11920_s28 + $0x100] ss:$8 sps:$4 sm:$0xff]   ;;  %v8880_v45 = vld [vmem:[%s11920_s28 + $0x114] ss:$8 sps:$4 sm:$0xff]  }
  0x14   :  { %1311 = vmatprep.subr.bf16.mxu1 %v8877_v43  ;;  %v8882_v46 = vld [vmem:[%s11920_s28 + $0x110] ss:$8 sps:$4 sm:$0xff]   ;;  %v8883_v47 = vld [vmem:[%s11920_s28 + $0x124] ss:$8 sps:$4 sm:$0xff]   ;;  %v8885_v48 = vld [vmem:[%s11920_s28 + $0x120] ss:$8 sps:$4 sm:$0xff]  }
  0x15   :  { %v726_v42 = vsel %vm230_vm0, %v7141_v41, 0  ;;  %1312 = vmatpush1.bf16.msra.mxu1 %v8879_v44  ;;  %v8886_v49 = vld [vmem:[%s11920_s28 + $0x134] ss:$8 sps:$4 sm:$0xff]   ;;  %v8888_v50 = vld [vmem:[%s11920_s28 + $0x130] ss:$8 sps:$4 sm:$0xff]   ;;  %v8868_v9 = vld [vmem:[%s11919_s19 + $0x20] sm:$0xff]  }
  0x16   :  { %244 = vmatpush1.bf16.msra.mxu0 %v232_v11  ;;  %1313 = vmatprep.subr.bf16.mxu1 %v8880_v45  ;;  %v8889_v51 = vld [vmem:[%s11920_s28 + $0x144] ss:$8 sps:$4 sm:$0xff]   ;;  %v8891_v52 = vld [vmem:[%s11920_s28 + $0x140] ss:$8 sps:$4 sm:$0xff]   ;;  %v8892_v53 = vld [vmem:[%s11920_s28 + $0x154] ss:$8 sps:$4 sm:$0xff]  }
  0x17   :  { %429 = vmatprep.subr.bf16.mxu0 %v8835_v10  ;;  %v8894_v54 = vld [vmem:[%s11920_s28 + $0x150] ss:$8 sps:$4 sm:$0xff]   ;;  %v8895_v55 = vld [vmem:[%s11920_s28 + $0x164] ss:$8 sps:$4 sm:$0xff]   ;;  %v8897_v56 = vld [vmem:[%s11920_s28 + $0x160] ss:$8 sps:$4 sm:$0xff]  }
  0x18   :  { %v8898_v57 = vld [vmem:[%s11920_s28 + $0x174] ss:$8 sps:$4 sm:$0xff]   ;;  %v8900_v58 = vld [vmem:[%s11920_s28 + $0x170] ss:$8 sps:$4 sm:$0xff]   ;;  %v8901_v59 = vld [vmem:[%s11920_s28 + $0x184] ss:$8 sps:$4 sm:$0xff]  }
  0x19   :  { %7085 = vmatmul.mubr.msk.bf16.vlgmr.msra.gmra.mrb[0].mxu0 %vm196_vm1, %v9634_v12  ;;  %1314 = vmatpush1.bf16.msra.mxu1 %v8882_v46  ;;  %v8903_v60 = vld [vmem:[%s11920_s28 + $0x180] ss:$8 sps:$4 sm:$0xff]   ;;  %v8904_v61 = vld [vmem:[%s11920_s28 + $0x194] ss:$8 sps:$4 sm:$0xff]   ;;  %v8906_v62 = vld [vmem:[%s11920_s28 + $0x190] ss:$8 sps:$4 sm:$0xff]  }
  0x1a   :  { %430 = vmatpush1.bf16.msra.mxu0 %v8833_v13  ;;  %279 = vmatprep.mubr.bf16.mxu0 %v9503_v1  ;;  %v8907_v63 = vld [vmem:[%s11920_s28 + $0x1a4] ss:$8 sps:$4 sm:$0xff]   ;;  %v8909_v0 = vld [vmem:[%s11920_s28 + $0x1a0] ss:$8 sps:$4 sm:$0xff]   ;;  %v8910_v2 = vld [vmem:[%s11920_s28 + $0x1b4] ss:$8 sps:$4 sm:$0xff]  }
  0x1b   :  { %431 = vmatprep.subr.bf16.mxu0 %v8840_v14  ;;  %1315 = vmatprep.subr.bf16.mxu1 %v8883_v47  ;;  %v8866_v3 = vld [vmem:[%s11919_s19 + $0x10] sm:$0xff]   ;;  %v8913_v5 = vld [vmem:[%s11920_s28 + $0x1c4] ss:$8 sps:$4 sm:$0xff]   ;;  %v8915_v6 = vld [vmem:[%s11920_s28 + $0x1c0] ss:$8 sps:$4 sm:$0xff]  }
  0x1c   :  { %v8912_v4 = vld [vmem:[%s11920_s28 + $0x1b0] ss:$8 sps:$4 sm:$0xff]   ;;  %v8916_v7 = vld [vmem:[%s11920_s28 + $0x1d4] ss:$8 sps:$4 sm:$0xff]   ;;  %v8869_v10 = vld [vmem:[%s11919_s19 + $0x28] sm:$0xff]  }
  0x1d   :  { %1316 = vmatpush1.bf16.msra.mxu1 %v8885_v48  ;;  %v8867_v8 = vld [vmem:[%s11919_s19 + $0x18] sm:$0xff]   ;;  %v8870_v11 = vld [vmem:[%s11919_s19 + $0x30] sm:$0xff]   ;;  %v8872_v13 = vld [vmem:[%s11919_s19 + $0x40] sm:$0xff]  }
  0x1e   :  { %432 = vmatpush1.bf16.msra.mxu0 %v8838_v16  ;;  %1317 = vmatprep.subr.bf16.mxu1 %v8886_v49  ;;  %v8873_v14 = vld [vmem:[%s11919_s19 + $0x48] sm:$0xff]   ;;  %v8874_v15 = vld [vmem:[%s11919_s19 + $0x50] sm:$0xff]   ;;  %v8875_v16 = vld [vmem:[%s11919_s19 + $0x58] sm:$0xff]  }
  0x1f   :  { %433 = vmatprep.subr.bf16.mxu0 %v8846_v17  ;;  %v8876_v17 = vld [vmem:[%s11919_s19 + $0x60] sm:$0xff]   ;;  %v8918_v18 = vld [vmem:[%s11920_s28 + $0x1d0] ss:$8 sps:$4 sm:$0xff]   ;;  %v8930_v49 = vld [vmem:[%s11920_s28 + $0x14] ss:$8 sps:$4 sm:$0xff]  }
  0x20   :  { %v8925_v46 = vld [vmem:[%s11920_s28] ss:$8 sps:$4 sm:$0xff]  }
  0x21   :  { %7086 = vmatmul.mubr.msk.bf16.gmra.mrb[4].mxu0 %vm196_vm1, %v8836_v19  ;;  %1318 = vmatpush1.bf16.msra.mxu1 %v8888_v50 }
  0x22   :  { %289 = vmatprep.mubr.bf16.mxu0 %v9503_v1  ;;  %434 = vmatpush1.bf16.msra.mxu0 %v8844_v20  ;;  %v8921_v20 = vld [vmem:[%s11920_s28 + $0x1e0] ss:$8 sps:$4 sm:$0xff]  }
  0x23   :  { %7105 = vmatprep.subr.msk.bf16.mxu0 %vm230_vm0, %v7104_v21  ;;  %1319 = vmatprep.subr.bf16.mxu1 %v8889_v51  ;;  %v8922_v21 = vld [vmem:[%s11920_s28 + $0x1f4] ss:$8 sps:$4 sm:$0xff]  }
  0x25   :  { %1320 = vmatpush1.bf16.msra.mxu1 %v8891_v52 }
  0x26   :  { %436 = vmatpush1.bf16.msra.mxu0 %v424_v22  ;;  %1321 = vmatprep.subr.bf16.mxu1 %v8892_v53  ;;  %v8924_v22 = vld [vmem:[%s11920_s28 + $0x1f0] ss:$8 sps:$4 sm:$0xff]  }
  0x27   :  { %731 = vmatprep.subr.bf16.mxu0 %v8857_v23  ;;  %v8927_v23 = vld [vmem:[%s11920_s28 + $0x4] ss:$8 sps:$4 sm:$0xff]  }
  0x29   :  { %7087 = vmatmul.mubr.msk.bf16.gmra.mrb[8].mxu0 %vm196_vm1, %v8837_v24  ;;  %1322 = vmatpush1.bf16.msra.mxu1 %v8894_v54 }
  0x2a   :  { %299 = vmatprep.mubr.bf16.mxu0 %v9503_v1  ;;  %1323 = vmatprep.subr.bf16.mxu1 %v8895_v55  ;;  %v8928_v55 = vld [vmem:[%s11920_s28 + $0x10] ss:$8 sps:$4 sm:$0xff]  }
  0x2d   :  { %1324 = vmatpush1.bf16.msra.mxu1 %v8897_v56 }
  0x2e   :  { %1325 = vmatprep.subr.bf16.mxu1 %v8898_v57 }
  0x31   :  { %7088 = vmatmul.mubr.msk.bf16.gmra.mrb[12].mxu0 %vm196_vm1, %v8841_v25  ;;  %1326 = vmatpush1.bf16.msra.mxu1 %v8900_v58  ;;  %v8933_v58 = vld [vmem:[%s11920_s28 + $0x24] ss:$8 sps:$4 sm:$0xff]  }
  0x32   :  { %309 = vmatprep.mubr.bf16.mxu0 %v9503_v1  ;;  %1327 = vmatprep.subr.bf16.mxu1 %v8901_v59 }
  0x35   :  { %1328 = vmatpush1.bf16.msra.mxu1 %v8903_v60 }
  0x36   :  { %1329 = vmatprep.subr.bf16.mxu1 %v8904_v61 }
  0x39   :  { %7089 = vmatmul.mubr.msk.bf16.gmra.mrb[16].mxu0 %vm196_vm1, %v8842_v26  ;;  %1330 = vmatpush1.bf16.msra.mxu1 %v8906_v62 }
  0x3a   :  { %319 = vmatprep.mubr.bf16.mxu0 %v9503_v1  ;;  %1331 = vmatprep.subr.bf16.mxu1 %v8907_v63 }
  0x3d   :  { %1332 = vmatpush1.bf16.msra.mxu1 %v8909_v0  ;;  %v8931_v0 = vld [vmem:[%s11920_s28 + $0x20] ss:$8 sps:$4 sm:$0xff]  }
  0x3e   :  { %1333 = vmatprep.subr.bf16.mxu1 %v8910_v2 }
  0x41   :  { %7090 = vmatmul.mubr.msk.bf16.gmra.mrb[20].mxu0 %vm196_vm1, %v8843_v27  ;;  %1334 = vmatpush1.bf16.msra.mxu1 %v8912_v4  ;;  %v8936_v4 = vld [vmem:[%s11920_s28 + $0x34] ss:$8 sps:$4 sm:$0xff]  }
  0x42   :  { %329 = vmatprep.mubr.bf16.mxu0 %v9503_v1  ;;  %1335 = vmatprep.subr.bf16.mxu1 %v8913_v5 }
  0x45   :  { %1336 = vmatpush1.bf16.msra.mxu1 %v8915_v6 }
  0x46   :  { %1337 = vmatprep.subr.bf16.mxu1 %v8916_v7 }
  0x49   :  { %7091 = vmatmul.mubr.msk.bf16.gmra.mrb[24].mxu0 %vm196_vm1, %v9690_v28  ;;  %1338 = vmatpush1.bf16.msra.mxu1 %v8918_v18 }
  0x4a   :  { %339 = vmatprep.mubr.bf16.mxu0 %v9503_v1 }
  0x51   :  { %7092 = vmatmul.mubr.msk.bf16.gmra.mrb[28].mxu0 %vm196_vm1, %v9698_v29 }
  0x52   :  { %349 = vmatprep.mubr.bf16.mxu0 %v9503_v1 }
  0x59   :  { %7093 = vmatmul.mubr.msk.bf16.gmra.mrb[32].mxu0 %vm196_vm1, %v9706_v30 }
  0x5a   :  { %359 = vmatprep.mubr.bf16.mxu0 %v9503_v1 }
  0x61   :  { %7094 = vmatmul.mubr.msk.bf16.gmra.mrb[36].mxu0 %vm196_vm1, %v9714_v31 }
  0x62   :  { %369 = vmatprep.mubr.bf16.mxu0 %v9503_v1 }
  0x69   :  { %7095 = vmatmul.mubr.msk.bf16.gmra.mrb[40].mxu0 %vm196_vm1, %v8853_v32 }
  0x6a   :  { %461 = vmatprep.mubr.bf16.mxu0 %v9503_v1 }
  0x71   :  { %7106 = vmatmul.mubr.msk.bf16.vlgmr.msra.gmra.mrb[0].mxu0 %vm196_vm1, %v8854_v33 }
  0x72   :  { %732 = vmatpush1.bf16.msra.mxu0 %v8855_v34  ;;  %471 = vmatprep.mubr.bf16.mxu0 %v9503_v1 }
  0x73   :  { %733 = vmatprep.subr.bf16.mxu0 %v8860_v35 }
  0x76   :  { %734 = vmatpush1.bf16.msra.mxu0 %v8858_v36 }
  0x77   :  { %735 = vmatprep.subr.bf16.mxu0 %v8863_v37 }
  0x79   :  { %7107 = vmatmul.mubr.msk.bf16.gmra.mrb[4].mxu0 %vm196_vm1, %v9634_v12  ;;  %v8871_v12 = vld [vmem:[%s11919_s19 + $0x38] sm:$0xff]  }
  0x7a   :  { %481 = vmatprep.mubr.bf16.mxu0 %v9503_v1  ;;  %736 = vmatpush1.bf16.msra.mxu0 %v8861_v39 }
  0x7b   :  { %7143 = vmatprep.subr.msk.bf16.mxu0 %vm230_vm0, %v7142_v40 }
  0x7e   :  { %738 = vmatpush1.bf16.msra.mxu0 %v726_v42 }
  0x81   :  { %7108 = vmatmul.mubr.msk.bf16.gmra.mrb[8].mxu0 %vm196_vm1, %v8836_v19  ;;  %v8919_v19 = vld [vmem:[%s11920_s28 + $0x1e4] ss:$8 sps:$4 sm:$0xff]  }
  0x82   :  { %491 = vmatprep.mubr.bf16.mxu0 %v9503_v1  ;;  %1339 = vmatprep.subr.bf16.mxu1 %v8919_v19  ;;  %v8937_v19 = vld [vmem:[%s11920_s28 + $0x40] ss:$8 sps:$4 sm:$0xff]  }
  0x83   :  { %1340 = vmatpush1.bf16.msra.mxu1 %v8921_v20 }
  0x84   :  { %1341 = vmatprep.subr.bf16.mxu1 %v8922_v21 }
  0x87   :  { %1342 = vmatpush1.bf16.msra.mxu1 %v8924_v22  ;;  %v8942_v22 = vld [vmem:[%s11920_s28 + $0x54] ss:$8 sps:$4 sm:$0xff]  }
  0x88   :  { %1614 = vmatprep.subr.bf16.mxu1 %v8927_v23 }
  0x89   :  { %7109 = vmatmul.mubr.msk.bf16.gmra.mrb[12].mxu0 %vm196_vm1, %v8837_v24  ;;  %v920_v24 = vlaneseq }
  0x8a   :  { %501 = vmatprep.mubr.bf16.mxu0 %v9503_v1 }
  0x91   :  { %7110 = vmatmul.mubr.msk.bf16.gmra.mrb[16].mxu0 %vm196_vm1, %v8841_v25  ;;  %v921_v25 = vshrl.u32 %v920_v24, 7 }
  0x92   :  { %511 = vmatprep.mubr.bf16.mxu0 %v9503_v1 }
  0x99   :  { %7111 = vmatmul.mubr.msk.bf16.gmra.mrb[20].mxu0 %vm196_vm1, %v8842_v26  ;;  %v9927_v26 = vsub.s32 0, %v921_v25 }
  0x9a   :  { %521 = vmatprep.mubr.bf16.mxu0 %v9503_v1 }
  0xa1   :  { %7112 = vmatmul.mubr.msk.bf16.gmra.mrb[24].mxu0 %vm196_vm1, %v8843_v27  ;;  %v918_v27 = vld [vmem:[%s11896_s7] ss:$4 sm:$0x3] }
  0xa2   :  { %531 = vmatprep.mubr.bf16.mxu0 %v9503_v1 }
  0xa9   :  { %7113 = vmatmul.mubr.msk.bf16.gmra.mrb[28].mxu0 %vm196_vm1, %v9690_v28  ;;  %v9932_v28 = vsub.s32 1, %v921_v25 }
  0xaa   :  { %541 = vmatprep.mubr.bf16.mxu0 %v9503_v1 }
  0xb1   :  { %7114 = vmatmul.mubr.msk.bf16.gmra.mrb[32].mxu0 %vm196_vm1, %v9698_v29  ;;  %v9935_v29 = vrot.slane %v918_v27, %v9927_v26 }
  0xb2   :  { %551 = vmatprep.mubr.bf16.mxu0 %v9503_v1 }
  0xb9   :  { %7115 = vmatmul.mubr.msk.bf16.gmra.mrb[36].mxu0 %vm196_vm1, %v9706_v30  ;;  %v9938_v30 = vrot.slane %v918_v27, %v9932_v28 }
  0xba   :  { %561 = vmatprep.mubr.bf16.mxu0 %v9503_v1 }
  0xc1   :  { %7116 = vmatmul.mubr.msk.bf16.gmra.mrb[40].mxu0 %vm196_vm1, %v9714_v31 }
  0xc2   :  { %763 = vmatprep.mubr.bf16.mxu0 %v9503_v1 }
  0xc9   :  { %7144 = vmatmul.mubr.msk.bf16.vlgmr.msra.gmra.mrb[0].mxu0 %vm196_vm1, %v8866_v3 }
  0xca   :  { %773 = vmatprep.mubr.bf16.mxu0 %v9503_v1 }
  0xd1   :  { %7145 = vmatmul.mubr.msk.bf16.gmra.mrb[4].mxu0 %vm196_vm1, %v8867_v8 }
  0xd2   :  { %783 = vmatprep.mubr.bf16.mxu0 %v9503_v1 }
  0xd9   :  { %7146 = vmatmul.mubr.msk.bf16.gmra.mrb[8].mxu0 %vm196_vm1, %v8868_v9 }
  0xda   :  { %793 = vmatprep.mubr.bf16.mxu0 %v9503_v1 }
  0xe1   :  { %7147 = vmatmul.mubr.msk.bf16.gmra.mrb[12].mxu0 %vm196_vm1, %v8869_v10  ;;  %v8934_v10 = vld [vmem:[%s11920_s28 + $0x30] ss:$8 sps:$4 sm:$0xff]  }
  0xe2   :  { %803 = vmatprep.mubr.bf16.mxu0 %v9503_v1 }
  0xe9   :  { %7148 = vmatmul.mubr.msk.bf16.gmra.mrb[16].mxu0 %vm196_vm1, %v8870_v11 }
  0xea   :  { %813 = vmatprep.mubr.bf16.mxu0 %v9503_v1 }
  0xf1   :  { %7149 = vmatmul.mubr.msk.bf16.gmra.mrb[20].mxu0 %vm196_vm1, %v8871_v12 }
  0xf2   :  { %823 = vmatprep.mubr.bf16.mxu0 %v9503_v1 }
  0xf9   :  { %7150 = vmatmul.mubr.msk.bf16.gmra.mrb[24].mxu0 %vm196_vm1, %v8872_v13  ;;  %v8939_v13 = vld [vmem:[%s11920_s28 + $0x44] ss:$8 sps:$4 sm:$0xff]  }
  0xfa   :  { %833 = vmatprep.mubr.bf16.mxu0 %v9503_v1 }
 0x101   :  { %7151 = vmatmul.mubr.msk.bf16.gmra.mrb[28].mxu0 %vm196_vm1, %v8873_v14 }
 0x102   :  { %843 = vmatprep.mubr.bf16.mxu0 %v9503_v1 }
 0x109   :  { %7152 = vmatmul.mubr.msk.bf16.gmra.mrb[32].mxu0 %vm196_vm1, %v8874_v15 }
 0x10a   :  { %853 = vmatprep.mubr.bf16.mxu0 %v9503_v1 }
 0x111   :  { %7153 = vmatmul.mubr.msk.bf16.gmra.mrb[36].mxu0 %vm196_vm1, %v8875_v16 }
 0x112   :  { %863 = vmatprep.mubr.bf16.mxu0 %v9503_v1 }
 0x119   :  { %7154 = vmatmul.mubr.msk.bf16.gmra.mrb[40].mxu0 %vm196_vm1, %v8876_v17 }
 0x19c   :  { %v765_v31 = vpop.f32.mrb[0].mxu0 }
 0x19d   :  { %v930_v32 = vadd.f32 %v9935_v29, %v765_v31  ;;  %v767_v33 = vpop.f32.mrb[1].mxu0 }
 0x19e   :  { %v931_v34 = vadd.f32 %v9938_v30, %v767_v33  ;;  %v769_v35 = vpop.f32.mrb[2].mxu0 }
 0x19f   :  { %v932_v36 = vadd.f32 %v9935_v29, %v769_v35  ;;  %v771_v37 = vpop.f32.mrb[3].mxu0  ;;  %v974_v39 = vmax.f32 %v930_v32, 0.0  ;;  %v8940_v32 = vld [vmem:[%s11920_s28 + $0x50] ss:$8 sps:$4 sm:$0xff]   ;;  %v8945_v35 = vld [vmem:[%s11920_s28 + $0x64] ss:$8 sps:$4 sm:$0xff]  }
 0x1a0   :  { %v933_v38 = vadd.f32 %v9938_v30, %v771_v37  ;;  %v975_v41 = vmax.f32 %v931_v34, 0.0 }
 0x1a1   :  { %v976_v40 = vmax.f32 %v932_v36, 0.0 }
 0x1a2   :  { %v977_v42 = vmax.f32 %v933_v38, 0.0 }
 0x1a3   :  { %v9944_v43 = vpack.c.bf16 %v976_v40, %v974_v39 }
 0x1a4   :  { %v775_v44 = vpop.f32.mrb[4].mxu0  ;;  %v9946_v45 = vpack.c.bf16 %v977_v42, %v975_v41  ;;  %v8943_v41 = vld [vmem:[%s11920_s28 + $0x60] ss:$8 sps:$4 sm:$0xff]  }
 0x1a5   :  { %v934_v47 = vadd.f32 %v9935_v29, %v775_v44  ;;  %v777_v48 = vpop.f32.mrb[5].mxu0 }
 0x1a6   :  { %v935_v50 = vadd.f32 %v9938_v30, %v777_v48  ;;  %v779_v51 = vpop.f32.mrb[6].mxu0  ;;  %1343 = vmatprep.mubr.bf16.mxu1 %v9946_v45 }
 0x1a7   :  { %v936_v52 = vadd.f32 %v9935_v29, %v779_v51  ;;  %v781_v53 = vpop.f32.mrb[7].mxu0  ;;  %1344 = vmatmul.mubr.bf16.vlgmr.msra.gmra.mrb[0].mxu1 %v9944_v43  ;;  %v978_v56 = vmax.f32 %v934_v47, 0.0 }
 0x1a8   :  { %v937_v54 = vadd.f32 %v9938_v30, %v781_v53  ;;  %1615 = vmatpush1.bf16.msra.mxu1 %v8925_v46  ;;  %v979_v59 = vmax.f32 %v935_v50, 0.0  ;;  %v8948_v46 = vld [vmem:[%s11920_s28 + $0x74] ss:$8 sps:$4 sm:$0xff]  }
 0x1a9   :  { %v980_v57 = vmax.f32 %v936_v52, 0.0  ;;  %1616 = vmatprep.subr.bf16.mxu1 %v8930_v49  ;;  %v8946_v52 = vld [vmem:[%s11920_s28 + $0x70] ss:$8 sps:$4 sm:$0xff]  }
 0x1aa   :  { %v981_v60 = vmax.f32 %v937_v54, 0.0 }
 0x1ab   :  { %v9966_v61 = vpack.c.bf16 %v980_v57, %v978_v56 }
 0x1ac   :  { %v9968_v62 = vpack.c.bf16 %v981_v60, %v979_v59  ;;  %v785_v63 = vpop.f32.mrb[8].mxu0  ;;  %1617 = vmatpush1.bf16.msra.mxu1 %v8928_v55  ;;  %v8951_v55 = vld [vmem:[%s11920_s28 + $0x84] ss:$8 sps:$4 sm:$0xff]  }
 0x1ad   :  { %v938_v2 = vadd.f32 %v9935_v29, %v785_v63  ;;  %v787_v3 = vpop.f32.mrb[9].mxu0  ;;  %1618 = vmatprep.subr.bf16.mxu1 %v8933_v58  ;;  %v8949_v63 = vld [vmem:[%s11920_s28 + $0x80] ss:$8 sps:$4 sm:$0xff]  }
 0x1ae   :  { %v939_v5 = vadd.f32 %v9938_v30, %v787_v3  ;;  %v789_v6 = vpop.f32.mrb[10].mxu0  ;;  %1353 = vmatprep.mubr.bf16.mxu1 %v9968_v62  ;;  %v8954_v3 = vld [vmem:[%s11920_s28 + $0x94] ss:$8 sps:$4 sm:$0xff]  }
 0x1af   :  { %v940_v7 = vadd.f32 %v9935_v29, %v789_v6  ;;  %v791_v8 = vpop.f32.mrb[11].mxu0  ;;  %1354 = vmatmul.mubr.bf16.gmra.mrb[4].mxu1 %v9966_v61  ;;  %v982_v11 = vmax.f32 %v938_v2, 0.0 }
 0x1b0   :  { %v941_v9 = vadd.f32 %v9938_v30, %v791_v8  ;;  %1619 = vmatpush1.bf16.msra.mxu1 %v8931_v0  ;;  %v983_v14 = vmax.f32 %v939_v5, 0.0 }
 0x1b1   :  { %v984_v12 = vmax.f32 %v940_v7, 0.0  ;;  %1620 = vmatprep.subr.bf16.mxu1 %v8936_v4 }
 0x1b2   :  { %v985_v15 = vmax.f32 %v941_v9, 0.0  ;;  %v8952_v9 = vld [vmem:[%s11920_s28 + $0x90] ss:$8 sps:$4 sm:$0xff]  }
 0x1b3   :  { %v9988_v16 = vpack.c.bf16 %v984_v12, %v982_v11  ;;  %v8957_v12 = vld [vmem:[%s11920_s28 + $0xa4] ss:$8 sps:$4 sm:$0xff]  }
 0x1b4   :  { %v9990_v17 = vpack.c.bf16 %v985_v15, %v983_v14  ;;  %v795_v18 = vpop.f32.mrb[12].mxu0  ;;  %1621 = vmatpush1.bf16.msra.mxu1 %v8934_v10 }
 0x1b5   :  { %v942_v20 = vadd.f32 %v9935_v29, %v795_v18  ;;  %v797_v21 = vpop.f32.mrb[13].mxu0  ;;  %1622 = vmatprep.subr.bf16.mxu1 %v8939_v13 }
 0x1b6   :  { %v943_v23 = vadd.f32 %v9938_v30, %v797_v21  ;;  %v799_v24 = vpop.f32.mrb[14].mxu0  ;;  %1363 = vmatprep.mubr.bf16.mxu1 %v9990_v17 }
 0x1b7   :  { %v944_v25 = vadd.f32 %v9935_v29, %v799_v24  ;;  %v801_v27 = vpop.f32.mrb[15].mxu0  ;;  %1364 = vmatmul.mubr.bf16.gmra.mrb[8].mxu1 %v9988_v16  ;;  %v986_v33 = vmax.f32 %v942_v20, 0.0  ;;  %v8955_v20 = vld [vmem:[%s11920_s28 + $0xa0] ss:$8 sps:$4 sm:$0xff]  }
 0x1b8   :  { %v945_v31 = vadd.f32 %v9938_v30, %v801_v27  ;;  %1623 = vmatpush1.bf16.msra.mxu1 %v8937_v19  ;;  %v987_v36 = vmax.f32 %v943_v23, 0.0  ;;  %v8960_v23 = vld [vmem:[%s11920_s28 + $0xb4] ss:$8 sps:$4 sm:$0xff]  }
 0x1b9   :  { %v988_v34 = vmax.f32 %v944_v25, 0.0  ;;  %1624 = vmatprep.subr.bf16.mxu1 %v8942_v22 }
 0x1ba   :  { %v989_v37 = vmax.f32 %v945_v31, 0.0 }
 0x1bb   :  { %v10010_v38 = vpack.c.bf16 %v988_v34, %v986_v33  ;;  %v8958_v33 = vld [vmem:[%s11920_s28 + $0xb0] ss:$8 sps:$4 sm:$0xff]  }
 0x1bc   :  { %v10012_v39 = vpack.c.bf16 %v989_v37, %v987_v36  ;;  %v805_v40 = vpop.f32.mrb[16].mxu0  ;;  %1625 = vmatpush1.bf16.msra.mxu1 %v8940_v32  ;;  %v8963_v36 = vld [vmem:[%s11920_s28 + $0xc4] ss:$8 sps:$4 sm:$0xff]  }
 0x1bd   :  { %v946_v42 = vadd.f32 %v9935_v29, %v805_v40  ;;  %v807_v44 = vpop.f32.mrb[17].mxu0  ;;  %1626 = vmatprep.subr.bf16.mxu1 %v8945_v35 }
 0x1be   :  { %v947_v47 = vadd.f32 %v9938_v30, %v807_v44  ;;  %v809_v48 = vpop.f32.mrb[18].mxu0  ;;  %1373 = vmatprep.mubr.bf16.mxu1 %v10012_v39 }
 0x1bf   :  { %v948_v49 = vadd.f32 %v9935_v29, %v809_v48  ;;  %v811_v50 = vpop.f32.mrb[19].mxu0  ;;  %1374 = vmatmul.mubr.bf16.gmra.mrb[12].mxu1 %v10010_v38  ;;  %v990_v53 = vmax.f32 %v946_v42, 0.0 }
 0x1c0   :  { %v949_v51 = vadd.f32 %v9938_v30, %v811_v50  ;;  %1627 = vmatpush1.bf16.msra.mxu1 %v8943_v41  ;;  %v991_v56 = vmax.f32 %v947_v47, 0.0 }
 0x1c1   :  { %v992_v54 = vmax.f32 %v948_v49, 0.0  ;;  %1628 = vmatprep.subr.bf16.mxu1 %v8948_v46  ;;  %v8961_v46 = vld [vmem:[%s11920_s28 + $0xc0] ss:$8 sps:$4 sm:$0xff]   ;;  %v8966_v49 = vld [vmem:[%s11920_s28 + $0xd4] ss:$8 sps:$4 sm:$0xff]  }
 0x1c2   :  { %v993_v57 = vmax.f32 %v949_v51, 0.0 }
 0x1c3   :  { %v10032_v58 = vpack.c.bf16 %v992_v54, %v990_v53 }
 0x1c4   :  { %v10034_v59 = vpack.c.bf16 %v993_v57, %v991_v56  ;;  %v815_v60 = vpop.f32.mrb[20].mxu0  ;;  %1629 = vmatpush1.bf16.msra.mxu1 %v8946_v52 }
 0x1c5   :  { %v950_v0 = vadd.f32 %v9935_v29, %v815_v60  ;;  %v817_v2 = vpop.f32.mrb[21].mxu0  ;;  %1630 = vmatprep.subr.bf16.mxu1 %v8951_v55  ;;  %v8964_v55 = vld [vmem:[%s11920_s28 + $0xd0] ss:$8 sps:$4 sm:$0xff]   ;;  %v8969_v60 = vld [vmem:[%s11920_s28 + $0xe4] ss:$8 sps:$4 sm:$0xff]  }
 0x1c6   :  { %v951_v4 = vadd.f32 %v9938_v30, %v817_v2  ;;  %v819_v5 = vpop.f32.mrb[22].mxu0  ;;  %1383 = vmatprep.mubr.bf16.mxu1 %v10034_v59 }
 0x1c7   :  { %v952_v6 = vadd.f32 %v9935_v29, %v819_v5  ;;  %v821_v7 = vpop.f32.mrb[23].mxu0  ;;  %1384 = vmatmul.mubr.bf16.gmra.mrb[16].mxu1 %v10032_v58  ;;  %v994_v10 = vmax.f32 %v950_v0, 0.0  ;;  %v8967_v5 = vld [vmem:[%s11920_s28 + $0xe0] ss:$8 sps:$4 sm:$0xff]  }
 0x1c8   :  { %v953_v8 = vadd.f32 %v9938_v30, %v821_v7  ;;  %1631 = vmatpush1.bf16.msra.mxu1 %v8949_v63  ;;  %v995_v13 = vmax.f32 %v951_v4, 0.0 }
 0x1c9   :  { %v996_v11 = vmax.f32 %v952_v6, 0.0  ;;  %1632 = vmatprep.subr.bf16.mxu1 %v8954_v3 }
 0x1ca   :  { %v997_v14 = vmax.f32 %v953_v8, 0.0  ;;  %v8972_v8 = vld [vmem:[%s11920_s28 + $0xf4] ss:$8 sps:$4 sm:$0xff]  }
 0x1cb   :  { %v10054_v15 = vpack.c.bf16 %v996_v11, %v994_v10 }
 0x1cc   :  { %v10056_v18 = vpack.c.bf16 %v997_v14, %v995_v13  ;;  %v825_v19 = vpop.f32.mrb[24].mxu0  ;;  %1633 = vmatpush1.bf16.msra.mxu1 %v8952_v9  ;;  %v8970_v14 = vld [vmem:[%s11920_s28 + $0xf0] ss:$8 sps:$4 sm:$0xff]  }
 0x1cd   :  { %v954_v21 = vadd.f32 %v9935_v29, %v825_v19  ;;  %v827_v22 = vpop.f32.mrb[25].mxu0  ;;  %1634 = vmatprep.subr.bf16.mxu1 %v8957_v12 }
 0x1ce   :  { %v955_v24 = vadd.f32 %v9938_v30, %v827_v22  ;;  %v829_v25 = vpop.f32.mrb[26].mxu0  ;;  %1393 = vmatprep.mubr.bf16.mxu1 %v10056_v18 }
 0x1cf   :  { %v956_v27 = vadd.f32 %v9935_v29, %v829_v25  ;;  %v831_v31 = vpop.f32.mrb[27].mxu0  ;;  %1394 = vmatmul.mubr.bf16.gmra.mrb[20].mxu1 %v10054_v15  ;;  %v998_v34 = vmax.f32 %v954_v21, 0.0  ;;  %v8975_v21 = vld [vmem:[%s11920_s28 + $0x204] ss:$8 sps:$4 sm:$0xff]  }
 0x1d0   :  { %v957_v32 = vadd.f32 %v9938_v30, %v831_v31  ;;  %1635 = vmatpush1.bf16.msra.mxu1 %v8955_v20  ;;  %v999_v37 = vmax.f32 %v955_v24, 0.0 }
 0x1d1   :  { %v1000_v35 = vmax.f32 %v956_v27, 0.0  ;;  %1636 = vmatprep.subr.bf16.mxu1 %v8960_v23 }
 0x1d2   :  { %v1001_v40 = vmax.f32 %v957_v32, 0.0 }
 0x1d3   :  { %v10076_v41 = vpack.c.bf16 %v1000_v35, %v998_v34 }
 0x1d4   :  { %v10078_v42 = vpack.c.bf16 %v1001_v40, %v999_v37  ;;  %v835_v44 = vpop.f32.mrb[28].mxu0  ;;  %1637 = vmatpush1.bf16.msra.mxu1 %v8958_v33 }
 0x1d5   :  { %v958_v47 = vadd.f32 %v9935_v29, %v835_v44  ;;  %v837_v48 = vpop.f32.mrb[29].mxu0  ;;  %1638 = vmatprep.subr.bf16.mxu1 %v8963_v36 }
 0x1d6   :  { %v959_v50 = vadd.f32 %v9938_v30, %v837_v48  ;;  %v839_v51 = vpop.f32.mrb[30].mxu0  ;;  %1403 = vmatprep.mubr.bf16.mxu1 %v10078_v42 }
 0x1d7   :  { %v960_v52 = vadd.f32 %v9935_v29, %v839_v51  ;;  %v841_v53 = vpop.f32.mrb[31].mxu0  ;;  %1404 = vmatmul.mubr.bf16.gmra.mrb[24].mxu1 %v10076_v41  ;;  %v1002_v56 = vmax.f32 %v958_v47, 0.0 }
 0x1d8   :  { %v961_v54 = vadd.f32 %v9938_v30, %v841_v53  ;;  %1639 = vmatpush1.bf16.msra.mxu1 %v8961_v46  ;;  %v1003_v63 = vmax.f32 %v959_v50, 0.0 }
 0x1d9   :  { %v1004_v57 = vmax.f32 %v960_v52, 0.0  ;;  %1640 = vmatprep.subr.bf16.mxu1 %v8966_v49 }
 0x1da   :  { %v1005_v0 = vmax.f32 %v961_v54, 0.0 }
 0x1db   :  { %v10098_v2 = vpack.c.bf16 %v1004_v57, %v1002_v56 }
 0x1dc   :  { %v10100_v3 = vpack.c.bf16 %v1005_v0, %v1003_v63  ;;  %v845_v4 = vpop.f32.mrb[32].mxu0  ;;  %1641 = vmatpush1.bf16.msra.mxu1 %v8964_v55 }
 0x1dd   :  { %v962_v6 = vadd.f32 %v9935_v29, %v845_v4  ;;  %v847_v7 = vpop.f32.mrb[33].mxu0  ;;  %1642 = vmatprep.subr.bf16.mxu1 %v8969_v60 }
 0x1de   :  { %v963_v9 = vadd.f32 %v9938_v30, %v847_v7  ;;  %v849_v10 = vpop.f32.mrb[34].mxu0  ;;  %1413 = vmatprep.mubr.bf16.mxu1 %v10100_v3  ;;  %v8976_v7 = vld [vmem:[%s11920_s28 + $0x210] ss:$8 sps:$4 sm:$0xff]  }
 0x1df   :  { %v964_v11 = vadd.f32 %v9935_v29, %v849_v10  ;;  %v851_v12 = vpop.f32.mrb[35].mxu0  ;;  %1414 = vmatmul.mubr.bf16.gmra.mrb[28].mxu1 %v10098_v2  ;;  %v1006_v19 = vmax.f32 %v962_v6, 0.0  ;;  %v8982_v10 = vld [vmem:[%s11920_s28 + $0x230] ss:$8 sps:$4 sm:$0xff]  }
 0x1e0   :  { %v965_v13 = vadd.f32 %v9938_v30, %v851_v12  ;;  %1643 = vmatpush1.bf16.msra.mxu1 %v8967_v5  ;;  %v1007_v22 = vmax.f32 %v963_v9, 0.0  ;;  %v8979_v9 = vld [vmem:[%s11920_s28 + $0x220] ss:$8 sps:$4 sm:$0xff]  }
 0x1e1   :  { %v1008_v20 = vmax.f32 %v964_v11, 0.0  ;;  %1644 = vmatprep.subr.bf16.mxu1 %v8972_v8  ;;  %v8981_v8 = vld [vmem:[%s11920_s28 + $0x224] ss:$8 sps:$4 sm:$0xff]   ;;  %v8985_v12 = vld [vmem:[%s11920_s28 + $0x240] ss:$8 sps:$4 sm:$0xff]  }
 0x1e2   :  { %v1009_v23 = vmax.f32 %v965_v13, 0.0  ;;  %v8987_v11 = vld [vmem:[%s11920_s28 + $0x244] ss:$8 sps:$4 sm:$0xff]   ;;  %v8988_v13 = vld [vmem:[%s11920_s28 + $0x250] ss:$8 sps:$4 sm:$0xff]  }
 0x1e3   :  { %v10120_v24 = vpack.c.bf16 %v1008_v20, %v1006_v19  ;;  %v8991_v19 = vld [vmem:[%s11920_s28 + $0x260] ss:$8 sps:$4 sm:$0xff]   ;;  %v8996_v20 = vld [vmem:[%s11920_s28 + $0x274] ss:$8 sps:$4 sm:$0xff]  }
 0x1e4   :  { %v10122_v25 = vpack.c.bf16 %v1009_v23, %v1007_v22  ;;  %v855_v27 = vpop.f32.mrb[36].mxu0  ;;  %1645 = vmatpush1.bf16.msra.mxu1 %v8970_v14  ;;  %v8993_v14 = vld [vmem:[%s11920_s28 + $0x264] ss:$8 sps:$4 sm:$0xff]   ;;  %v8997_v23 = vld [vmem:[%s11920_s28 + $0x280] ss:$8 sps:$4 sm:$0xff]  }
 0x1e5   :  { %v966_v31 = vadd.f32 %v9935_v29, %v855_v27  ;;  %v857_v32 = vpop.f32.mrb[37].mxu0  ;;  %1972 = vmatprep.subr.bf16.mxu1 %v8975_v21  ;;  %v8994_v21 = vld [vmem:[%s11920_s28 + $0x270] ss:$8 sps:$4 sm:$0xff]   ;;  %v8999_v22 = vld [vmem:[%s11920_s28 + $0x284] ss:$8 sps:$4 sm:$0xff]  }
 0x1e6   :  { %v967_v33 = vadd.f32 %v9938_v30, %v857_v32  ;;  %v859_v34 = vpop.f32.mrb[38].mxu0  ;;  %1423 = vmatprep.mubr.bf16.mxu1 %v10122_v25  ;;  %v9002_v27 = vld [vmem:[%s11920_s28 + $0x294] ss:$8 sps:$4 sm:$0xff]   ;;  %v9005_v32 = vld [vmem:[%s11920_s28 + $0x2a4] ss:$8 sps:$4 sm:$0xff]  }
 0x1e7   :  { %v968_v35 = vadd.f32 %v9935_v29, %v859_v34  ;;  %v861_v36 = vpop.f32.mrb[39].mxu0  ;;  %1424 = vmatmul.mubr.bf16.gmra.mrb[32].mxu1 %v10120_v24  ;;  %v1010_v40 = vmax.f32 %v966_v31, 0.0  ;;  %v9000_v31 = vld [vmem:[%s11920_s28 + $0x290] ss:$8 sps:$4 sm:$0xff]   ;;  %v9008_v34 = vld [vmem:[%s11920_s28 + $0x2b4] ss:$8 sps:$4 sm:$0xff]  }
 0x1e8   :  { %v969_v37 = vadd.f32 %v9938_v30, %v861_v36  ;;  %v1011_v46 = vmax.f32 %v967_v33, 0.0  ;;  %v9003_v33 = vld [vmem:[%s11920_s28 + $0x2a0] ss:$8 sps:$4 sm:$0xff]   ;;  %v9011_v36 = vld [vmem:[%s11920_s28 + $0x2c4] ss:$8 sps:$4 sm:$0xff]  }
 0x1e9   :  { %v1012_v44 = vmax.f32 %v968_v35, 0.0  ;;  %v9006_v35 = vld [vmem:[%s11920_s28 + $0x2b0] ss:$8 sps:$4 sm:$0xff]  }
 0x1ea   :  { %v1013_v47 = vmax.f32 %v969_v37, 0.0  ;;  %v9021_v37 = vld [vmem:[%s11897_s5 + $0x100] ss:$8 sps:$4 sm:$0xff]  }
 0x1eb   :  { %v10130_v48 = vpack.c.bf16 %v1012_v44, %v1010_v40  ;;  %v9023_v40 = vld [vmem:[%s11897_s5 + $0x104] ss:$8 sps:$4 sm:$0xff]   ;;  %v9026_v44 = vld [vmem:[%s11897_s5 + $0x114] ss:$8 sps:$4 sm:$0xff]  }
 0x1ec   :  { %v10132_v49 = vpack.c.bf16 %v1013_v47, %v1011_v46  ;;  %v865_v50 = vpop.f32.mrb[40].mxu0  ;;  %v9009_v46 = vld [vmem:[%s11920_s28 + $0x2c0] ss:$8 sps:$4 sm:$0xff]   ;;  %2553 = vmatprep.subr.bf16.mxu0 %v9023_v40  ;;  %v9014_v47 = vld [vmem:[%s11920_s28 + $0x2d4] ss:$8 sps:$4 sm:$0xff]  }
 0x1ed   :  { %v970_v51 = vadd.f32 %v9935_v29, %v865_v50  ;;  %v867_v52 = vpop.f32.mrb[41].mxu0  ;;  %2554 = vmatpush1.bf16.msra.mxu0 %v9021_v37  ;;  %v9024_v50 = vld [vmem:[%s11897_s5 + $0x110] ss:$8 sps:$4 sm:$0xff]   ;;  %v9074_v37 = vld [vmem:[%s11897_s5 + $0x14] ss:$8 sps:$4 sm:$0xff]  }
 0x1ee   :  { %v971_v53 = vadd.f32 %v9938_v30, %v867_v52  ;;  %v869_v54 = vpop.f32.mrb[42].mxu0  ;;  %1433 = vmatprep.mubr.bf16.mxu1 %v10132_v49  ;;  %2555 = vmatprep.subr.bf16.mxu0 %v9026_v44  ;;  %v9012_v52 = vld [vmem:[%s11920_s28 + $0x2d0] ss:$8 sps:$4 sm:$0xff]  }
 0x1ef   :  { %v972_v55 = vadd.f32 %v9935_v29, %v869_v54  ;;  %v871_v56 = vpop.f32.mrb[43].mxu0  ;;  %1434 = vmatmul.mubr.bf16.gmra.mrb[36].mxu1 %v10130_v48  ;;  %v1014_v60 = vmax.f32 %v970_v51, 0.0  ;;  %v8973_v29 = vld [vmem:[%s11920_s28 + $0x200] ss:$8 sps:$4 sm:$0xff]   ;;  %v9029_v51 = vld [vmem:[%s11897_s5 + $0x124] ss:$8 sps:$4 sm:$0xff]  }
 0x1f0   :  { %v973_v57 = vadd.f32 %v9938_v30, %v871_v56  ;;  %v1015_v0 = vmax.f32 %v971_v53, 0.0  ;;  %v8978_v30 = vld [vmem:[%s11920_s28 + $0x214] ss:$8 sps:$4 sm:$0xff]   ;;  %v9017_v53 = vld [vmem:[%s11920_s28 + $0x2e4] ss:$8 sps:$4 sm:$0xff]  }
 0x1f1   :  { %v1016_v63 = vmax.f32 %v972_v55, 0.0  ;;  %2556 = vmatpush1.bf16.msra.mxu0 %v9024_v50  ;;  %v9027_v54 = vld [vmem:[%s11897_s5 + $0x120] ss:$8 sps:$4 sm:$0xff]   ;;  %v9032_v55 = vld [vmem:[%s11897_s5 + $0x134] ss:$8 sps:$4 sm:$0xff]  }
 0x1f2   :  { %v1017_v4 = vmax.f32 %v973_v57, 0.0  ;;  %2557 = vmatprep.subr.bf16.mxu0 %v9029_v51  ;;  %v9015_v56 = vld [vmem:[%s11920_s28 + $0x2e0] ss:$8 sps:$4 sm:$0xff]   ;;  %v9020_v57 = vld [vmem:[%s11920_s28 + $0x2f4] ss:$8 sps:$4 sm:$0xff]  }
 0x1f3   :  { %v10140_v5 = vpack.c.bf16 %v1016_v63, %v1014_v60  ;;  %v9030_v60 = vld [vmem:[%s11897_s5 + $0x130] ss:$8 sps:$4 sm:$0xff]   ;;  %v9035_v63 = vld [vmem:[%s11897_s5 + $0x144] ss:$8 sps:$4 sm:$0xff]  }
 0x1f4   :  { %v10142_v6 = vpack.c.bf16 %v1017_v4, %v1015_v0  ;;  %v9018_v0 = vld [vmem:[%s11920_s28 + $0x2f0] ss:$8 sps:$4 sm:$0xff]   ;;  %v9033_v4 = vld [vmem:[%s11897_s5 + $0x140] ss:$8 sps:$4 sm:$0xff]  }
 0x1f5   :  { %2558 = vmatpush1.bf16.msra.mxu0 %v9027_v54  ;;  %v9072_v51 = vld [vmem:[%s11897_s5 + $0x10] ss:$8 sps:$4 sm:$0xff]   ;;  %v9077_v54 = vld [vmem:[%s11897_s5 + $0x24] ss:$8 sps:$4 sm:$0xff]  }
 0x1f6   :  { %1443 = vmatprep.mubr.bf16.mxu1 %v10142_v6  ;;  %2559 = vmatprep.subr.bf16.mxu0 %v9032_v55 }
 0x1f7   :  { %1444 = vmatmul.mubr.bf16.gmra.mrb[40].mxu1 %v10140_v5 }
 0x1f8   :  { %1646 = vmatprep.mubr.bf16.mxu1 %v9503_v1 }
 0x1f9   :  { %2560 = vmatpush1.bf16.msra.mxu0 %v9030_v60 }
 0x1fa   :  { %2561 = vmatprep.subr.bf16.mxu0 %v9035_v63 }
 0x1fd   :  { %2562 = vmatpush1.bf16.msra.mxu0 %v9033_v4 }
 0x1ff   :  { %1647 = vmatmul.mubr.bf16.vlgmr.msra.gmra.mrb[0].mxu1 %v9503_v1 }
 0x200   :  { %1656 = vmatprep.mubr.bf16.mxu1 %v9946_v45  ;;  %1973 = vmatpush1.bf16.msra.mxu1 %v8973_v29  ;;  %v8984_v45 = vld [vmem:[%s11920_s28 + $0x234] ss:$8 sps:$4 sm:$0xff]  }
 0x201   :  { %1974 = vmatprep.subr.bf16.mxu1 %v8978_v30  ;;  %v9038_v29 = vld [vmem:[%s11897_s5 + $0x154] ss:$8 sps:$4 sm:$0xff]   ;;  %v9036_v30 = vld [vmem:[%s11897_s5 + $0x150] ss:$8 sps:$4 sm:$0xff]  }
 0x202   :  { %2563 = vmatprep.subr.bf16.mxu0 %v9038_v29 }
 0x203   :  { %2564 = vmatpush1.bf16.msra.mxu0 %v9036_v30  ;;  %v9080_v30 = vld [vmem:[%s11897_s5 + $0x34] ss:$8 sps:$4 sm:$0xff]  }
 0x204   :  { %1975 = vmatpush1.bf16.msra.mxu1 %v8976_v7  ;;  %v9041_v7 = vld [vmem:[%s11897_s5 + $0x164] ss:$8 sps:$4 sm:$0xff]  }
 0x205   :  { %1976 = vmatprep.subr.bf16.mxu1 %v8981_v8  ;;  %v9039_v8 = vld [vmem:[%s11897_s5 + $0x160] ss:$8 sps:$4 sm:$0xff]   ;;  %2565 = vmatprep.subr.bf16.mxu0 %v9041_v7 }
 0x207   :  { %1657 = vmatmul.mubr.bf16.gmra.mrb[4].mxu1 %v9944_v43  ;;  %v8990_v43 = vld [vmem:[%s11920_s28 + $0x254] ss:$8 sps:$4 sm:$0xff]   ;;  %2566 = vmatpush1.bf16.msra.mxu0 %v9039_v8 }
 0x208   :  { %1666 = vmatprep.mubr.bf16.mxu1 %v9968_v62  ;;  %1977 = vmatpush1.bf16.msra.mxu1 %v8979_v9  ;;  %v9044_v9 = vld [vmem:[%s11897_s5 + $0x174] ss:$8 sps:$4 sm:$0xff]  }
 0x209   :  { %1978 = vmatprep.subr.bf16.mxu1 %v8984_v45  ;;  %v9042_v45 = vld [vmem:[%s11897_s5 + $0x170] ss:$8 sps:$4 sm:$0xff]   ;;  %2567 = vmatprep.subr.bf16.mxu0 %v9044_v9 }
 0x20b   :  { %2568 = vmatpush1.bf16.msra.mxu0 %v9042_v45 }
 0x20c   :  { %1979 = vmatpush1.bf16.msra.mxu1 %v8982_v10  ;;  %v9047_v10 = vld [vmem:[%s11897_s5 + $0x184] ss:$8 sps:$4 sm:$0xff]  }
 0x20d   :  { %1980 = vmatprep.subr.bf16.mxu1 %v8987_v11  ;;  %v9045_v11 = vld [vmem:[%s11897_s5 + $0x180] ss:$8 sps:$4 sm:$0xff]   ;;  %2569 = vmatprep.subr.bf16.mxu0 %v9047_v10 }
 0x20f   :  { %1667 = vmatmul.mubr.bf16.gmra.mrb[8].mxu1 %v9966_v61  ;;  %2570 = vmatpush1.bf16.msra.mxu0 %v9045_v11  ;;  %v9078_v11 = vld [vmem:[%s11897_s5 + $0x30] ss:$8 sps:$4 sm:$0xff]  }
 0x210   :  { %1676 = vmatprep.mubr.bf16.mxu1 %v9990_v17  ;;  %1981 = vmatpush1.bf16.msra.mxu1 %v8985_v12  ;;  %v9050_v12 = vld [vmem:[%s11897_s5 + $0x194] ss:$8 sps:$4 sm:$0xff]  }
 0x211   :  { %1982 = vmatprep.subr.bf16.mxu1 %v8990_v43  ;;  %v9048_v43 = vld [vmem:[%s11897_s5 + $0x190] ss:$8 sps:$4 sm:$0xff]   ;;  %2571 = vmatprep.subr.bf16.mxu0 %v9050_v12 }
 0x213   :  { %2572 = vmatpush1.bf16.msra.mxu0 %v9048_v43 }
 0x214   :  { %1983 = vmatpush1.bf16.msra.mxu1 %v8988_v13  ;;  %v9053_v13 = vld [vmem:[%s11897_s5 + $0x1a4] ss:$8 sps:$4 sm:$0xff]  }
 0x215   :  { %1984 = vmatprep.subr.bf16.mxu1 %v8993_v14  ;;  %v9051_v14 = vld [vmem:[%s11897_s5 + $0x1a0] ss:$8 sps:$4 sm:$0xff]   ;;  %2573 = vmatprep.subr.bf16.mxu0 %v9053_v13  ;;  %v9083_v13 = vld [vmem:[%s11897_s5 + $0x44] ss:$8 sps:$4 sm:$0xff]  }
 0x217   :  { %1677 = vmatmul.mubr.bf16.gmra.mrb[12].mxu1 %v9988_v16  ;;  %2574 = vmatpush1.bf16.msra.mxu0 %v9051_v14 }
 0x218   :  { %1686 = vmatprep.mubr.bf16.mxu1 %v10012_v39  ;;  %1985 = vmatpush1.bf16.msra.mxu1 %v8991_v19  ;;  %v9056_v19 = vld [vmem:[%s11897_s5 + $0x1b4] ss:$8 sps:$4 sm:$0xff]  }
 0x219   :  { %1986 = vmatprep.subr.bf16.mxu1 %v8996_v20  ;;  %v9054_v20 = vld [vmem:[%s11897_s5 + $0x1b0] ss:$8 sps:$4 sm:$0xff]   ;;  %2575 = vmatprep.subr.bf16.mxu0 %v9056_v19 }
 0x21b   :  { %2576 = vmatpush1.bf16.msra.mxu0 %v9054_v20 }
 0x21c   :  { %1987 = vmatpush1.bf16.msra.mxu1 %v8994_v21  ;;  %v9057_v21 = vld [vmem:[%s11897_s5 + $0x1c0] ss:$8 sps:$4 sm:$0xff]  }
 0x21d   :  { %1988 = vmatprep.subr.bf16.mxu1 %v8999_v22  ;;  %v9062_v22 = vld [vmem:[%s11897_s5 + $0x1d4] ss:$8 sps:$4 sm:$0xff]  }
 0x21f   :  { %1687 = vmatmul.mubr.bf16.gmra.mrb[16].mxu1 %v10010_v38 }
 0x220   :  { %1696 = vmatprep.mubr.bf16.mxu1 %v10034_v59  ;;  %1989 = vmatpush1.bf16.msra.mxu1 %v8997_v23  ;;  %v9060_v23 = vld [vmem:[%s11897_s5 + $0x1d0] ss:$8 sps:$4 sm:$0xff]  }
 0x221   :  { %1990 = vmatprep.subr.bf16.mxu1 %v9002_v27 }
 0x224   :  { %1991 = vmatpush1.bf16.msra.mxu1 %v9000_v31 }
 0x225   :  { %1992 = vmatprep.subr.bf16.mxu1 %v9005_v32 }
 0x227   :  { %1697 = vmatmul.mubr.bf16.gmra.mrb[20].mxu1 %v10032_v58 }
 0x228   :  { %1706 = vmatprep.mubr.bf16.mxu1 %v10056_v18  ;;  %1993 = vmatpush1.bf16.msra.mxu1 %v9003_v33 }
 0x229   :  { %1994 = vmatprep.subr.bf16.mxu1 %v9008_v34  ;;  %v9069_v34 = vld [vmem:[%s11897_s5] ss:$8 sps:$4 sm:$0xff]  }
 0x22c   :  { %1995 = vmatpush1.bf16.msra.mxu1 %v9006_v35 }
 0x22d   :  { %1996 = vmatprep.subr.bf16.mxu1 %v9011_v36 }
 0x22f   :  { %1707 = vmatmul.mubr.bf16.gmra.mrb[24].mxu1 %v10054_v15 }
 0x230   :  { %1716 = vmatprep.mubr.bf16.mxu1 %v10078_v42  ;;  %1997 = vmatpush1.bf16.msra.mxu1 %v9009_v46 }
 0x231   :  { %1998 = vmatprep.subr.bf16.mxu1 %v9014_v47 }
 0x234   :  { %1999 = vmatpush1.bf16.msra.mxu1 %v9012_v52 }
 0x235   :  { %2000 = vmatprep.subr.bf16.mxu1 %v9017_v53 }
 0x237   :  { %1717 = vmatmul.mubr.bf16.gmra.mrb[28].mxu1 %v10076_v41 }
 0x238   :  { %1726 = vmatprep.mubr.bf16.mxu1 %v10100_v3  ;;  %2001 = vmatpush1.bf16.msra.mxu1 %v9015_v56 }
 0x239   :  { %2002 = vmatprep.subr.bf16.mxu1 %v9020_v57 }
 0x23c   :  { %2003 = vmatpush1.bf16.msra.mxu1 %v9018_v0  ;;  %v9075_v0 = vld [vmem:[%s11897_s5 + $0x20] ss:$8 sps:$4 sm:$0xff]  }
 0x23f   :  { %1727 = vmatmul.mubr.bf16.gmra.mrb[32].mxu1 %v10098_v2 }
 0x240   :  { %1736 = vmatprep.mubr.bf16.mxu1 %v10122_v25 }
 0x247   :  { %1737 = vmatmul.mubr.bf16.gmra.mrb[36].mxu1 %v10120_v24 }
 0x248   :  { %1746 = vmatprep.mubr.bf16.mxu1 %v10132_v49 }
 0x24f   :  { %1747 = vmatmul.mubr.bf16.gmra.mrb[40].mxu1 %v10130_v48 }
 0x250   :  { %2004 = vmatprep.mubr.bf16.mxu1 %v9968_v62  ;;  %v9059_v62 = vld [vmem:[%s11897_s5 + $0x1c4] ss:$8 sps:$4 sm:$0xff]  }
 0x251   :  { %2577 = vmatprep.subr.bf16.mxu0 %v9059_v62 }
 0x252   :  { %2578 = vmatpush1.bf16.msra.mxu0 %v9057_v21 }
 0x253   :  { %2579 = vmatprep.subr.bf16.mxu0 %v9062_v22  ;;  %v9081_v22 = vld [vmem:[%s11897_s5 + $0x40] ss:$8 sps:$4 sm:$0xff]  }
 0x256   :  { %2580 = vmatpush1.bf16.msra.mxu0 %v9060_v23 }
 0x257   :  { %2005 = vmatmul.mubr.bf16.vlgmr.msra.gmra.mrb[0].mxu1 %v9966_v61  ;;  %v9065_v61 = vld [vmem:[%s11897_s5 + $0x1e4] ss:$8 sps:$4 sm:$0xff]  }
 0x258   :  { %2014 = vmatprep.mubr.bf16.mxu1 %v9990_v17  ;;  %2581 = vmatprep.subr.bf16.mxu0 %v9065_v61  ;;  %v9068_v17 = vld [vmem:[%s11897_s5 + $0x1f4] ss:$8 sps:$4 sm:$0xff]  }
 0x25f   :  { %2015 = vmatmul.mubr.bf16.gmra.mrb[4].mxu1 %v9988_v16  ;;  %v9063_v16 = vld [vmem:[%s11897_s5 + $0x1e0] ss:$8 sps:$4 sm:$0xff]  }
 0x260   :  { %2024 = vmatprep.mubr.bf16.mxu1 %v10012_v39  ;;  %2582 = vmatpush1.bf16.msra.mxu0 %v9063_v16  ;;  %v9071_v39 = vld [vmem:[%s11897_s5 + $0x4] ss:$8 sps:$4 sm:$0xff]   ;;  %v9086_v16 = vld [vmem:[%s11897_s5 + $0x54] ss:$8 sps:$4 sm:$0xff]  }
 0x261   :  { %2583 = vmatprep.subr.bf16.mxu0 %v9068_v17 }
 0x267   :  { %2025 = vmatmul.mubr.bf16.gmra.mrb[8].mxu1 %v10010_v38  ;;  %v9066_v38 = vld [vmem:[%s11897_s5 + $0x1f0] ss:$8 sps:$4 sm:$0xff]  }
 0x268   :  { %2034 = vmatprep.mubr.bf16.mxu1 %v10034_v59  ;;  %2584 = vmatpush1.bf16.msra.mxu0 %v9066_v38 }
 0x269   :  { %2856 = vmatprep.subr.bf16.mxu0 %v9071_v39 }
 0x26f   :  { %2035 = vmatmul.mubr.bf16.gmra.mrb[12].mxu1 %v10032_v58  ;;  %v7315_v58 = vld [vmem:[%s11896_s7 + $0x1] ss:$4 sm:$0x3] }
 0x270   :  { %2044 = vmatprep.mubr.bf16.mxu1 %v10056_v18  ;;  %v10386_v59 = vrot.slane %v7315_v58, %v9927_v26 }
 0x277   :  { %2045 = vmatmul.mubr.bf16.gmra.mrb[16].mxu1 %v10054_v15  ;;  %v10389_v15 = vrot.slane %v7315_v58, %v9932_v28 }
 0x278   :  { %2054 = vmatprep.mubr.bf16.mxu1 %v10078_v42 }
 0x27f   :  { %2055 = vmatmul.mubr.bf16.gmra.mrb[20].mxu1 %v10076_v41 }
 0x280   :  { %2064 = vmatprep.mubr.bf16.mxu1 %v10100_v3 }
 0x287   :  { %2065 = vmatmul.mubr.bf16.gmra.mrb[24].mxu1 %v10098_v2 }
 0x288   :  { %2074 = vmatprep.mubr.bf16.mxu1 %v10122_v25 }
 0x28f   :  { %2075 = vmatmul.mubr.bf16.gmra.mrb[28].mxu1 %v10120_v24 }
 0x290   :  { %2084 = vmatprep.mubr.bf16.mxu1 %v10132_v49 }
 0x297   :  { %2085 = vmatmul.mubr.bf16.gmra.mrb[32].mxu1 %v10130_v48 }
 0x298   :  { %2094 = vmatprep.mubr.bf16.mxu1 %v10142_v6 }
 0x29f   :  { %2095 = vmatmul.mubr.bf16.gmra.mrb[36].mxu1 %v10140_v5 }
 0x2a0   :  { %2104 = vmatprep.mubr.bf16.mxu1 %v9503_v1 }
 0x2a7   :  { %2105 = vmatmul.mubr.bf16.gmra.mrb[40].mxu1 %v9503_v1 }
 0x32a   :  { %v2006_v18 = vpop.f32.mrb[0].mxu1 }
 0x32b   :  { %v2172_v41 = vadd.f32 %v10386_v59, %v2006_v18  ;;  %v2008_v42 = vpop.f32.mrb[1].mxu1 }
 0x32c   :  { %v2173_v2 = vadd.f32 %v10389_v15, %v2008_v42  ;;  %v2010_v3 = vpop.f32.mrb[2].mxu1 }
 0x32d   :  { %v2174_v24 = vadd.f32 %v10386_v59, %v2010_v3  ;;  %v2012_v25 = vpop.f32.mrb[3].mxu1  ;;  %v2216_v49 = vmax.f32 %v2172_v41, 0.0  ;;  %v9084_v41 = vld [vmem:[%s11897_s5 + $0x50] ss:$8 sps:$4 sm:$0xff]   ;;  %v9089_v3 = vld [vmem:[%s11897_s5 + $0x64] ss:$8 sps:$4 sm:$0xff]  }
 0x32e   :  { %v2175_v48 = vadd.f32 %v10389_v15, %v2012_v25  ;;  %v2217_v6 = vmax.f32 %v2173_v2, 0.0 }
 0x32f   :  { %v2218_v5 = vmax.f32 %v2174_v24, 0.0 }
 0x330   :  { %v2219_v27 = vmax.f32 %v2175_v48, 0.0 }
 0x331   :  { %v10395_v31 = vpack.c.bf16 %v2218_v5, %v2216_v49 }
 0x332   :  { %v10397_v32 = vpack.c.bf16 %v2219_v27, %v2217_v6  ;;  %v2016_v33 = vpop.f32.mrb[4].mxu1  ;;  %v9087_v6 = vld [vmem:[%s11897_s5 + $0x60] ss:$8 sps:$4 sm:$0xff]  }
 0x333   :  { %v2176_v35 = vadd.f32 %v10386_v59, %v2016_v33  ;;  %v2018_v36 = vpop.f32.mrb[5].mxu1 }
 0x334   :  { %v2177_v40 = vadd.f32 %v10389_v15, %v2018_v36  ;;  %v2020_v44 = vpop.f32.mrb[6].mxu1  ;;  %2585 = vmatprep.mubr.bf16.mxu0 %v10397_v32 }
 0x335   :  { %v2178_v46 = vadd.f32 %v10386_v59, %v2020_v44  ;;  %v2022_v47 = vpop.f32.mrb[7].mxu1  ;;  %2586 = vmatmul.mubr.bf16.vlgmr.msra.gmra.mrb[44].mxu0 %v10395_v31  ;;  %v2220_v52 = vmax.f32 %v2176_v35, 0.0 }
 0x336   :  { %v2179_v50 = vadd.f32 %v10389_v15, %v2022_v47  ;;  %2857 = vmatpush1.bf16.msra.mxu0 %v9069_v34  ;;  %v2221_v55 = vmax.f32 %v2177_v40, 0.0  ;;  %v9092_v34 = vld [vmem:[%s11897_s5 + $0x74] ss:$8 sps:$4 sm:$0xff]  }
 0x337   :  { %v2222_v53 = vmax.f32 %v2178_v46, 0.0  ;;  %2858 = vmatprep.subr.bf16.mxu0 %v9074_v37  ;;  %v9090_v46 = vld [vmem:[%s11897_s5 + $0x70] ss:$8 sps:$4 sm:$0xff]  }
 0x338   :  { %v2223_v56 = vmax.f32 %v2179_v50, 0.0 }
 0x339   :  { %v10417_v57 = vpack.c.bf16 %v2222_v53, %v2220_v52 }
 0x33a   :  { %v10419_v60 = vpack.c.bf16 %v2223_v56, %v2221_v55  ;;  %v2026_v63 = vpop.f32.mrb[8].mxu1  ;;  %2859 = vmatpush1.bf16.msra.mxu0 %v9072_v51  ;;  %v9095_v51 = vld [vmem:[%s11897_s5 + $0x84] ss:$8 sps:$4 sm:$0xff]  }
 0x33b   :  { %v2180_v4 = vadd.f32 %v10386_v59, %v2026_v63  ;;  %v2028_v29 = vpop.f32.mrb[9].mxu1  ;;  %2860 = vmatprep.subr.bf16.mxu0 %v9077_v54  ;;  %v9093_v63 = vld [vmem:[%s11897_s5 + $0x80] ss:$8 sps:$4 sm:$0xff]  }
 0x33c   :  { %v2181_v7 = vadd.f32 %v10389_v15, %v2028_v29  ;;  %v2030_v8 = vpop.f32.mrb[10].mxu1  ;;  %2595 = vmatprep.mubr.bf16.mxu0 %v10419_v60  ;;  %v9098_v29 = vld [vmem:[%s11897_s5 + $0x94] ss:$8 sps:$4 sm:$0xff]  }
 0x33d   :  { %v2182_v9 = vadd.f32 %v10386_v59, %v2030_v8  ;;  %v2032_v45 = vpop.f32.mrb[11].mxu1  ;;  %2596 = vmatmul.mubr.bf16.gmra.mrb[48].mxu0 %v10417_v57  ;;  %v2224_v12 = vmax.f32 %v2180_v4, 0.0 }
 0x33e   :  { %v2183_v10 = vadd.f32 %v10389_v15, %v2032_v45  ;;  %2861 = vmatpush1.bf16.msra.mxu0 %v9075_v0  ;;  %v2225_v14 = vmax.f32 %v2181_v7, 0.0 }
 0x33f   :  { %v2226_v43 = vmax.f32 %v2182_v9, 0.0  ;;  %2862 = vmatprep.subr.bf16.mxu0 %v9080_v30 }
 0x340   :  { %v2227_v19 = vmax.f32 %v2183_v10, 0.0  ;;  %v9096_v10 = vld [vmem:[%s11897_s5 + $0x90] ss:$8 sps:$4 sm:$0xff]  }
 0x341   :  { %v10439_v20 = vpack.c.bf16 %v2226_v43, %v2224_v12  ;;  %v9101_v43 = vld [vmem:[%s11897_s5 + $0xa4] ss:$8 sps:$4 sm:$0xff]  }
 0x342   :  { %v10441_v62 = vpack.c.bf16 %v2227_v19, %v2225_v14  ;;  %v2036_v21 = vpop.f32.mrb[12].mxu1  ;;  %2863 = vmatpush1.bf16.msra.mxu0 %v9078_v11 }
 0x343   :  { %v2184_v23 = vadd.f32 %v10386_v59, %v2036_v21  ;;  %v2038_v61 = vpop.f32.mrb[13].mxu1  ;;  %2864 = vmatprep.subr.bf16.mxu0 %v9083_v13 }
 0x344   :  { %v2185_v17 = vadd.f32 %v10389_v15, %v2038_v61  ;;  %v2040_v38 = vpop.f32.mrb[14].mxu1  ;;  %2605 = vmatprep.mubr.bf16.mxu0 %v10441_v62 }
 0x345   :  { %v2186_v39 = vadd.f32 %v10386_v59, %v2040_v38  ;;  %v2042_v58 = vpop.f32.mrb[15].mxu1  ;;  %2606 = vmatmul.mubr.bf16.gmra.mrb[52].mxu0 %v10439_v20  ;;  %v2228_v42 = vmax.f32 %v2184_v23, 0.0  ;;  %v9099_v23 = vld [vmem:[%s11897_s5 + $0xa0] ss:$8 sps:$4 sm:$0xff]  }
 0x346   :  { %v2187_v18 = vadd.f32 %v10389_v15, %v2042_v58  ;;  %2865 = vmatpush1.bf16.msra.mxu0 %v9081_v22  ;;  %v2229_v24 = vmax.f32 %v2185_v17, 0.0  ;;  %v9104_v17 = vld [vmem:[%s11897_s5 + $0xb4] ss:$8 sps:$4 sm:$0xff]  }
 0x347   :  { %v2230_v2 = vmax.f32 %v2186_v39, 0.0  ;;  %2866 = vmatprep.subr.bf16.mxu0 %v9086_v16 }
 0x348   :  { %v2231_v25 = vmax.f32 %v2187_v18, 0.0 }
 0x349   :  { %v10461_v48 = vpack.c.bf16 %v2230_v2, %v2228_v42  ;;  %v9102_v42 = vld [vmem:[%s11897_s5 + $0xb0] ss:$8 sps:$4 sm:$0xff]  }
 0x34a   :  { %v10463_v49 = vpack.c.bf16 %v2231_v25, %v2229_v24  ;;  %v2046_v5 = vpop.f32.mrb[16].mxu1  ;;  %2867 = vmatpush1.bf16.msra.mxu0 %v9084_v41  ;;  %v9107_v24 = vld [vmem:[%s11897_s5 + $0xc4] ss:$8 sps:$4 sm:$0xff]  }
 0x34b   :  { %v2188_v27 = vadd.f32 %v10386_v59, %v2046_v5  ;;  %v2048_v33 = vpop.f32.mrb[17].mxu1  ;;  %2868 = vmatprep.subr.bf16.mxu0 %v9089_v3 }
 0x34c   :  { %v2189_v35 = vadd.f32 %v10389_v15, %v2048_v33  ;;  %v2050_v36 = vpop.f32.mrb[18].mxu1  ;;  %2615 = vmatprep.mubr.bf16.mxu0 %v10463_v49 }
 0x34d   :  { %v2190_v37 = vadd.f32 %v10386_v59, %v2050_v36  ;;  %v2052_v40 = vpop.f32.mrb[19].mxu1  ;;  %2616 = vmatmul.mubr.bf16.gmra.mrb[56].mxu0 %v10461_v48  ;;  %v2232_v47 = vmax.f32 %v2188_v27, 0.0 }
 0x34e   :  { %v2191_v44 = vadd.f32 %v10389_v15, %v2052_v40  ;;  %2869 = vmatpush1.bf16.msra.mxu0 %v9087_v6  ;;  %v2233_v52 = vmax.f32 %v2189_v35, 0.0 }
 0x34f   :  { %v2234_v50 = vmax.f32 %v2190_v37, 0.0  ;;  %2870 = vmatprep.subr.bf16.mxu0 %v9092_v34  ;;  %v9105_v34 = vld [vmem:[%s11897_s5 + $0xc0] ss:$8 sps:$4 sm:$0xff]   ;;  %v9110_v37 = vld [vmem:[%s11897_s5 + $0xd4] ss:$8 sps:$4 sm:$0xff]  }
 0x350   :  { %v2235_v53 = vmax.f32 %v2191_v44, 0.0 }
 0x351   :  { %v10483_v54 = vpack.c.bf16 %v2234_v50, %v2232_v47 }
 0x352   :  { %v10485_v55 = vpack.c.bf16 %v2235_v53, %v2233_v52  ;;  %v2056_v56 = vpop.f32.mrb[20].mxu1  ;;  %2871 = vmatpush1.bf16.msra.mxu0 %v9090_v46 }
 0x353   :  { %v2192_v0 = vadd.f32 %v10386_v59, %v2056_v56  ;;  %v2058_v4 = vpop.f32.mrb[21].mxu1  ;;  %2872 = vmatprep.subr.bf16.mxu0 %v9095_v51  ;;  %v9108_v51 = vld [vmem:[%s11897_s5 + $0xd0] ss:$8 sps:$4 sm:$0xff]   ;;  %v9113_v56 = vld [vmem:[%s11897_s5 + $0xe4] ss:$8 sps:$4 sm:$0xff]  }
 0x354   :  { %v2193_v30 = vadd.f32 %v10389_v15, %v2058_v4  ;;  %v2060_v7 = vpop.f32.mrb[22].mxu1  ;;  %2625 = vmatprep.mubr.bf16.mxu0 %v10485_v55 }
 0x355   :  { %v2194_v8 = vadd.f32 %v10386_v59, %v2060_v7  ;;  %v2062_v9 = vpop.f32.mrb[23].mxu1  ;;  %2626 = vmatmul.mubr.bf16.gmra.mrb[60].mxu0 %v10483_v54  ;;  %v2236_v11 = vmax.f32 %v2192_v0, 0.0  ;;  %v9111_v7 = vld [vmem:[%s11897_s5 + $0xe0] ss:$8 sps:$4 sm:$0xff]  }
 0x356   :  { %v2195_v45 = vadd.f32 %v10389_v15, %v2062_v9  ;;  %2873 = vmatpush1.bf16.msra.mxu0 %v9093_v63  ;;  %v2237_v13 = vmax.f32 %v2193_v30, 0.0 }
 0x357   :  { %v2238_v12 = vmax.f32 %v2194_v8, 0.0  ;;  %2874 = vmatprep.subr.bf16.mxu0 %v9098_v29 }
 0x358   :  { %v2239_v14 = vmax.f32 %v2195_v45, 0.0  ;;  %v9116_v45 = vld [vmem:[%s11897_s5 + $0xf4] ss:$8 sps:$4 sm:$0xff]  }
 0x359   :  { %v10505_v19 = vpack.c.bf16 %v2238_v12, %v2236_v11 }
 0x35a   :  { %v10507_v21 = vpack.c.bf16 %v2239_v14, %v2237_v13  ;;  %v2066_v22 = vpop.f32.mrb[24].mxu1  ;;  %2875 = vmatpush1.bf16.msra.mxu0 %v9096_v10  ;;  %v9114_v14 = vld [vmem:[%s11897_s5 + $0xf0] ss:$8 sps:$4 sm:$0xff]  }
 0x35b   :  { %v2196_v61 = vadd.f32 %v10386_v59, %v2066_v22  ;;  %v2068_v16 = vpop.f32.mrb[25].mxu1  ;;  %2876 = vmatprep.subr.bf16.mxu0 %v9101_v43 }
 0x35c   :  { %v2197_v38 = vadd.f32 %v10389_v15, %v2068_v16  ;;  %v2070_v39 = vpop.f32.mrb[26].mxu1  ;;  %2635 = vmatprep.mubr.bf16.mxu0 %v10507_v21 }
 0x35d   :  { %v2198_v58 = vadd.f32 %v10386_v59, %v2070_v39  ;;  %v2072_v18 = vpop.f32.mrb[27].mxu1  ;;  %2636 = vmatmul.mubr.bf16.gmra.mrb[64].mxu0 %v10505_v19  ;;  %v2240_v2 = vmax.f32 %v2196_v61, 0.0  ;;  %v9119_v61 = vld [vmem:[%s11897_s5 + $0x204] ss:$8 sps:$4 sm:$0xff]  }
 0x35e   :  { %v2199_v41 = vadd.f32 %v10389_v15, %v2072_v18  ;;  %2877 = vmatpush1.bf16.msra.mxu0 %v9099_v23  ;;  %v2241_v25 = vmax.f32 %v2197_v38, 0.0 }
 0x35f   :  { %v2242_v3 = vmax.f32 %v2198_v58, 0.0  ;;  %2878 = vmatprep.subr.bf16.mxu0 %v9104_v17 }
 0x360   :  { %v2243_v5 = vmax.f32 %v2199_v41, 0.0 }
 0x361   :  { %v10527_v6 = vpack.c.bf16 %v2242_v3, %v2240_v2 }
 0x362   :  { %v10529_v27 = vpack.c.bf16 %v2243_v5, %v2241_v25  ;;  %v2076_v33 = vpop.f32.mrb[28].mxu1  ;;  %2879 = vmatpush1.bf16.msra.mxu0 %v9102_v42 }
 0x363   :  { %v2200_v35 = vadd.f32 %v10386_v59, %v2076_v33  ;;  %v2078_v36 = vpop.f32.mrb[29].mxu1  ;;  %2880 = vmatprep.subr.bf16.mxu0 %v9107_v24 }
 0x364   :  { %v2201_v40 = vadd.f32 %v10389_v15, %v2078_v36  ;;  %v2080_v44 = vpop.f32.mrb[30].mxu1  ;;  %2645 = vmatprep.mubr.bf16.mxu0 %v10529_v27 }
 0x365   :  { %v2202_v46 = vadd.f32 %v10386_v59, %v2080_v44  ;;  %v2082_v47 = vpop.f32.mrb[31].mxu1  ;;  %2646 = vmatmul.mubr.bf16.gmra.mrb[68].mxu0 %v10527_v6  ;;  %v2244_v52 = vmax.f32 %v2200_v35, 0.0 }
 0x366   :  { %v2203_v50 = vadd.f32 %v10389_v15, %v2082_v47  ;;  %2881 = vmatpush1.bf16.msra.mxu0 %v9105_v34  ;;  %v2245_v63 = vmax.f32 %v2201_v40, 0.0 }
 0x367   :  { %v2246_v53 = vmax.f32 %v2202_v46, 0.0  ;;  %2882 = vmatprep.subr.bf16.mxu0 %v9110_v37 }
 0x368   :  { %v2247_v0 = vmax.f32 %v2203_v50, 0.0 }
 0x369   :  { %v10549_v4 = vpack.c.bf16 %v2246_v53, %v2244_v52 }
 0x36a   :  { %v10551_v29 = vpack.c.bf16 %v2247_v0, %v2245_v63  ;;  %v2086_v30 = vpop.f32.mrb[32].mxu1  ;;  %2883 = vmatpush1.bf16.msra.mxu0 %v9108_v51 }
 0x36b   :  { %v2204_v8 = vadd.f32 %v10386_v59, %v2086_v30  ;;  %v2088_v9 = vpop.f32.mrb[33].mxu1  ;;  %2884 = vmatprep.subr.bf16.mxu0 %v9113_v56 }
 0x36c   :  { %v2205_v10 = vadd.f32 %v10389_v15, %v2088_v9  ;;  %v2090_v11 = vpop.f32.mrb[34].mxu1  ;;  %2655 = vmatprep.mubr.bf16.mxu0 %v10551_v29  ;;  %v9120_v9 = vld [vmem:[%s11897_s5 + $0x210] ss:$8 sps:$4 sm:$0xff]  }
 0x36d   :  { %v2206_v12 = vadd.f32 %v10386_v59, %v2090_v11  ;;  %v2092_v43 = vpop.f32.mrb[35].mxu1  ;;  %2656 = vmatmul.mubr.bf16.gmra.mrb[72].mxu0 %v10549_v4  ;;  %v2248_v22 = vmax.f32 %v2204_v8, 0.0  ;;  %v9126_v11 = vld [vmem:[%s11897_s5 + $0x230] ss:$8 sps:$4 sm:$0xff]  }
 0x36e   :  { %v2207_v13 = vadd.f32 %v10389_v15, %v2092_v43  ;;  %2885 = vmatpush1.bf16.msra.mxu0 %v9111_v7  ;;  %v2249_v16 = vmax.f32 %v2205_v10, 0.0  ;;  %v9123_v10 = vld [vmem:[%s11897_s5 + $0x220] ss:$8 sps:$4 sm:$0xff]  }
 0x36f   :  { %v2250_v23 = vmax.f32 %v2206_v12, 0.0  ;;  %2886 = vmatprep.subr.bf16.mxu0 %v9116_v45  ;;  %v9125_v45 = vld [vmem:[%s11897_s5 + $0x224] ss:$8 sps:$4 sm:$0xff]   ;;  %v9129_v43 = vld [vmem:[%s11897_s5 + $0x240] ss:$8 sps:$4 sm:$0xff]  }
 0x370   :  { %v2251_v17 = vmax.f32 %v2207_v13, 0.0  ;;  %v9131_v12 = vld [vmem:[%s11897_s5 + $0x244] ss:$8 sps:$4 sm:$0xff]   ;;  %v9132_v13 = vld [vmem:[%s11897_s5 + $0x250] ss:$8 sps:$4 sm:$0xff]  }
 0x371   :  { %v10571_v38 = vpack.c.bf16 %v2250_v23, %v2248_v22  ;;  %v9135_v22 = vld [vmem:[%s11897_s5 + $0x260] ss:$8 sps:$4 sm:$0xff]   ;;  %v9140_v23 = vld [vmem:[%s11897_s5 + $0x274] ss:$8 sps:$4 sm:$0xff]  }
 0x372   :  { %v10573_v39 = vpack.c.bf16 %v2251_v17, %v2249_v16  ;;  %v2096_v58 = vpop.f32.mrb[36].mxu1  ;;  %2887 = vmatpush1.bf16.msra.mxu0 %v9114_v14  ;;  %v9137_v14 = vld [vmem:[%s11897_s5 + $0x264] ss:$8 sps:$4 sm:$0xff]   ;;  %v9141_v17 = vld [vmem:[%s11897_s5 + $0x280] ss:$8 sps:$4 sm:$0xff]  }
 0x373   :  { %v2208_v18 = vadd.f32 %v10386_v59, %v2096_v58  ;;  %v2098_v41 = vpop.f32.mrb[37].mxu1  ;;  %3214 = vmatprep.subr.bf16.mxu0 %v9119_v61  ;;  %v9138_v61 = vld [vmem:[%s11897_s5 + $0x270] ss:$8 sps:$4 sm:$0xff]   ;;  %v9143_v16 = vld [vmem:[%s11897_s5 + $0x284] ss:$8 sps:$4 sm:$0xff]  }
 0x374   :  { %v2209_v42 = vadd.f32 %v10389_v15, %v2098_v41  ;;  %v2100_v2 = vpop.f32.mrb[38].mxu1  ;;  %2665 = vmatprep.mubr.bf16.mxu0 %v10573_v39  ;;  %v9146_v58 = vld [vmem:[%s11897_s5 + $0x294] ss:$8 sps:$4 sm:$0xff]   ;;  %v9149_v41 = vld [vmem:[%s11897_s5 + $0x2a4] ss:$8 sps:$4 sm:$0xff]  }
 0x375   :  { %v2210_v3 = vadd.f32 %v10386_v59, %v2100_v2  ;;  %v2102_v24 = vpop.f32.mrb[39].mxu1  ;;  %2666 = vmatmul.mubr.bf16.gmra.mrb[76].mxu0 %v10571_v38  ;;  %v2252_v5 = vmax.f32 %v2208_v18, 0.0  ;;  %v9144_v18 = vld [vmem:[%s11897_s5 + $0x290] ss:$8 sps:$4 sm:$0xff]   ;;  %v9152_v2 = vld [vmem:[%s11897_s5 + $0x2b4] ss:$8 sps:$4 sm:$0xff]  }
 0x376   :  { %v2211_v25 = vadd.f32 %v10389_v15, %v2102_v24  ;;  %v2253_v34 = vmax.f32 %v2209_v42, 0.0  ;;  %v9147_v42 = vld [vmem:[%s11897_s5 + $0x2a0] ss:$8 sps:$4 sm:$0xff]   ;;  %v9155_v24 = vld [vmem:[%s11897_s5 + $0x2c4] ss:$8 sps:$4 sm:$0xff]  }
 0x377   :  { %v2254_v33 = vmax.f32 %v2210_v3, 0.0  ;;  %v9150_v3 = vld [vmem:[%s11897_s5 + $0x2b0] ss:$8 sps:$4 sm:$0xff]  }
 0x378   :  { %v2255_v35 = vmax.f32 %v2211_v25, 0.0  ;;  %v9165_v25 = vld [vmem:[%s11898_s6 + $0x100] ss:$8 sps:$4 sm:$0xff]  }
 0x379   :  { %v10581_v36 = vpack.c.bf16 %v2254_v33, %v2252_v5  ;;  %v9167_v5 = vld [vmem:[%s11898_s6 + $0x104] ss:$8 sps:$4 sm:$0xff]   ;;  %v9170_v33 = vld [vmem:[%s11898_s6 + $0x114] ss:$8 sps:$4 sm:$0xff]  }
 0x37a   :  { %v10583_v37 = vpack.c.bf16 %v2255_v35, %v2253_v34  ;;  %v2106_v40 = vpop.f32.mrb[40].mxu1  ;;  %v9153_v34 = vld [vmem:[%s11897_s5 + $0x2c0] ss:$8 sps:$4 sm:$0xff]   ;;  %3795 = vmatprep.subr.bf16.mxu1 %v9167_v5  ;;  %v9158_v35 = vld [vmem:[%s11897_s5 + $0x2d4] ss:$8 sps:$4 sm:$0xff]  }
 0x37b   :  { %v2212_v44 = vadd.f32 %v10386_v59, %v2106_v40  ;;  %v2108_v46 = vpop.f32.mrb[41].mxu1  ;;  %3796 = vmatpush1.bf16.msra.mxu1 %v9165_v25  ;;  %v9168_v40 = vld [vmem:[%s11898_s6 + $0x110] ss:$8 sps:$4 sm:$0xff]   ;;  %v9218_v25 = vld [vmem:[%s11898_s6 + $0x14] ss:$8 sps:$4 sm:$0xff]  }
 0x37c   :  { %v2213_v47 = vadd.f32 %v10389_v15, %v2108_v46  ;;  %v2110_v50 = vpop.f32.mrb[42].mxu1  ;;  %2675 = vmatprep.mubr.bf16.mxu0 %v10583_v37  ;;  %3797 = vmatprep.subr.bf16.mxu1 %v9170_v33  ;;  %v9156_v46 = vld [vmem:[%s11897_s5 + $0x2d0] ss:$8 sps:$4 sm:$0xff]  }
 0x37d   :  { %v2214_v51 = vadd.f32 %v10386_v59, %v2110_v50  ;;  %v2112_v52 = vpop.f32.mrb[43].mxu1  ;;  %2676 = vmatmul.mubr.bf16.gmra.mrb[80].mxu0 %v10581_v36  ;;  %v2256_v56 = vmax.f32 %v2212_v44, 0.0  ;;  %v9117_v59 = vld [vmem:[%s11897_s5 + $0x200] ss:$8 sps:$4 sm:$0xff]   ;;  %v9173_v44 = vld [vmem:[%s11898_s6 + $0x124] ss:$8 sps:$4 sm:$0xff]  }
 0x37e   :  { %v2215_v53 = vadd.f32 %v10389_v15, %v2112_v52  ;;  %v2257_v0 = vmax.f32 %v2213_v47, 0.0  ;;  %v9122_v15 = vld [vmem:[%s11897_s5 + $0x214] ss:$8 sps:$4 sm:$0xff]   ;;  %v9161_v47 = vld [vmem:[%s11897_s5 + $0x2e4] ss:$8 sps:$4 sm:$0xff]  }
 0x37f   :  { %v2258_v63 = vmax.f32 %v2214_v51, 0.0  ;;  %3798 = vmatpush1.bf16.msra.mxu1 %v9168_v40  ;;  %v9171_v50 = vld [vmem:[%s11898_s6 + $0x120] ss:$8 sps:$4 sm:$0xff]   ;;  %v9176_v51 = vld [vmem:[%s11898_s6 + $0x134] ss:$8 sps:$4 sm:$0xff]  }
 0x380   :  { %v2259_v30 = vmax.f32 %v2215_v53, 0.0  ;;  %3799 = vmatprep.subr.bf16.mxu1 %v9173_v44  ;;  %v9159_v52 = vld [vmem:[%s11897_s5 + $0x2e0] ss:$8 sps:$4 sm:$0xff]   ;;  %v9164_v53 = vld [vmem:[%s11897_s5 + $0x2f4] ss:$8 sps:$4 sm:$0xff]  }
 0x381   :  { %v10591_v7 = vpack.c.bf16 %v2258_v63, %v2256_v56  ;;  %v9174_v56 = vld [vmem:[%s11898_s6 + $0x130] ss:$8 sps:$4 sm:$0xff]   ;;  %v9179_v63 = vld [vmem:[%s11898_s6 + $0x144] ss:$8 sps:$4 sm:$0xff]  }
 0x382   :  { %v10593_v8 = vpack.c.bf16 %v2259_v30, %v2257_v0  ;;  %v9162_v0 = vld [vmem:[%s11897_s5 + $0x2f0] ss:$8 sps:$4 sm:$0xff]   ;;  %v9177_v30 = vld [vmem:[%s11898_s6 + $0x140] ss:$8 sps:$4 sm:$0xff]  }
 0x383   :  { %3800 = vmatpush1.bf16.msra.mxu1 %v9171_v50  ;;  %v9216_v44 = vld [vmem:[%s11898_s6 + $0x10] ss:$8 sps:$4 sm:$0xff]   ;;  %v9221_v50 = vld [vmem:[%s11898_s6 + $0x24] ss:$8 sps:$4 sm:$0xff]  }
 0x384   :  { %2685 = vmatprep.mubr.bf16.mxu0 %v10593_v8  ;;  %3801 = vmatprep.subr.bf16.mxu1 %v9176_v51 }
 0x385   :  { %2686 = vmatmul.mubr.bf16.gmra.mrb[84].mxu0 %v10591_v7 }
 0x386   :  { %2888 = vmatprep.mubr.bf16.mxu0 %v9503_v1 }
 0x387   :  { %3802 = vmatpush1.bf16.msra.mxu1 %v9174_v56 }
 0x388   :  { %3803 = vmatprep.subr.bf16.mxu1 %v9179_v63 }
 0x38b   :  { %3804 = vmatpush1.bf16.msra.mxu1 %v9177_v30 }
 0x38d   :  { %2889 = vmatmul.mubr.bf16.vlgmr.msra.gmra.mrb[44].mxu0 %v9503_v1 }
 0x38e   :  { %2898 = vmatprep.mubr.bf16.mxu0 %v10397_v32  ;;  %3215 = vmatpush1.bf16.msra.mxu0 %v9117_v59  ;;  %v9128_v32 = vld [vmem:[%s11897_s5 + $0x234] ss:$8 sps:$4 sm:$0xff]  }
 0x38f   :  { %3216 = vmatprep.subr.bf16.mxu0 %v9122_v15  ;;  %v9182_v59 = vld [vmem:[%s11898_s6 + $0x154] ss:$8 sps:$4 sm:$0xff]   ;;  %v9180_v15 = vld [vmem:[%s11898_s6 + $0x150] ss:$8 sps:$4 sm:$0xff]  }
 0x390   :  { %3805 = vmatprep.subr.bf16.mxu1 %v9182_v59 }
 0x391   :  { %3806 = vmatpush1.bf16.msra.mxu1 %v9180_v15  ;;  %v9224_v15 = vld [vmem:[%s11898_s6 + $0x34] ss:$8 sps:$4 sm:$0xff]  }
 0x392   :  { %3217 = vmatpush1.bf16.msra.mxu0 %v9120_v9  ;;  %v9185_v9 = vld [vmem:[%s11898_s6 + $0x164] ss:$8 sps:$4 sm:$0xff]  }
 0x393   :  { %3218 = vmatprep.subr.bf16.mxu0 %v9125_v45  ;;  %v9183_v45 = vld [vmem:[%s11898_s6 + $0x160] ss:$8 sps:$4 sm:$0xff]   ;;  %3807 = vmatprep.subr.bf16.mxu1 %v9185_v9 }
 0x395   :  { %2899 = vmatmul.mubr.bf16.gmra.mrb[48].mxu0 %v10395_v31  ;;  %v9134_v31 = vld [vmem:[%s11897_s5 + $0x254] ss:$8 sps:$4 sm:$0xff]   ;;  %3808 = vmatpush1.bf16.msra.mxu1 %v9183_v45 }
 0x396   :  { %2908 = vmatprep.mubr.bf16.mxu0 %v10419_v60  ;;  %3219 = vmatpush1.bf16.msra.mxu0 %v9123_v10  ;;  %v9188_v10 = vld [vmem:[%s11898_s6 + $0x174] ss:$8 sps:$4 sm:$0xff]  }
 0x397   :  { %3220 = vmatprep.subr.bf16.mxu0 %v9128_v32  ;;  %v9186_v32 = vld [vmem:[%s11898_s6 + $0x170] ss:$8 sps:$4 sm:$0xff]   ;;  %3809 = vmatprep.subr.bf16.mxu1 %v9188_v10 }
 0x399   :  { %3810 = vmatpush1.bf16.msra.mxu1 %v9186_v32 }
 0x39a   :  { %3221 = vmatpush1.bf16.msra.mxu0 %v9126_v11  ;;  %v9191_v11 = vld [vmem:[%s11898_s6 + $0x184] ss:$8 sps:$4 sm:$0xff]  }
 0x39b   :  { %3222 = vmatprep.subr.bf16.mxu0 %v9131_v12  ;;  %v9189_v12 = vld [vmem:[%s11898_s6 + $0x180] ss:$8 sps:$4 sm:$0xff]   ;;  %3811 = vmatprep.subr.bf16.mxu1 %v9191_v11 }
 0x39d   :  { %2909 = vmatmul.mubr.bf16.gmra.mrb[52].mxu0 %v10417_v57  ;;  %3812 = vmatpush1.bf16.msra.mxu1 %v9189_v12  ;;  %v9222_v12 = vld [vmem:[%s11898_s6 + $0x30] ss:$8 sps:$4 sm:$0xff]  }
 0x39e   :  { %2918 = vmatprep.mubr.bf16.mxu0 %v10441_v62  ;;  %3223 = vmatpush1.bf16.msra.mxu0 %v9129_v43  ;;  %v9194_v43 = vld [vmem:[%s11898_s6 + $0x194] ss:$8 sps:$4 sm:$0xff]  }
 0x39f   :  { %3224 = vmatprep.subr.bf16.mxu0 %v9134_v31  ;;  %v9192_v31 = vld [vmem:[%s11898_s6 + $0x190] ss:$8 sps:$4 sm:$0xff]   ;;  %3813 = vmatprep.subr.bf16.mxu1 %v9194_v43 }
 0x3a1   :  { %3814 = vmatpush1.bf16.msra.mxu1 %v9192_v31 }
 0x3a2   :  { %3225 = vmatpush1.bf16.msra.mxu0 %v9132_v13  ;;  %v9197_v13 = vld [vmem:[%s11898_s6 + $0x1a4] ss:$8 sps:$4 sm:$0xff]  }
 0x3a3   :  { %3226 = vmatprep.subr.bf16.mxu0 %v9137_v14  ;;  %v9195_v14 = vld [vmem:[%s11898_s6 + $0x1a0] ss:$8 sps:$4 sm:$0xff]   ;;  %3815 = vmatprep.subr.bf16.mxu1 %v9197_v13  ;;  %v9227_v13 = vld [vmem:[%s11898_s6 + $0x44] ss:$8 sps:$4 sm:$0xff]  }
 0x3a5   :  { %2919 = vmatmul.mubr.bf16.gmra.mrb[56].mxu0 %v10439_v20  ;;  %3816 = vmatpush1.bf16.msra.mxu1 %v9195_v14 }
 0x3a6   :  { %2928 = vmatprep.mubr.bf16.mxu0 %v10463_v49  ;;  %3227 = vmatpush1.bf16.msra.mxu0 %v9135_v22  ;;  %v9200_v22 = vld [vmem:[%s11898_s6 + $0x1b4] ss:$8 sps:$4 sm:$0xff]  }
 0x3a7   :  { %3228 = vmatprep.subr.bf16.mxu0 %v9140_v23  ;;  %v9198_v23 = vld [vmem:[%s11898_s6 + $0x1b0] ss:$8 sps:$4 sm:$0xff]   ;;  %3817 = vmatprep.subr.bf16.mxu1 %v9200_v22 }
 0x3a9   :  { %3818 = vmatpush1.bf16.msra.mxu1 %v9198_v23 }
 0x3aa   :  { %3229 = vmatpush1.bf16.msra.mxu0 %v9138_v61  ;;  %v9201_v61 = vld [vmem:[%s11898_s6 + $0x1c0] ss:$8 sps:$4 sm:$0xff]  }
 0x3ab   :  { %3230 = vmatprep.subr.bf16.mxu0 %v9143_v16  ;;  %v9206_v16 = vld [vmem:[%s11898_s6 + $0x1d4] ss:$8 sps:$4 sm:$0xff]  }
 0x3ad   :  { %2929 = vmatmul.mubr.bf16.gmra.mrb[60].mxu0 %v10461_v48 }
 0x3ae   :  { %2938 = vmatprep.mubr.bf16.mxu0 %v10485_v55  ;;  %3231 = vmatpush1.bf16.msra.mxu0 %v9141_v17  ;;  %v9204_v17 = vld [vmem:[%s11898_s6 + $0x1d0] ss:$8 sps:$4 sm:$0xff]  }
 0x3af   :  { %3232 = vmatprep.subr.bf16.mxu0 %v9146_v58 }
 0x3b2   :  { %3233 = vmatpush1.bf16.msra.mxu0 %v9144_v18 }
 0x3b3   :  { %3234 = vmatprep.subr.bf16.mxu0 %v9149_v41 }
 0x3b5   :  { %2939 = vmatmul.mubr.bf16.gmra.mrb[64].mxu0 %v10483_v54 }
 0x3b6   :  { %2948 = vmatprep.mubr.bf16.mxu0 %v10507_v21  ;;  %3235 = vmatpush1.bf16.msra.mxu0 %v9147_v42 }
 0x3b7   :  { %3236 = vmatprep.subr.bf16.mxu0 %v9152_v2  ;;  %v9213_v2 = vld [vmem:[%s11898_s6] ss:$8 sps:$4 sm:$0xff]  }
 0x3ba   :  { %3237 = vmatpush1.bf16.msra.mxu0 %v9150_v3 }
 0x3bb   :  { %3238 = vmatprep.subr.bf16.mxu0 %v9155_v24 }
 0x3bd   :  { %2949 = vmatmul.mubr.bf16.gmra.mrb[68].mxu0 %v10505_v19 }
 0x3be   :  { %2958 = vmatprep.mubr.bf16.mxu0 %v10529_v27  ;;  %3239 = vmatpush1.bf16.msra.mxu0 %v9153_v34 }
 0x3bf   :  { %3240 = vmatprep.subr.bf16.mxu0 %v9158_v35 }
 0x3c2   :  { %3241 = vmatpush1.bf16.msra.mxu0 %v9156_v46 }
 0x3c3   :  { %3242 = vmatprep.subr.bf16.mxu0 %v9161_v47 }
 0x3c5   :  { %2959 = vmatmul.mubr.bf16.gmra.mrb[72].mxu0 %v10527_v6 }
 0x3c6   :  { %2968 = vmatprep.mubr.bf16.mxu0 %v10551_v29  ;;  %3243 = vmatpush1.bf16.msra.mxu0 %v9159_v52 }
 0x3c7   :  { %3244 = vmatprep.subr.bf16.mxu0 %v9164_v53 }
 0x3ca   :  { %3245 = vmatpush1.bf16.msra.mxu0 %v9162_v0  ;;  %v9219_v0 = vld [vmem:[%s11898_s6 + $0x20] ss:$8 sps:$4 sm:$0xff]  }
 0x3cd   :  { %2969 = vmatmul.mubr.bf16.gmra.mrb[76].mxu0 %v10549_v4 }
 0x3ce   :  { %2978 = vmatprep.mubr.bf16.mxu0 %v10573_v39 }
 0x3d5   :  { %2979 = vmatmul.mubr.bf16.gmra.mrb[80].mxu0 %v10571_v38 }
 0x3d6   :  { %2988 = vmatprep.mubr.bf16.mxu0 %v10583_v37 }
 0x3dd   :  { %2989 = vmatmul.mubr.bf16.gmra.mrb[84].mxu0 %v10581_v36 }
 0x3de   :  { %3246 = vmatprep.mubr.bf16.mxu0 %v10419_v60  ;;  %v9203_v60 = vld [vmem:[%s11898_s6 + $0x1c4] ss:$8 sps:$4 sm:$0xff]  }
 0x3df   :  { %3819 = vmatprep.subr.bf16.mxu1 %v9203_v60 }
 0x3e0   :  { %3820 = vmatpush1.bf16.msra.mxu1 %v9201_v61 }
 0x3e1   :  { %3821 = vmatprep.subr.bf16.mxu1 %v9206_v16  ;;  %v9225_v16 = vld [vmem:[%s11898_s6 + $0x40] ss:$8 sps:$4 sm:$0xff]  }
 0x3e4   :  { %3822 = vmatpush1.bf16.msra.mxu1 %v9204_v17 }
 0x3e5   :  { %3247 = vmatmul.mubr.bf16.vlgmr.msra.gmra.mrb[44].mxu0 %v10417_v57  ;;  %v9209_v57 = vld [vmem:[%s11898_s6 + $0x1e4] ss:$8 sps:$4 sm:$0xff]  }
 0x3e6   :  { %3256 = vmatprep.mubr.bf16.mxu0 %v10441_v62  ;;  %3823 = vmatprep.subr.bf16.mxu1 %v9209_v57  ;;  %v9212_v62 = vld [vmem:[%s11898_s6 + $0x1f4] ss:$8 sps:$4 sm:$0xff]  }
 0x3ed   :  { %3257 = vmatmul.mubr.bf16.gmra.mrb[48].mxu0 %v10439_v20  ;;  %v9207_v20 = vld [vmem:[%s11898_s6 + $0x1e0] ss:$8 sps:$4 sm:$0xff]  }
 0x3ee   :  { %3266 = vmatprep.mubr.bf16.mxu0 %v10463_v49  ;;  %3824 = vmatpush1.bf16.msra.mxu1 %v9207_v20  ;;  %v9215_v49 = vld [vmem:[%s11898_s6 + $0x4] ss:$8 sps:$4 sm:$0xff]   ;;  %v9230_v20 = vld [vmem:[%s11898_s6 + $0x54] ss:$8 sps:$4 sm:$0xff]  }
 0x3ef   :  { %3825 = vmatprep.subr.bf16.mxu1 %v9212_v62 }
 0x3f5   :  { %3267 = vmatmul.mubr.bf16.gmra.mrb[52].mxu0 %v10461_v48  ;;  %v9210_v48 = vld [vmem:[%s11898_s6 + $0x1f0] ss:$8 sps:$4 sm:$0xff]  }
 0x3f6   :  { %3276 = vmatprep.mubr.bf16.mxu0 %v10485_v55  ;;  %3826 = vmatpush1.bf16.msra.mxu1 %v9210_v48 }
 0x3f7   :  { %4098 = vmatprep.subr.bf16.mxu1 %v9215_v49 }
 0x3fd   :  { %3277 = vmatmul.mubr.bf16.gmra.mrb[56].mxu0 %v10483_v54  ;;  %v7476_v54 = vld [vmem:[%s11896_s7 + $0x2] ss:$4 sm:$0x3] }
 0x3fe   :  { %3286 = vmatprep.mubr.bf16.mxu0 %v10507_v21  ;;  %v10837_v55 = vrot.slane %v7476_v54, %v9927_v26 }
 0x405   :  { %3287 = vmatmul.mubr.bf16.gmra.mrb[60].mxu0 %v10505_v19  ;;  %v10840_v19 = vrot.slane %v7476_v54, %v9932_v28 }
 0x406   :  { %3296 = vmatprep.mubr.bf16.mxu0 %v10529_v27 }
 0x40d   :  { %3297 = vmatmul.mubr.bf16.gmra.mrb[64].mxu0 %v10527_v6 }
 0x40e   :  { %3306 = vmatprep.mubr.bf16.mxu0 %v10551_v29 }
 0x415   :  { %3307 = vmatmul.mubr.bf16.gmra.mrb[68].mxu0 %v10549_v4 }
 0x416   :  { %3316 = vmatprep.mubr.bf16.mxu0 %v10573_v39 }
 0x41d   :  { %3317 = vmatmul.mubr.bf16.gmra.mrb[72].mxu0 %v10571_v38 }
 0x41e   :  { %3326 = vmatprep.mubr.bf16.mxu0 %v10583_v37 }
 0x425   :  { %3327 = vmatmul.mubr.bf16.gmra.mrb[76].mxu0 %v10581_v36 }
 0x426   :  { %3336 = vmatprep.mubr.bf16.mxu0 %v10593_v8 }
 0x42d   :  { %3337 = vmatmul.mubr.bf16.gmra.mrb[80].mxu0 %v10591_v7 }
 0x42e   :  { %3346 = vmatprep.mubr.bf16.mxu0 %v9503_v1 }
 0x435   :  { %3347 = vmatmul.mubr.bf16.gmra.mrb[84].mxu0 %v9503_v1 }
 0x4b8   :  { %v3248_v21 = vpop.f32.mrb[44].mxu0 }
 0x4b9   :  { %v3414_v6 = vadd.f32 %v10837_v55, %v3248_v21  ;;  %v3250_v27 = vpop.f32.mrb[45].mxu0 }
 0x4ba   :  { %v3415_v4 = vadd.f32 %v10840_v19, %v3250_v27  ;;  %v3252_v29 = vpop.f32.mrb[46].mxu0 }
 0x4bb   :  { %v3416_v38 = vadd.f32 %v10837_v55, %v3252_v29  ;;  %v3254_v39 = vpop.f32.mrb[47].mxu0  ;;  %v3458_v37 = vmax.f32 %v3414_v6, 0.0  ;;  %v9228_v6 = vld [vmem:[%s11898_s6 + $0x50] ss:$8 sps:$4 sm:$0xff]   ;;  %v9233_v29 = vld [vmem:[%s11898_s6 + $0x64] ss:$8 sps:$4 sm:$0xff]  }
 0x4bc   :  { %v3417_v36 = vadd.f32 %v10840_v19, %v3254_v39  ;;  %v3459_v8 = vmax.f32 %v3415_v4, 0.0 }
 0x4bd   :  { %v3460_v7 = vmax.f32 %v3416_v38, 0.0 }
 0x4be   :  { %v3461_v58 = vmax.f32 %v3417_v36, 0.0 }
 0x4bf   :  { %v10846_v18 = vpack.c.bf16 %v3460_v7, %v3458_v37 }
 0x4c0   :  { %v10848_v41 = vpack.c.bf16 %v3461_v58, %v3459_v8  ;;  %v3258_v42 = vpop.f32.mrb[48].mxu0  ;;  %v9231_v8 = vld [vmem:[%s11898_s6 + $0x60] ss:$8 sps:$4 sm:$0xff]  }
 0x4c1   :  { %v3418_v3 = vadd.f32 %v10837_v55, %v3258_v42  ;;  %v3260_v24 = vpop.f32.mrb[49].mxu0 }
 0x4c2   :  { %v3419_v5 = vadd.f32 %v10840_v19, %v3260_v24  ;;  %v3262_v33 = vpop.f32.mrb[50].mxu0  ;;  %3827 = vmatprep.mubr.bf16.mxu1 %v10848_v41 }
 0x4c3   :  { %v3420_v34 = vadd.f32 %v10837_v55, %v3262_v33  ;;  %v3264_v35 = vpop.f32.mrb[51].mxu0  ;;  %3828 = vmatmul.mubr.bf16.vlgmr.msra.gmra.mrb[44].mxu1 %v10846_v18  ;;  %v3462_v46 = vmax.f32 %v3418_v3, 0.0 }
 0x4c4   :  { %v3421_v40 = vadd.f32 %v10840_v19, %v3264_v35  ;;  %4099 = vmatpush1.bf16.msra.mxu1 %v9213_v2  ;;  %v3463_v51 = vmax.f32 %v3419_v5, 0.0  ;;  %v9236_v2 = vld [vmem:[%s11898_s6 + $0x74] ss:$8 sps:$4 sm:$0xff]  }
 0x4c5   :  { %v3464_v47 = vmax.f32 %v3420_v34, 0.0  ;;  %4100 = vmatprep.subr.bf16.mxu1 %v9218_v25  ;;  %v9234_v34 = vld [vmem:[%s11898_s6 + $0x70] ss:$8 sps:$4 sm:$0xff]  }
 0x4c6   :  { %v3465_v52 = vmax.f32 %v3421_v40, 0.0 }
 0x4c7   :  { %v10868_v53 = vpack.c.bf16 %v3464_v47, %v3462_v46 }
 0x4c8   :  { %v10870_v56 = vpack.c.bf16 %v3465_v52, %v3463_v51  ;;  %v3268_v63 = vpop.f32.mrb[52].mxu0  ;;  %4101 = vmatpush1.bf16.msra.mxu1 %v9216_v44  ;;  %v9239_v44 = vld [vmem:[%s11898_s6 + $0x84] ss:$8 sps:$4 sm:$0xff]  }
 0x4c9   :  { %v3422_v30 = vadd.f32 %v10837_v55, %v3268_v63  ;;  %v3270_v59 = vpop.f32.mrb[53].mxu0  ;;  %4102 = vmatprep.subr.bf16.mxu1 %v9221_v50  ;;  %v9237_v63 = vld [vmem:[%s11898_s6 + $0x80] ss:$8 sps:$4 sm:$0xff]  }
 0x4ca   :  { %v3423_v9 = vadd.f32 %v10840_v19, %v3270_v59  ;;  %v3272_v45 = vpop.f32.mrb[54].mxu0  ;;  %3837 = vmatprep.mubr.bf16.mxu1 %v10870_v56  ;;  %v9242_v59 = vld [vmem:[%s11898_s6 + $0x94] ss:$8 sps:$4 sm:$0xff]  }
 0x4cb   :  { %v3424_v10 = vadd.f32 %v10837_v55, %v3272_v45  ;;  %v3274_v32 = vpop.f32.mrb[55].mxu0  ;;  %3838 = vmatmul.mubr.bf16.gmra.mrb[48].mxu1 %v10868_v53  ;;  %v3466_v43 = vmax.f32 %v3422_v30, 0.0 }
 0x4cc   :  { %v3425_v11 = vadd.f32 %v10840_v19, %v3274_v32  ;;  %4103 = vmatpush1.bf16.msra.mxu1 %v9219_v0  ;;  %v3467_v14 = vmax.f32 %v3423_v9, 0.0 }
 0x4cd   :  { %v3468_v31 = vmax.f32 %v3424_v10, 0.0  ;;  %4104 = vmatprep.subr.bf16.mxu1 %v9224_v15 }
 0x4ce   :  { %v3469_v22 = vmax.f32 %v3425_v11, 0.0  ;;  %v9240_v11 = vld [vmem:[%s11898_s6 + $0x90] ss:$8 sps:$4 sm:$0xff]  }
 0x4cf   :  { %v10890_v23 = vpack.c.bf16 %v3468_v31, %v3466_v43  ;;  %v9245_v31 = vld [vmem:[%s11898_s6 + $0xa4] ss:$8 sps:$4 sm:$0xff]  }
 0x4d0   :  { %v10892_v60 = vpack.c.bf16 %v3469_v22, %v3467_v14  ;;  %v3278_v61 = vpop.f32.mrb[56].mxu0  ;;  %4105 = vmatpush1.bf16.msra.mxu1 %v9222_v12 }
 0x4d1   :  { %v3426_v17 = vadd.f32 %v10837_v55, %v3278_v61  ;;  %v3280_v57 = vpop.f32.mrb[57].mxu0  ;;  %4106 = vmatprep.subr.bf16.mxu1 %v9227_v13 }
 0x4d2   :  { %v3427_v62 = vadd.f32 %v10840_v19, %v3280_v57  ;;  %v3282_v48 = vpop.f32.mrb[58].mxu0  ;;  %3847 = vmatprep.mubr.bf16.mxu1 %v10892_v60 }
 0x4d3   :  { %v3428_v49 = vadd.f32 %v10837_v55, %v3282_v48  ;;  %v3284_v54 = vpop.f32.mrb[59].mxu0  ;;  %3848 = vmatmul.mubr.bf16.gmra.mrb[52].mxu1 %v10890_v23  ;;  %v3470_v27 = vmax.f32 %v3426_v17, 0.0  ;;  %v9243_v17 = vld [vmem:[%s11898_s6 + $0xa0] ss:$8 sps:$4 sm:$0xff]  }
 0x4d4   :  { %v3429_v21 = vadd.f32 %v10840_v19, %v3284_v54  ;;  %4107 = vmatpush1.bf16.msra.mxu1 %v9225_v16  ;;  %v3471_v38 = vmax.f32 %v3427_v62, 0.0  ;;  %v9248_v62 = vld [vmem:[%s11898_s6 + $0xb4] ss:$8 sps:$4 sm:$0xff]  }
 0x4d5   :  { %v3472_v4 = vmax.f32 %v3428_v49, 0.0  ;;  %4108 = vmatprep.subr.bf16.mxu1 %v9230_v20 }
 0x4d6   :  { %v3473_v39 = vmax.f32 %v3429_v21, 0.0 }
 0x4d7   :  { %v10912_v36 = vpack.c.bf16 %v3472_v4, %v3470_v27  ;;  %v9246_v27 = vld [vmem:[%s11898_s6 + $0xb0] ss:$8 sps:$4 sm:$0xff]  }
 0x4d8   :  { %v10914_v37 = vpack.c.bf16 %v3473_v39, %v3471_v38  ;;  %v3288_v7 = vpop.f32.mrb[60].mxu0  ;;  %4109 = vmatpush1.bf16.msra.mxu1 %v9228_v6  ;;  %v9251_v38 = vld [vmem:[%s11898_s6 + $0xc4] ss:$8 sps:$4 sm:$0xff]  }
 0x4d9   :  { %v3430_v58 = vadd.f32 %v10837_v55, %v3288_v7  ;;  %v3290_v42 = vpop.f32.mrb[61].mxu0  ;;  %4110 = vmatprep.subr.bf16.mxu1 %v9233_v29 }
 0x4da   :  { %v3431_v3 = vadd.f32 %v10840_v19, %v3290_v42  ;;  %v3292_v24 = vpop.f32.mrb[62].mxu0  ;;  %3857 = vmatprep.mubr.bf16.mxu1 %v10914_v37 }
 0x4db   :  { %v3432_v25 = vadd.f32 %v10837_v55, %v3292_v24  ;;  %v3294_v5 = vpop.f32.mrb[63].mxu0  ;;  %3858 = vmatmul.mubr.bf16.gmra.mrb[56].mxu1 %v10912_v36  ;;  %v3474_v35 = vmax.f32 %v3430_v58, 0.0 }
 0x4dc   :  { %v3433_v33 = vadd.f32 %v10840_v19, %v3294_v5  ;;  %4111 = vmatpush1.bf16.msra.mxu1 %v9231_v8  ;;  %v3475_v46 = vmax.f32 %v3431_v3, 0.0 }
 0x4dd   :  { %v3476_v40 = vmax.f32 %v3432_v25, 0.0  ;;  %4112 = vmatprep.subr.bf16.mxu1 %v9236_v2  ;;  %v9249_v2 = vld [vmem:[%s11898_s6 + $0xc0] ss:$8 sps:$4 sm:$0xff]   ;;  %v9254_v25 = vld [vmem:[%s11898_s6 + $0xd4] ss:$8 sps:$4 sm:$0xff]  }
 0x4de   :  { %v3477_v47 = vmax.f32 %v3433_v33, 0.0 }
 0x4df   :  { %v10934_v50 = vpack.c.bf16 %v3476_v40, %v3474_v35 }
 0x4e0   :  { %v10936_v51 = vpack.c.bf16 %v3477_v47, %v3475_v46  ;;  %v3298_v52 = vpop.f32.mrb[64].mxu0  ;;  %4113 = vmatpush1.bf16.msra.mxu1 %v9234_v34 }
 0x4e1   :  { %v3434_v0 = vadd.f32 %v10837_v55, %v3298_v52  ;;  %v3300_v30 = vpop.f32.mrb[65].mxu0  ;;  %4114 = vmatprep.subr.bf16.mxu1 %v9239_v44  ;;  %v9252_v44 = vld [vmem:[%s11898_s6 + $0xd0] ss:$8 sps:$4 sm:$0xff]   ;;  %v9257_v52 = vld [vmem:[%s11898_s6 + $0xe4] ss:$8 sps:$4 sm:$0xff]  }
 0x4e2   :  { %v3435_v15 = vadd.f32 %v10840_v19, %v3300_v30  ;;  %v3302_v9 = vpop.f32.mrb[66].mxu0  ;;  %3867 = vmatprep.mubr.bf16.mxu1 %v10936_v51 }
 0x4e3   :  { %v3436_v45 = vadd.f32 %v10837_v55, %v3302_v9  ;;  %v3304_v10 = vpop.f32.mrb[67].mxu0  ;;  %3868 = vmatmul.mubr.bf16.gmra.mrb[60].mxu1 %v10934_v50  ;;  %v3478_v12 = vmax.f32 %v3434_v0, 0.0  ;;  %v9255_v9 = vld [vmem:[%s11898_s6 + $0xe0] ss:$8 sps:$4 sm:$0xff]  }
 0x4e4   :  { %v3437_v32 = vadd.f32 %v10840_v19, %v3304_v10  ;;  %4115 = vmatpush1.bf16.msra.mxu1 %v9237_v63  ;;  %v3479_v13 = vmax.f32 %v3435_v15, 0.0 }
 0x4e5   :  { %v3480_v43 = vmax.f32 %v3436_v45, 0.0  ;;  %4116 = vmatprep.subr.bf16.mxu1 %v9242_v59 }
 0x4e6   :  { %v3481_v14 = vmax.f32 %v3437_v32, 0.0  ;;  %v9260_v32 = vld [vmem:[%s11898_s6 + $0xf4] ss:$8 sps:$4 sm:$0xff]  }
 0x4e7   :  { %v10956_v22 = vpack.c.bf16 %v3480_v43, %v3478_v12 }
 0x4e8   :  { %v10958_v61 = vpack.c.bf16 %v3481_v14, %v3479_v13  ;;  %v3308_v16 = vpop.f32.mrb[68].mxu0  ;;  %4117 = vmatpush1.bf16.msra.mxu1 %v9240_v11  ;;  %v9258_v14 = vld [vmem:[%s11898_s6 + $0xf0] ss:$8 sps:$4 sm:$0xff]  }
 0x4e9   :  { %v3438_v57 = vadd.f32 %v10837_v55, %v3308_v16  ;;  %v3310_v20 = vpop.f32.mrb[69].mxu0  ;;  %4118 = vmatprep.subr.bf16.mxu1 %v9245_v31 }
 0x4ea   :  { %v3439_v48 = vadd.f32 %v10840_v19, %v3310_v20  ;;  %v3312_v49 = vpop.f32.mrb[70].mxu0  ;;  %3877 = vmatprep.mubr.bf16.mxu1 %v10958_v61 }
 0x4eb   :  { %v3440_v54 = vadd.f32 %v10837_v55, %v3312_v49  ;;  %v3314_v21 = vpop.f32.mrb[71].mxu0  ;;  %3878 = vmatmul.mubr.bf16.gmra.mrb[64].mxu1 %v10956_v22  ;;  %v3482_v4 = vmax.f32 %v3438_v57, 0.0  ;;  %v9263_v57 = vld [vmem:[%s11898_s6 + $0x204] ss:$8 sps:$4 sm:$0xff]  }
 0x4ec   :  { %v3441_v6 = vadd.f32 %v10840_v19, %v3314_v21  ;;  %4119 = vmatpush1.bf16.msra.mxu1 %v9243_v17  ;;  %v3483_v39 = vmax.f32 %v3439_v48, 0.0 }
 0x4ed   :  { %v3484_v29 = vmax.f32 %v3440_v54, 0.0  ;;  %4120 = vmatprep.subr.bf16.mxu1 %v9248_v62 }
 0x4ee   :  { %v3485_v7 = vmax.f32 %v3441_v6, 0.0 }
 0x4ef   :  { %v10978_v8 = vpack.c.bf16 %v3484_v29, %v3482_v4 }
 0x4f0   :  { %v10980_v58 = vpack.c.bf16 %v3485_v7, %v3483_v39  ;;  %v3318_v42 = vpop.f32.mrb[72].mxu0  ;;  %4121 = vmatpush1.bf16.msra.mxu1 %v9246_v27 }
 0x4f1   :  { %v3442_v3 = vadd.f32 %v10837_v55, %v3318_v42  ;;  %v3320_v24 = vpop.f32.mrb[73].mxu0  ;;  %4122 = vmatprep.subr.bf16.mxu1 %v9251_v38 }
 0x4f2   :  { %v3443_v5 = vadd.f32 %v10840_v19, %v3320_v24  ;;  %v3322_v33 = vpop.f32.mrb[74].mxu0  ;;  %3887 = vmatprep.mubr.bf16.mxu1 %v10980_v58 }
 0x4f3   :  { %v3444_v34 = vadd.f32 %v10837_v55, %v3322_v33  ;;  %v3324_v35 = vpop.f32.mrb[75].mxu0  ;;  %3888 = vmatmul.mubr.bf16.gmra.mrb[68].mxu1 %v10978_v8  ;;  %v3486_v46 = vmax.f32 %v3442_v3, 0.0 }
 0x4f4   :  { %v3445_v40 = vadd.f32 %v10840_v19, %v3324_v35  ;;  %4123 = vmatpush1.bf16.msra.mxu1 %v9249_v2  ;;  %v3487_v63 = vmax.f32 %v3443_v5, 0.0 }
 0x4f5   :  { %v3488_v47 = vmax.f32 %v3444_v34, 0.0  ;;  %4124 = vmatprep.subr.bf16.mxu1 %v9254_v25 }
 0x4f6   :  { %v3489_v0 = vmax.f32 %v3445_v40, 0.0 }
 0x4f7   :  { %v11000_v30 = vpack.c.bf16 %v3488_v47, %v3486_v46 }
 0x4f8   :  { %v11002_v59 = vpack.c.bf16 %v3489_v0, %v3487_v63  ;;  %v3328_v15 = vpop.f32.mrb[76].mxu0  ;;  %4125 = vmatpush1.bf16.msra.mxu1 %v9252_v44 }
 0x4f9   :  { %v3446_v45 = vadd.f32 %v10837_v55, %v3328_v15  ;;  %v3330_v10 = vpop.f32.mrb[77].mxu0  ;;  %4126 = vmatprep.subr.bf16.mxu1 %v9257_v52 }
 0x4fa   :  { %v3447_v11 = vadd.f32 %v10840_v19, %v3330_v10  ;;  %v3332_v12 = vpop.f32.mrb[78].mxu0  ;;  %3897 = vmatprep.mubr.bf16.mxu1 %v11002_v59  ;;  %v9264_v10 = vld [vmem:[%s11898_s6 + $0x210] ss:$8 sps:$4 sm:$0xff]  }
 0x4fb   :  { %v3448_v43 = vadd.f32 %v10837_v55, %v3332_v12  ;;  %v3334_v31 = vpop.f32.mrb[79].mxu0  ;;  %3898 = vmatmul.mubr.bf16.gmra.mrb[72].mxu1 %v11000_v30  ;;  %v3490_v16 = vmax.f32 %v3446_v45, 0.0  ;;  %v9270_v12 = vld [vmem:[%s11898_s6 + $0x230] ss:$8 sps:$4 sm:$0xff]  }
 0x4fc   :  { %v3449_v13 = vadd.f32 %v10840_v19, %v3334_v31  ;;  %4127 = vmatpush1.bf16.msra.mxu1 %v9255_v9  ;;  %v3491_v20 = vmax.f32 %v3447_v11, 0.0  ;;  %v9267_v11 = vld [vmem:[%s11898_s6 + $0x220] ss:$8 sps:$4 sm:$0xff]  }
 0x4fd   :  { %v3492_v17 = vmax.f32 %v3448_v43, 0.0  ;;  %4128 = vmatprep.subr.bf16.mxu1 %v9260_v32  ;;  %v9269_v32 = vld [vmem:[%s11898_s6 + $0x224] ss:$8 sps:$4 sm:$0xff]   ;;  %v9273_v31 = vld [vmem:[%s11898_s6 + $0x240] ss:$8 sps:$4 sm:$0xff]  }
 0x4fe   :  { %v3493_v62 = vmax.f32 %v3449_v13, 0.0  ;;  %v9275_v43 = vld [vmem:[%s11898_s6 + $0x244] ss:$8 sps:$4 sm:$0xff]   ;;  %v9276_v13 = vld [vmem:[%s11898_s6 + $0x250] ss:$8 sps:$4 sm:$0xff]  }
 0x4ff   :  { %v11022_v48 = vpack.c.bf16 %v3492_v17, %v3490_v16  ;;  %v9279_v16 = vld [vmem:[%s11898_s6 + $0x260] ss:$8 sps:$4 sm:$0xff]   ;;  %v9284_v17 = vld [vmem:[%s11898_s6 + $0x274] ss:$8 sps:$4 sm:$0xff]  }
 0x500   :  { %v11024_v49 = vpack.c.bf16 %v3493_v62, %v3491_v20  ;;  %v3338_v54 = vpop.f32.mrb[80].mxu0  ;;  %4129 = vmatpush1.bf16.msra.mxu1 %v9258_v14  ;;  %v9281_v14 = vld [vmem:[%s11898_s6 + $0x264] ss:$8 sps:$4 sm:$0xff]   ;;  %v9285_v62 = vld [vmem:[%s11898_s6 + $0x280] ss:$8 sps:$4 sm:$0xff]  }
 0x501   :  { %v3450_v21 = vadd.f32 %v10837_v55, %v3338_v54  ;;  %v3340_v6 = vpop.f32.mrb[81].mxu0  ;;  %4456 = vmatprep.subr.bf16.mxu1 %v9263_v57  ;;  %v9282_v57 = vld [vmem:[%s11898_s6 + $0x270] ss:$8 sps:$4 sm:$0xff]   ;;  %v9287_v20 = vld [vmem:[%s11898_s6 + $0x284] ss:$8 sps:$4 sm:$0xff]  }
 0x502   :  { %v3451_v27 = vadd.f32 %v10840_v19, %v3340_v6  ;;  %v3342_v4 = vpop.f32.mrb[82].mxu0  ;;  %3907 = vmatprep.mubr.bf16.mxu1 %v11024_v49  ;;  %v9290_v54 = vld [vmem:[%s11898_s6 + $0x294] ss:$8 sps:$4 sm:$0xff]   ;;  %v9293_v6 = vld [vmem:[%s11898_s6 + $0x2a4] ss:$8 sps:$4 sm:$0xff]  }
 0x503   :  { %v3452_v29 = vadd.f32 %v10837_v55, %v3342_v4  ;;  %v3344_v38 = vpop.f32.mrb[83].mxu0  ;;  %3908 = vmatmul.mubr.bf16.gmra.mrb[76].mxu1 %v11022_v48  ;;  %v3494_v7 = vmax.f32 %v3450_v21, 0.0  ;;  %v9288_v21 = vld [vmem:[%s11898_s6 + $0x290] ss:$8 sps:$4 sm:$0xff]   ;;  %v9296_v4 = vld [vmem:[%s11898_s6 + $0x2b4] ss:$8 sps:$4 sm:$0xff]  }
 0x504   :  { %v3453_v39 = vadd.f32 %v10840_v19, %v3344_v38  ;;  %v3495_v2 = vmax.f32 %v3451_v27, 0.0  ;;  %v9291_v27 = vld [vmem:[%s11898_s6 + $0x2a0] ss:$8 sps:$4 sm:$0xff]   ;;  %v9299_v38 = vld [vmem:[%s11898_s6 + $0x2c4] ss:$8 sps:$4 sm:$0xff]  }
 0x505   :  { %v3496_v42 = vmax.f32 %v3452_v29, 0.0  ;;  %v9294_v29 = vld [vmem:[%s11898_s6 + $0x2b0] ss:$8 sps:$4 sm:$0xff]  }
 0x506   :  { %v3497_v3 = vmax.f32 %v3453_v39, 0.0  ;;  %v9309_v39 = vld [vmem:[%s11899_s8 + $0xc0] sm:$0xff]  }
 0x507   :  { %v11032_v24 = vpack.c.bf16 %v3496_v42, %v3494_v7  ;;  %v9310_v7 = vld [vmem:[%s11899_s8 + $0x80] sm:$0xff]   ;;  %8180 = vmatprep.subr.bf16.mxu0 %v9309_v39 }
 0x508   :  { %v11034_v25 = vpack.c.bf16 %v3497_v3, %v3495_v2  ;;  %v3348_v5 = vpop.f32.mrb[84].mxu0  ;;  %v9297_v42 = vld [vmem:[%s11898_s6 + $0x2c0] ss:$8 sps:$4 sm:$0xff]   ;;  %8181 = vmatpush3.bf16.msra.mxu0 %v9310_v7 }
 0x509   :  { %v3454_v33 = vadd.f32 %v10837_v55, %v3348_v5  ;;  %v3350_v34 = vpop.f32.mrb[85].mxu0  ;;  %v9311_v2 = vld [vmem:[%s11899_s8 + $0xc8] sm:$0xff]   ;;  %v9302_v5 = vld [vmem:[%s11898_s6 + $0x2d4] ss:$8 sps:$4 sm:$0xff]  }
 0x50a   :  { %v3455_v35 = vadd.f32 %v10840_v19, %v3350_v34  ;;  %v3352_v40 = vpop.f32.mrb[86].mxu0  ;;  %3917 = vmatprep.mubr.bf16.mxu1 %v11034_v25  ;;  %v9312_v3 = vld [vmem:[%s11899_s8 + $0x88] sm:$0xff]   ;;  %8182 = vmatprep.subr.bf16.mxu0 %v9311_v2  ;;  %v9300_v34 = vld [vmem:[%s11898_s6 + $0x2d0] ss:$8 sps:$4 sm:$0xff]  }
 0x50b   :  { %v3456_v44 = vadd.f32 %v10837_v55, %v3352_v40  ;;  %v3354_v46 = vpop.f32.mrb[87].mxu0  ;;  %3918 = vmatmul.mubr.bf16.gmra.mrb[80].mxu1 %v11032_v24  ;;  %v3498_v52 = vmax.f32 %v3454_v33, 0.0  ;;  %v9261_v55 = vld [vmem:[%s11898_s6 + $0x200] ss:$8 sps:$4 sm:$0xff]   ;;  %v9313_v33 = vld [vmem:[%s11899_s8 + $0xd0] sm:$0xff]   ;;  %v9315_v40 = vld [vmem:[%s11899_s8 + $0xd8] sm:$0xff]  }
 0x50c   :  { %v3457_v47 = vadd.f32 %v10840_v19, %v3354_v46  ;;  %v3499_v0 = vmax.f32 %v3455_v35, 0.0  ;;  %v9266_v19 = vld [vmem:[%s11898_s6 + $0x214] ss:$8 sps:$4 sm:$0xff]   ;;  %8183 = vmatpush3.bf16.msra.mxu0 %v9312_v3  ;;  %v9303_v46 = vld [vmem:[%s11898_s6 + $0x2e0] ss:$8 sps:$4 sm:$0xff]  }
 0x50d   :  { %v3500_v63 = vmax.f32 %v3456_v44, 0.0  ;;  %v9314_v35 = vld [vmem:[%s11899_s8 + $0x90] sm:$0xff]   ;;  %v9305_v44 = vld [vmem:[%s11898_s6 + $0x2e4] ss:$8 sps:$4 sm:$0xff]   ;;  %8184 = vmatprep.subr.bf16.mxu0 %v9313_v33 }
 0x50e   :  { %v3501_v15 = vmax.f32 %v3457_v47, 0.0  ;;  %v9316_v47 = vld [vmem:[%s11899_s8 + $0x98] sm:$0xff]   ;;  %v4789_v33 = vld [vmem:[%s11901_s1 + $0x8] sm:$0xff] }
 0x50f   :  { %v11042_v9 = vpack.c.bf16 %v3500_v63, %v3498_v52  ;;  %v9308_v52 = vld [vmem:[%s11898_s6 + $0x2f4] ss:$8 sps:$4 sm:$0xff]   ;;  %v9319_v63 = vld [vmem:[%s11899_s8 + $0xe0] sm:$0xff]  }
 0x510   :  { %v11044_v45 = vpack.c.bf16 %v3501_v15, %v3499_v0  ;;  %8185 = vmatpush3.bf16.msra.mxu0 %v9314_v35  ;;  %v9306_v0 = vld [vmem:[%s11898_s6 + $0x2f0] ss:$8 sps:$4 sm:$0xff]   ;;  %v9320_v15 = vld [vmem:[%s11899_s8 + $0xa0] sm:$0xff]  }
 0x511   :  { %8186 = vmatprep.subr.bf16.mxu0 %v9315_v40 }
 0x512   :  { %3927 = vmatprep.mubr.bf16.mxu1 %v11044_v45 }
 0x513   :  { %3928 = vmatmul.mubr.bf16.gmra.mrb[84].mxu1 %v11042_v9 }
 0x514   :  { %4130 = vmatprep.mubr.bf16.mxu1 %v9503_v1  ;;  %8187 = vmatpush3.bf16.msra.mxu0 %v9316_v47 }
 0x515   :  { %8188 = vmatprep.subr.bf16.mxu0 %v9319_v63 }
 0x518   :  { %8189 = vmatpush3.bf16.msra.mxu0 %v9320_v15 }
 0x51b   :  { %4131 = vmatmul.mubr.bf16.vlgmr.msra.gmra.mrb[44].mxu1 %v9503_v1 }
 0x51c   :  { %4140 = vmatprep.mubr.bf16.mxu1 %v10848_v41  ;;  %4457 = vmatpush1.bf16.msra.mxu1 %v9261_v55  ;;  %v9272_v41 = vld [vmem:[%s11898_s6 + $0x234] ss:$8 sps:$4 sm:$0xff]   ;;  %v9323_v55 = vld [vmem:[%s11899_s8 + $0xe8] sm:$0xff]  }
 0x51d   :  { %4458 = vmatprep.subr.bf16.mxu1 %v9266_v19  ;;  %v9317_v19 = vld [vmem:[%s11899_s8 + $0x1c0] sm:$0xff]   ;;  %8190 = vmatprep.subr.bf16.mxu0 %v9323_v55 }
 0x520   :  { %4459 = vmatpush1.bf16.msra.mxu1 %v9264_v10  ;;  %v9324_v10 = vld [vmem:[%s11899_s8 + $0xa8] sm:$0xff]  }
 0x521   :  { %4460 = vmatprep.subr.bf16.mxu1 %v9269_v32  ;;  %v9327_v32 = vld [vmem:[%s11899_s8 + $0xf0] sm:$0xff]   ;;  %8191 = vmatpush3.bf16.msra.mxu0 %v9324_v10 }
 0x522   :  { %8192 = vmatprep.subr.bf16.mxu0 %v9327_v32 }
 0x523   :  { %4141 = vmatmul.mubr.bf16.gmra.mrb[48].mxu1 %v10846_v18  ;;  %v9278_v18 = vld [vmem:[%s11898_s6 + $0x254] ss:$8 sps:$4 sm:$0xff]  }
 0x524   :  { %4150 = vmatprep.mubr.bf16.mxu1 %v10870_v56  ;;  %4461 = vmatpush1.bf16.msra.mxu1 %v9267_v11  ;;  %v9328_v11 = vld [vmem:[%s11899_s8 + $0xb0] sm:$0xff]  }
 0x525   :  { %4462 = vmatprep.subr.bf16.mxu1 %v9272_v41  ;;  %8193 = vmatpush3.bf16.msra.mxu0 %v9328_v11  ;;  %v9318_v41 = vld [vmem:[%s11899_s8 + $0x180] sm:$0xff]  }
 0x528   :  { %4463 = vmatpush1.bf16.msra.mxu1 %v9270_v12  ;;  %v9321_v12 = vld [vmem:[%s11899_s8 + $0x1c8] sm:$0xff]  }
 0x529   :  { %4464 = vmatprep.subr.bf16.mxu1 %v9275_v43  ;;  %v9322_v43 = vld [vmem:[%s11899_s8 + $0x188] sm:$0xff]  }
 0x52b   :  { %4151 = vmatmul.mubr.bf16.gmra.mrb[52].mxu1 %v10868_v53 }
 0x52c   :  { %4160 = vmatprep.mubr.bf16.mxu1 %v10892_v60  ;;  %4465 = vmatpush1.bf16.msra.mxu1 %v9273_v31  ;;  %v9325_v31 = vld [vmem:[%s11899_s8 + $0x1d0] sm:$0xff]  }
 0x52d   :  { %4466 = vmatprep.subr.bf16.mxu1 %v9278_v18  ;;  %v9329_v18 = vld [vmem:[%s11899_s8 + $0x1d8] sm:$0xff]  }
 0x530   :  { %4467 = vmatpush1.bf16.msra.mxu1 %v9276_v13 }
 0x531   :  { %4468 = vmatprep.subr.bf16.mxu1 %v9281_v14 }
 0x533   :  { %4161 = vmatmul.mubr.bf16.gmra.mrb[56].mxu1 %v10890_v23 }
 0x534   :  { %4170 = vmatprep.mubr.bf16.mxu1 %v10914_v37  ;;  %4469 = vmatpush1.bf16.msra.mxu1 %v9279_v16 }
 0x535   :  { %4470 = vmatprep.subr.bf16.mxu1 %v9284_v17 }
 0x538   :  { %4471 = vmatpush1.bf16.msra.mxu1 %v9282_v57 }
 0x539   :  { %4472 = vmatprep.subr.bf16.mxu1 %v9287_v20 }
 0x53b   :  { %4171 = vmatmul.mubr.bf16.gmra.mrb[60].mxu1 %v10912_v36 }
 0x53c   :  { %4180 = vmatprep.mubr.bf16.mxu1 %v10936_v51  ;;  %4473 = vmatpush1.bf16.msra.mxu1 %v9285_v62 }
 0x53d   :  { %4474 = vmatprep.subr.bf16.mxu1 %v9290_v54 }
 0x540   :  { %4475 = vmatpush1.bf16.msra.mxu1 %v9288_v21 }
 0x541   :  { %4476 = vmatprep.subr.bf16.mxu1 %v9293_v6 }
 0x543   :  { %4181 = vmatmul.mubr.bf16.gmra.mrb[64].mxu1 %v10934_v50 }
 0x544   :  { %4190 = vmatprep.mubr.bf16.mxu1 %v10958_v61  ;;  %4477 = vmatpush1.bf16.msra.mxu1 %v9291_v27 }
 0x545   :  { %4478 = vmatprep.subr.bf16.mxu1 %v9296_v4 }
 0x548   :  { %4479 = vmatpush1.bf16.msra.mxu1 %v9294_v29 }
 0x549   :  { %4480 = vmatprep.subr.bf16.mxu1 %v9299_v38  ;;  %v9337_v38 = vld [vmem:[%s11899_s8 + $0x140] sm:$0xff]  }
 0x54b   :  { %4191 = vmatmul.mubr.bf16.gmra.mrb[68].mxu1 %v10956_v22 }
 0x54c   :  { %4200 = vmatprep.mubr.bf16.mxu1 %v10980_v58  ;;  %4481 = vmatpush1.bf16.msra.mxu1 %v9297_v42 }
 0x54d   :  { %4482 = vmatprep.subr.bf16.mxu1 %v9302_v5  ;;  %v4788_v5 = vld [vmem:[%s11901_s1] sm:$0xff] }
 0x54e   :  { %v4790_v47 = vpack.c.bf16 %v4789_v33, %v4788_v5  ;;  %v9359_v5 = vld [vmem:[%s11899_s8 + $0x128] sm:$0xff]   ;;  %v9360_v33 = vld [vmem:[%s11899_s8 + $0x298] sm:$0xff]  }
 0x550   :  { %4483 = vmatpush1.bf16.msra.mxu1 %v9300_v34 }
 0x551   :  { %4484 = vmatprep.subr.bf16.mxu1 %v9305_v44 }
 0x553   :  { %4201 = vmatmul.mubr.bf16.gmra.mrb[72].mxu1 %v10978_v8 }
 0x554   :  { %4210 = vmatprep.mubr.bf16.mxu1 %v11002_v59  ;;  %4485 = vmatpush1.bf16.msra.mxu1 %v9303_v46 }
 0x555   :  { %4486 = vmatprep.subr.bf16.mxu1 %v9308_v52 }
 0x558   :  { %4487 = vmatpush1.bf16.msra.mxu1 %v9306_v0  ;;  %v9339_v0 = vld [vmem:[%s11899_s8 + $0x100] sm:$0xff]  }
 0x559   :  { %8226 = vmatprep.subr.bf16.mxu1 %v9317_v19  ;;  %v9341_v19 = vld [vmem:[%s11899_s8 + $0x148] sm:$0xff]  }
 0x55b   :  { %4211 = vmatmul.mubr.bf16.gmra.mrb[76].mxu1 %v11000_v30 }
 0x55c   :  { %4220 = vmatprep.mubr.bf16.mxu1 %v11024_v49 }
 0x563   :  { %4221 = vmatmul.mubr.bf16.gmra.mrb[80].mxu1 %v11022_v48 }
 0x564   :  { %4230 = vmatprep.mubr.bf16.mxu1 %v11034_v25 }
 0x56b   :  { %4231 = vmatmul.mubr.bf16.gmra.mrb[84].mxu1 %v11032_v24 }
 0x56c   :  { %4488 = vmatprep.mubr.bf16.mxu1 %v10870_v56  ;;  %v9326_v56 = vld [vmem:[%s11899_s8 + $0x190] sm:$0xff]  }
 0x573   :  { %4489 = vmatmul.mubr.bf16.vlgmr.msra.gmra.mrb[44].mxu1 %v10868_v53  ;;  %v9330_v53 = vld [vmem:[%s11899_s8 + $0x198] sm:$0xff]  }
 0x574   :  { %4498 = vmatprep.mubr.bf16.mxu1 %v10892_v60  ;;  %8227 = vmatpush3.bf16.msra.mxu1 %v9318_v41  ;;  %v9332_v60 = vld [vmem:[%s11899_s8 + $0xb8] sm:$0xff]  }
 0x575   :  { %8228 = vmatprep.subr.bf16.mxu1 %v9321_v12 }
 0x578   :  { %8229 = vmatpush3.bf16.msra.mxu1 %v9322_v43  ;;  %v9343_v43 = vld [vmem:[%s11899_s8 + $0x108] sm:$0xff]  }
 0x579   :  { %8230 = vmatprep.subr.bf16.mxu1 %v9325_v31 }
 0x57b   :  { %4499 = vmatmul.mubr.bf16.gmra.mrb[48].mxu1 %v10890_v23  ;;  %v9331_v23 = vld [vmem:[%s11899_s8 + $0xf8] sm:$0xff]  }
 0x57c   :  { %4508 = vmatprep.mubr.bf16.mxu1 %v10914_v37  ;;  %8231 = vmatpush3.bf16.msra.mxu1 %v9326_v56  ;;  %v9334_v37 = vld [vmem:[%s11899_s8 + $0x1a0] sm:$0xff]  }
 0x57d   :  { %8232 = vmatprep.subr.bf16.mxu1 %v9329_v18  ;;  %8194 = vmatprep.subr.bf16.mxu0 %v9331_v23  ;;  %v9345_v18 = vld [vmem:[%s11899_s8 + $0x150] sm:$0xff]  }
 0x57e   :  { %8195 = vmatpush3.bf16.msra.mxu0 %v9332_v60 }
 0x580   :  { %8233 = vmatpush3.bf16.msra.mxu1 %v9330_v53 }
 0x583   :  { %4509 = vmatmul.mubr.bf16.gmra.mrb[52].mxu1 %v10912_v36  ;;  %v9333_v36 = vld [vmem:[%s11899_s8 + $0x1e0] sm:$0xff]  }
 0x584   :  { %4518 = vmatprep.mubr.bf16.mxu1 %v10936_v51  ;;  %8234 = vmatprep.subr.bf16.mxu1 %v9333_v36  ;;  %v9504_v51 = vmov 0.0  }
 0x585   :  { %8235 = vmatpush3.bf16.msra.mxu1 %v9334_v37  ;;  %8433 = vmatprep.subr.bf16.mxu0 %v9504_v51 }
 0x58b   :  { %4519 = vmatmul.mubr.bf16.gmra.mrb[56].mxu1 %v10934_v50  ;;  %v9336_v50 = vld [vmem:[%s11899_s8 + $0x1a8] sm:$0xff]  }
 0x58c   :  { %4528 = vmatprep.mubr.bf16.mxu1 %v10958_v61  ;;  %v9340_v61 = vld [vmem:[%s11899_s8 + $0x1b0] sm:$0xff]  }
 0x593   :  { %4529 = vmatmul.mubr.bf16.gmra.mrb[60].mxu1 %v10956_v22  ;;  %v9338_v22 = vld [vmem:[%s11899_s8 + $0x1f0] sm:$0xff]  }
 0x594   :  { %4538 = vmatprep.mubr.bf16.mxu1 %v10980_v58  ;;  %v9344_v58 = vld [vmem:[%s11899_s8 + $0x1b8] sm:$0xff]  }
 0x59b   :  { %4539 = vmatmul.mubr.bf16.gmra.mrb[64].mxu1 %v10978_v8  ;;  %v9342_v8 = vld [vmem:[%s11899_s8 + $0x1f8] sm:$0xff]  }
 0x59c   :  { %4548 = vmatprep.mubr.bf16.mxu1 %v11002_v59  ;;  %v7637_v59 = vld [vmem:[%s11896_s7 + $0x3] ss:$4 sm:$0x3] }
 0x5a3   :  { %4549 = vmatmul.mubr.bf16.gmra.mrb[68].mxu1 %v11000_v30  ;;  %v9346_v30 = vld [vmem:[%s11899_s8 + $0x2c0] sm:$0xff]  }
 0x5a4   :  { %4558 = vmatprep.mubr.bf16.mxu1 %v11024_v49  ;;  %v11292_v49 = vrot.slane %v7637_v59, %v9932_v28  ;;  %v4791_v28 = vld [vmem:[%s11900_s9] sm:$0xf] }
 0x5a5   :  { %v4970_v29 = vsel %vm4968_vm2, %v4791_v28, 0 }
 0x5ab   :  { %4559 = vmatmul.mubr.bf16.gmra.mrb[72].mxu1 %v11022_v48  ;;  %v11289_v48 = vrot.slane %v7637_v59, %v9927_v26 }
 0x5ac   :  { %4568 = vmatprep.mubr.bf16.mxu1 %v11034_v25 }
 0x5b3   :  { %4569 = vmatmul.mubr.bf16.gmra.mrb[76].mxu1 %v11032_v24 }
 0x5b4   :  { %4578 = vmatprep.mubr.bf16.mxu1 %v11044_v45 }
 0x5bb   :  { %4579 = vmatmul.mubr.bf16.gmra.mrb[80].mxu1 %v11042_v9 }
 0x5bc   :  { %4588 = vmatprep.mubr.bf16.mxu1 %v9503_v1 }
 0x5c3   :  { %4589 = vmatmul.mubr.bf16.gmra.mrb[84].mxu1 %v9503_v1  ;;  %v9335_v1 = vld [vmem:[%s11899_s8 + $0x1e8] sm:$0xff]  }
 0x5c4   :  { %8236 = vmatprep.subr.bf16.mxu1 %v9335_v1  ;;  %v9347_v1 = vld [vmem:[%s11899_s8 + $0x110] sm:$0xff]  }
 0x5c5   :  { %8237 = vmatpush3.bf16.msra.mxu1 %v9336_v50  ;;  %v9348_v50 = vld [vmem:[%s11899_s8 + $0x280] sm:$0xff]  }
 0x5c6   :  { %8238 = vmatprep.subr.bf16.mxu1 %v9338_v22 }
 0x5c9   :  { %8239 = vmatpush3.bf16.msra.mxu1 %v9340_v61 }
 0x5ca   :  { %8240 = vmatprep.subr.bf16.mxu1 %v9342_v8  ;;  %v9349_v8 = vld [vmem:[%s11899_s8 + $0x158] sm:$0xff]  }
 0x5cd   :  { %8241 = vmatpush3.bf16.msra.mxu1 %v9344_v58  ;;  %v9350_v58 = vld [vmem:[%s11899_s8 + $0x2c8] sm:$0xff]  }
 0x5ce   :  { %8270 = vmatprep.subr.bf16.mxu1 %v9346_v30 }
 0x646   :  { %v4490_v24 = vpop.f32.mrb[44].mxu1 }
 0x647   :  { %v4656_v25 = vadd.f32 %v11289_v48, %v4490_v24  ;;  %v4492_v9 = vpop.f32.mrb[45].mxu1 }
 0x648   :  { %v4657_v45 = vadd.f32 %v11292_v49, %v4492_v9  ;;  %v4494_v13 = vpop.f32.mrb[46].mxu1 }
 0x649   :  { %v4658_v14 = vadd.f32 %v11289_v48, %v4494_v13  ;;  %v4496_v16 = vpop.f32.mrb[47].mxu1  ;;  %v4700_v57 = vmax.f32 %v4656_v25, 0.0  ;;  %v9352_v13 = vld [vmem:[%s11899_s8 + $0x288] sm:$0xff]  }
 0x64a   :  { %v4659_v17 = vadd.f32 %v11292_v49, %v4496_v16  ;;  %v4701_v62 = vmax.f32 %v4657_v45, 0.0  ;;  %v9351_v45 = vld [vmem:[%s11899_s8 + $0x118] sm:$0xff]  }
 0x64b   :  { %v4702_v20 = vmax.f32 %v4658_v14, 0.0 }
 0x64c   :  { %v4703_v26 = vmax.f32 %v4659_v17, 0.0  ;;  %v9353_v17 = vld [vmem:[%s11899_s8 + $0x160] sm:$0xff]  }
 0x64d   :  { %v4744_v54 = vpack.c.bf16 %v4702_v20, %v4700_v57  ;;  %v9354_v57 = vld [vmem:[%s11899_s8 + $0x2d0] sm:$0xff]  }
 0x64e   :  { %v4745_v21 = vpack.c.bf16 %v4703_v26, %v4701_v62  ;;  %v4500_v6 = vpop.f32.mrb[48].mxu1 }
 0x64f   :  { %v4660_v27 = vadd.f32 %v11289_v48, %v4500_v6  ;;  %v4502_v4 = vpop.f32.mrb[49].mxu1  ;;  %v9356_v6 = vld [vmem:[%s11899_s8 + $0x290] sm:$0xff]  }
 0x650   :  { %v4661_v39 = vadd.f32 %v11292_v49, %v4502_v4  ;;  %v4504_v7 = vpop.f32.mrb[50].mxu1  ;;  %4955 = vmatprep.mubr.bf16.mxu0 %v4745_v21  ;;  %v9355_v21 = vld [vmem:[%s11899_s8 + $0x120] sm:$0xff]  }
 0x651   :  { %v4662_v42 = vadd.f32 %v11289_v48, %v4504_v7  ;;  %v4506_v2 = vpop.f32.mrb[51].mxu1  ;;  %4956 = vmatmul.mubr.bf16.vlgmr.msra.gmra.mrb[88].mxu0 %v4744_v54  ;;  %v4704_v34 = vmax.f32 %v4660_v27, 0.0 }
 0x652   :  { %v4663_v3 = vadd.f32 %v11292_v49, %v4506_v2  ;;  %8434 = vmatpush3.bf16.msra.mxu0 %v4970_v29  ;;  %8435 = vmatprep.mubr.msk.bf16.mxu0 %vm9505_vm3, %v9504_v51  ;;  %v4705_v40 = vmax.f32 %v4661_v39, 0.0  ;;  %v9357_v29 = vld [vmem:[%s11899_s8 + $0x168] sm:$0xff]  }
 0x653   :  { %v4706_v35 = vmax.f32 %v4662_v42, 0.0  ;;  %8204 = vmatprep.subr.bf16.mxu0 %v9337_v38  ;;  %v9358_v38 = vld [vmem:[%s11899_s8 + $0x2d8] sm:$0xff]  }
 0x654   :  { %v4707_v44 = vmax.f32 %v4663_v3, 0.0 }
 0x655   :  { %v11316_v46 = vpack.c.bf16 %v4706_v35, %v4704_v34 }
 0x656   :  { %v4747_v52 = vpack.c.bf16 %v4707_v44, %v4705_v40  ;;  %v4510_v63 = vpop.f32.mrb[52].mxu1  ;;  %v9361_v40 = vld [vmem:[%s11899_s8 + $0x170] sm:$0xff]   ;;  %v9362_v44 = vld [vmem:[%s11899_s8 + $0x2e0] sm:$0xff]  }
 0x657   :  { %v4664_v15 = vadd.f32 %v11289_v48, %v4510_v63  ;;  %v4512_v55 = vpop.f32.mrb[53].mxu1 }
 0x658   :  { %v4665_v10 = vadd.f32 %v11292_v49, %v4512_v55  ;;  %v4514_v32 = vpop.f32.mrb[54].mxu1  ;;  %v9363_v55 = vld [vmem:[%s11899_s8 + $0x130] sm:$0xff]  }
 0x659   :  { %v4666_v11 = vadd.f32 %v11289_v48, %v4514_v32  ;;  %v4516_v41 = vpop.f32.mrb[55].mxu1  ;;  %8436 = vmatmul.mubr.msk.bf16.vlgmr.msra.gmra.mrb[92].mxu0 %vm4964_vm4, %v4790_v47  ;;  %v4708_v31 = vmax.f32 %v4664_v15, 0.0 }
 0x65a   :  { %v4667_v12 = vadd.f32 %v11292_v49, %v4516_v41  ;;  %8205 = vmatpush3.bf16.msra.mxu0 %v9339_v0  ;;  %5176 = vmatprep.mubr.bf16.mxu0 %v4747_v52  ;;  %v4709_v53 = vmax.f32 %v4665_v10, 0.0  ;;  %v9366_v41 = vld [vmem:[%s11899_s8 + $0x2e8] sm:$0xff]  }
 0x65b   :  { %v4710_v56 = vmax.f32 %v4666_v11, 0.0  ;;  %8206 = vmatprep.subr.bf16.mxu0 %v9341_v19  ;;  %v9364_v19 = vld [vmem:[%s11899_s8 + $0x2a0] sm:$0xff]   ;;  %v9365_v11 = vld [vmem:[%s11899_s8 + $0x178] sm:$0xff]  }
 0x65c   :  { %v4711_v23 = vmax.f32 %v4667_v12, 0.0 }
 0x65d   :  { %v4748_v60 = vpack.c.bf16 %v4710_v56, %v4708_v31 }
 0x65e   :  { %v4749_v36 = vpack.c.bf16 %v4711_v23, %v4709_v53  ;;  %8207 = vmatpush3.bf16.msra.mxu0 %v9343_v43  ;;  %v4520_v37 = vpop.f32.mrb[56].mxu1  ;;  %v9367_v53 = vld [vmem:[%s11899_s8 + $0x138] sm:$0xff]   ;;  %v9368_v23 = vld [vmem:[%s11899_s8 + $0x2a8] sm:$0xff]  }
 0x65f   :  { %v4668_v22 = vadd.f32 %v11289_v48, %v4520_v37  ;;  %v4522_v61 = vpop.f32.mrb[57].mxu1  ;;  %8208 = vmatprep.subr.bf16.mxu0 %v9345_v18  ;;  %v9369_v37 = vld [vmem:[%s11899_s8 + $0x240] sm:$0xff]  }
 0x660   :  { %v4669_v30 = vadd.f32 %v11292_v49, %v4522_v61  ;;  %v4524_v59 = vpop.f32.mrb[58].mxu1  ;;  %5350 = vmatprep.mubr.bf16.mxu1 %v4749_v36 }
 0x661   :  { %v4670_v24 = vadd.f32 %v11289_v48, %v4524_v59  ;;  %v4526_v25 = vpop.f32.mrb[59].mxu1  ;;  %5351 = vmatmul.mubr.bf16.vlgmr.msra.gmra.mrb[88].mxu1 %v4748_v60  ;;  %v4712_v14 = vmax.f32 %v4668_v22, 0.0 }
 0x662   :  { %v4671_v9 = vadd.f32 %v11292_v49, %v4526_v25  ;;  %8209 = vmatpush3.bf16.msra.mxu0 %v9347_v1  ;;  %8271 = vmatpush3.bf16.msra.mxu1 %v9348_v50  ;;  %v4713_v20 = vmax.f32 %v4669_v30, 0.0  ;;  %v9370_v1 = vld [vmem:[%s11899_s8 + $0x2f0] sm:$0xff]   ;;  %v9371_v30 = vld [vmem:[%s11899_s8 + $0x200] sm:$0xff]  }
 0x663   :  { %v4714_v16 = vmax.f32 %v4670_v24, 0.0  ;;  %8210 = vmatprep.subr.bf16.mxu0 %v9349_v8  ;;  %8272 = vmatprep.subr.bf16.mxu1 %v9350_v58  ;;  %v9372_v25 = vld [vmem:[%s11899_s8 + $0x2b0] sm:$0xff]  }
 0x664   :  { %v4715_v62 = vmax.f32 %v4671_v9, 0.0  ;;  %v9373_v9 = vld [vmem:[%s11899_s8 + $0x248] sm:$0xff]  }
 0x665   :  { %v11362_v26 = vpack.c.bf16 %v4714_v16, %v4712_v14  ;;  %v9374_v14 = vld [vmem:[%s11899_s8 + $0x2f8] sm:$0xff]  }
 0x666   :  { %v11364_v28 = vpack.c.bf16 %v4715_v62, %v4713_v20  ;;  %8211 = vmatpush3.bf16.msra.mxu0 %v9351_v45  ;;  %8273 = vmatpush3.bf16.msra.mxu1 %v9352_v13  ;;  %v4530_v54 = vpop.f32.mrb[60].mxu1  ;;  %v9375_v20 = vld [vmem:[%s11899_s8 + $0x208] sm:$0xff]  }
 0x667   :  { %v4672_v27 = vadd.f32 %v11289_v48, %v4530_v54  ;;  %v4532_v4 = vpop.f32.mrb[61].mxu1  ;;  %8212 = vmatprep.subr.bf16.mxu0 %v9353_v17  ;;  %8274 = vmatprep.subr.bf16.mxu1 %v9354_v57 }
 0x668   :  { %v4673_v39 = vadd.f32 %v11292_v49, %v4532_v4  ;;  %v4534_v7 = vpop.f32.mrb[62].mxu1 }
 0x669   :  { %v4674_v42 = vadd.f32 %v11289_v48, %v4534_v7  ;;  %v4536_v2 = vpop.f32.mrb[63].mxu1  ;;  %v4716_v34 = vmax.f32 %v4672_v27, 0.0 }
 0x66a   :  { %v4675_v3 = vadd.f32 %v11292_v49, %v4536_v2  ;;  %8213 = vmatpush3.bf16.msra.mxu0 %v9355_v21  ;;  %8275 = vmatpush3.bf16.msra.mxu1 %v9356_v6  ;;  %v4717_v47 = vmax.f32 %v4673_v39, 0.0  ;;  %v9376_v21 = vld [vmem:[%s11899_s8 + $0x2b8] sm:$0xff]   ;;  %v9379_v39 = vld [vmem:[%s11899_s8 + $0x210] sm:$0xff]   ;;  %v9380_v2 = vld [vmem:[%s11899_s8 + $0x380] sm:$0xff]  }
 0x66b   :  { %v4718_v35 = vmax.f32 %v4674_v42, 0.0  ;;  %8214 = vmatprep.subr.bf16.mxu0 %v9357_v29  ;;  %8276 = vmatprep.subr.bf16.mxu1 %v9358_v38 }
 0x66c   :  { %v4719_v52 = vmax.f32 %v4675_v3, 0.0 }
 0x66d   :  { %v11394_v63 = vpack.c.bf16 %v4718_v35, %v4716_v34  ;;  %v9382_v34 = vld [vmem:[%s11899_s8 + $0x3c8] sm:$0xff]  }
 0x66e   :  { %v4753_v0 = vpack.c.bf16 %v4719_v52, %v4717_v47  ;;  %8215 = vmatpush3.bf16.msra.mxu0 %v9359_v5  ;;  %8277 = vmatpush3.bf16.msra.mxu1 %v9360_v33  ;;  %v4540_v15 = vpop.f32.mrb[64].mxu1  ;;  %v9381_v33 = vld [vmem:[%s11899_s8 + $0x258] sm:$0xff]  }
 0x66f   :  { %v4676_v10 = vadd.f32 %v11289_v48, %v4540_v15  ;;  %v4542_v32 = vpop.f32.mrb[65].mxu1  ;;  %8216 = vmatprep.subr.bf16.mxu0 %v9361_v40  ;;  %8278 = vmatprep.subr.bf16.mxu1 %v9362_v44  ;;  %v9383_v47 = vld [vmem:[%s11899_s8 + $0x218] sm:$0xff]   ;;  %v9384_v15 = vld [vmem:[%s11899_s8 + $0x388] sm:$0xff]  }
 0x670   :  { %v4677_v12 = vadd.f32 %v11292_v49, %v4542_v32  ;;  %v4544_v43 = vpop.f32.mrb[66].mxu1  ;;  %5698 = vmatprep.mubr.bf16.mxu1 %v4753_v0 }
 0x671   :  { %v4678_v31 = vadd.f32 %v11289_v48, %v4544_v43  ;;  %v4546_v56 = vpop.f32.mrb[67].mxu1  ;;  %v4720_v60 = vmax.f32 %v4676_v10, 0.0  ;;  %v9386_v10 = vld [vmem:[%s11899_s8 + $0x3d0] sm:$0xff]  }
 0x672   :  { %v4679_v18 = vadd.f32 %v11292_v49, %v4546_v56  ;;  %8217 = vmatpush3.bf16.msra.mxu0 %v9363_v55  ;;  %8279 = vmatpush3.bf16.msra.mxu1 %v9364_v19  ;;  %v4721_v50 = vmax.f32 %v4677_v12, 0.0  ;;  %v9385_v55 = vld [vmem:[%s11899_s8 + $0x260] sm:$0xff]   ;;  %v9388_v56 = vld [vmem:[%s11899_s8 + $0x390] sm:$0xff]  }
 0x673   :  { %v4722_v36 = vmax.f32 %v4678_v31, 0.0  ;;  %8218 = vmatprep.subr.bf16.mxu0 %v9365_v11  ;;  %8280 = vmatprep.subr.bf16.mxu1 %v9366_v41  ;;  %v9387_v12 = vld [vmem:[%s11899_s8 + $0x220] sm:$0xff]  }
 0x674   :  { %v4723_v22 = vmax.f32 %v4679_v18, 0.0  ;;  %v9389_v18 = vld [vmem:[%s11899_s8 + $0x268] sm:$0xff]  }
 0x675   :  { %v11424_v61 = vpack.c.bf16 %v4722_v36, %v4720_v60  ;;  %v9390_v60 = vld [vmem:[%s11899_s8 + $0x3d8] sm:$0xff]  }
 0x676   :  { %v11426_v8 = vpack.c.bf16 %v4723_v22, %v4721_v50  ;;  %8219 = vmatpush3.bf16.msra.mxu0 %v9367_v53  ;;  %8281 = vmatpush3.bf16.msra.mxu1 %v9368_v23  ;;  %v4550_v58 = vpop.f32.mrb[68].mxu1  ;;  %v9391_v50 = vld [vmem:[%s11899_s8 + $0x228] sm:$0xff]  }
 0x677   :  { %v4680_v59 = vadd.f32 %v11289_v48, %v4550_v58  ;;  %v4552_v24 = vpop.f32.mrb[69].mxu1  ;;  %8248 = vmatprep.subr.bf16.mxu0 %v9369_v37  ;;  %8282 = vmatprep.subr.bf16.mxu1 %v9370_v1 }
 0x678   :  { %v4681_v45 = vadd.f32 %v11292_v49, %v4552_v24  ;;  %v4554_v13 = vpop.f32.mrb[70].mxu1 }
 0x679   :  { %v4682_v16 = vadd.f32 %v11289_v48, %v4554_v13  ;;  %5177 = vmatmul.mubr.bf16.vlgmr.msra.gmra.mrb[96].mxu0 %v11316_v46  ;;  %v4556_v17 = vpop.f32.mrb[71].mxu1  ;;  %v4724_v62 = vmax.f32 %v4680_v59, 0.0  ;;  %v9377_v46 = vld [vmem:[%s11899_s8 + $0x250] sm:$0xff]  }
 0x67a   :  { %v4683_v57 = vadd.f32 %v11292_v49, %v4556_v17  ;;  %8249 = vmatpush3.bf16.msra.mxu0 %v9371_v30  ;;  %5524 = vmatprep.mubr.bf16.mxu0 %v11364_v28  ;;  %v4725_v6 = vmax.f32 %v4681_v45, 0.0  ;;  %v9378_v28 = vld [vmem:[%s11899_s8 + $0x3c0] sm:$0xff]   ;;  %v9392_v30 = vld [vmem:[%s11899_s8 + $0x398] sm:$0xff]   ;;  %v9393_v59 = vld [vmem:[%s11899_s8 + $0x270] sm:$0xff]  }
 0x67b   :  { %v4726_v54 = vmax.f32 %v4682_v16, 0.0  ;;  %8283 = vmatpush3.bf16.msra.mxu1 %v9372_v25  ;;  %8250 = vmatprep.subr.bf16.mxu0 %v9373_v9  ;;  %v9394_v9 = vld [vmem:[%s11899_s8 + $0x3e0] sm:$0xff]   ;;  %v9395_v16 = vld [vmem:[%s11899_s8 + $0x230] sm:$0xff]  }
 0x67c   :  { %v4727_v27 = vmax.f32 %v4683_v57, 0.0  ;;  %8284 = vmatprep.subr.bf16.mxu1 %v9374_v14 }
 0x67d   :  { %v11458_v4 = vpack.c.bf16 %v4726_v54, %v4724_v62  ;;  %v9397_v62 = vld [vmem:[%s11899_s8 + $0x278] sm:$0xff]  }
 0x67e   :  { %v4757_v29 = vpack.c.bf16 %v4727_v27, %v4725_v6  ;;  %8251 = vmatpush3.bf16.msra.mxu0 %v9375_v20  ;;  %v4560_v38 = vpop.f32.mrb[72].mxu1  ;;  %v9396_v20 = vld [vmem:[%s11899_s8 + $0x3a0] sm:$0xff]  }
 0x67f   :  { %8285 = vmatpush3.bf16.msra.mxu1 %v9376_v21  ;;  %v4684_v7 = vadd.f32 %v11289_v48, %v4560_v38  ;;  %v4562_v42 = vpop.f32.mrb[73].mxu1  ;;  %8252 = vmatprep.subr.bf16.mxu0 %v9377_v46  ;;  %v9398_v46 = vld [vmem:[%s11899_s8 + $0x3e8] sm:$0xff]  }
 0x680   :  { %v4685_v3 = vadd.f32 %v11292_v49, %v4562_v42  ;;  %v4564_v5 = vpop.f32.mrb[74].mxu1  ;;  %8314 = vmatprep.subr.bf16.mxu1 %v9378_v28  ;;  %v9401_v42 = vld [vmem:[%s11899_s8 + $0x340] sm:$0xff]  }
 0x681   :  { %v4686_v35 = vadd.f32 %v11289_v48, %v4564_v5  ;;  %v4566_v40 = vpop.f32.mrb[75].mxu1  ;;  %v4728_v52 = vmax.f32 %v4684_v7, 0.0  ;;  %v9400_v7 = vld [vmem:[%s11899_s8 + $0x3a8] sm:$0xff]   ;;  %v9402_v5 = vld [vmem:[%s11899_s8 + $0x3f0] sm:$0xff]  }
 0x682   :  { %5699 = vmatmul.mubr.bf16.vlgmr.msra.gmra.mrb[92].mxu1 %v11394_v63  ;;  %v4687_v44 = vadd.f32 %v11292_v49, %v4566_v40  ;;  %8253 = vmatpush3.bf16.msra.mxu0 %v9379_v39  ;;  %v4729_v63 = vmax.f32 %v4685_v3, 0.0  ;;  %v9403_v40 = vld [vmem:[%s11899_s8 + $0x300] sm:$0xff]  }
 0x683   :  { %v4730_v0 = vmax.f32 %v4686_v35, 0.0  ;;  %8315 = vmatpush3.bf16.msra.mxu1 %v9380_v2  ;;  %6046 = vmatprep.mubr.bf16.mxu1 %v4757_v29  ;;  %v9399_v29 = vld [vmem:[%s11899_s8 + $0x238] sm:$0xff]  }
 0x684   :  { %v4731_v19 = vmax.f32 %v4687_v44, 0.0  ;;  %8254 = vmatprep.subr.bf16.mxu0 %v9381_v33  ;;  %8316 = vmatprep.subr.bf16.mxu1 %v9382_v34 }
 0x685   :  { %v11489_v32 = vpack.c.bf16 %v4730_v0, %v4728_v52  ;;  %v9404_v52 = vld [vmem:[%s11899_s8 + $0x3b0] sm:$0xff]   ;;  %v9405_v0 = vld [vmem:[%s11899_s8 + $0x348] sm:$0xff]  }
 0x686   :  { %v11491_v11 = vpack.c.bf16 %v4731_v19, %v4729_v63  ;;  %8255 = vmatpush3.bf16.msra.mxu0 %v9383_v47  ;;  %v4570_v41 = vpop.f32.mrb[76].mxu1  ;;  %v9406_v63 = vld [vmem:[%s11899_s8 + $0x3f8] sm:$0xff]  }
 0x687   :  { %8317 = vmatpush3.bf16.msra.mxu1 %v9384_v15  ;;  %v4688_v43 = vadd.f32 %v11289_v48, %v4570_v41  ;;  %v4572_v31 = vpop.f32.mrb[77].mxu1  ;;  %8256 = vmatprep.subr.bf16.mxu0 %v9385_v55 }
 0x688   :  { %v4689_v53 = vadd.f32 %v11292_v49, %v4572_v31  ;;  %v4574_v23 = vpop.f32.mrb[78].mxu1  ;;  %8318 = vmatprep.subr.bf16.mxu1 %v9386_v10 }
 0x689   :  { %v4690_v36 = vadd.f32 %v11289_v48, %v4574_v23  ;;  %v4576_v37 = vpop.f32.mrb[79].mxu1  ;;  %v4732_v22 = vmax.f32 %v4688_v43, 0.0  ;;  %v9411_v23 = vld [vmem:[%s11899_s8 + $0x310] sm:$0xff]  }
 0x68a   :  { %v4691_v1 = vadd.f32 %v11292_v49, %v4576_v37  ;;  %8257 = vmatpush3.bf16.msra.mxu0 %v9387_v12  ;;  %v4733_v24 = vmax.f32 %v4689_v53, 0.0  ;;  %v9407_v12 = vld [vmem:[%s11899_s8 + $0x308] sm:$0xff]  }
 0x68b   :  { %v4734_v58 = vmax.f32 %v4690_v36, 0.0  ;;  %8319 = vmatpush3.bf16.msra.mxu1 %v9388_v56  ;;  %8258 = vmatprep.subr.bf16.mxu0 %v9389_v18  ;;  %v9413_v36 = vld [vmem:[%s11899_s8 + $0x358] sm:$0xff]   ;;  %v9414_v37 = vld [vmem:[%s11899_s8 + $0x4c8] sm:$0xff]  }
 0x68c   :  { %v4735_v25 = vmax.f32 %v4691_v1, 0.0  ;;  %8320 = vmatprep.subr.bf16.mxu1 %v9390_v60  ;;  %v9412_v60 = vld [vmem:[%s11899_s8 + $0x480] sm:$0xff]   ;;  %v9415_v1 = vld [vmem:[%s11899_s8 + $0x318] sm:$0xff]  }
 0x68d   :  { %v11521_v45 = vpack.c.bf16 %v4734_v58, %v4732_v22  ;;  %v9417_v22 = vld [vmem:[%s11899_s8 + $0x360] sm:$0xff]  }
 0x68e   :  { %v11523_v13 = vpack.c.bf16 %v4735_v25, %v4733_v24  ;;  %8259 = vmatpush3.bf16.msra.mxu0 %v9391_v50  ;;  %v4580_v14 = vpop.f32.mrb[80].mxu1  ;;  %v9416_v50 = vld [vmem:[%s11899_s8 + $0x488] sm:$0xff]   ;;  %v9419_v58 = vld [vmem:[%s11899_s8 + $0x320] sm:$0xff]   ;;  %v9422_v24 = vld [vmem:[%s11899_s8 + $0x4d8] sm:$0xff]  }
 0x68f   :  { %8321 = vmatpush3.bf16.msra.mxu1 %v9392_v30  ;;  %v4692_v17 = vadd.f32 %v11289_v48, %v4580_v14  ;;  %v4582_v57 = vpop.f32.mrb[81].mxu1  ;;  %8260 = vmatprep.subr.bf16.mxu0 %v9393_v59  ;;  %v9420_v30 = vld [vmem:[%s11899_s8 + $0x490] sm:$0xff]   ;;  %v9421_v59 = vld [vmem:[%s11899_s8 + $0x368] sm:$0xff]   ;;  %v9426_v14 = vld [vmem:[%s11899_s8 + $0x4e0] sm:$0xff]  }
 0x690   :  { %v4693_v54 = vadd.f32 %v11292_v49, %v4582_v57  ;;  %v4584_v21 = vpop.f32.mrb[82].mxu1  ;;  %8322 = vmatprep.subr.bf16.mxu1 %v9394_v9  ;;  %v9423_v25 = vld [vmem:[%s11899_s8 + $0x328] sm:$0xff]   ;;  %v9424_v9 = vld [vmem:[%s11899_s8 + $0x498] sm:$0xff]  }
 0x691   :  { %v4694_v6 = vadd.f32 %v11289_v48, %v4584_v21  ;;  %v4586_v27 = vpop.f32.mrb[83].mxu1  ;;  %v4736_v38 = vmax.f32 %v4692_v17, 0.0  ;;  %v9428_v17 = vld [vmem:[%s11899_s8 + $0x4a0] sm:$0xff]   ;;  %v9429_v57 = vld [vmem:[%s11899_s8 + $0x378] sm:$0xff]  }
 0x692   :  { %v4695_v28 = vadd.f32 %v11292_v49, %v4586_v27  ;;  %8261 = vmatpush3.bf16.msra.mxu0 %v9395_v16  ;;  %v4737_v2 = vmax.f32 %v4693_v54, 0.0  ;;  %v9427_v16 = vld [vmem:[%s11899_s8 + $0x330] sm:$0xff]   ;;  %v9432_v54 = vld [vmem:[%s11899_s8 + $0x4a8] sm:$0xff]   ;;  %v9433_v21 = vld [vmem:[%s11899_s8 + $0x440] sm:$0xff]  }
 0x693   :  { %v4738_v39 = vmax.f32 %v4694_v6, 0.0  ;;  %8323 = vmatpush3.bf16.msra.mxu1 %v9396_v20  ;;  %8262 = vmatprep.subr.bf16.mxu0 %v9397_v62  ;;  %v9430_v20 = vld [vmem:[%s11899_s8 + $0x4e8] sm:$0xff]   ;;  %v9431_v62 = vld [vmem:[%s11899_s8 + $0x338] sm:$0xff]   ;;  %v9435_v6 = vld [vmem:[%s11899_s8 + $0x400] sm:$0xff]  }
 0x694   :  { %v4739_v3 = vmax.f32 %v4695_v28, 0.0  ;;  %8324 = vmatprep.subr.bf16.mxu1 %v9398_v46  ;;  %v9434_v46 = vld [vmem:[%s11899_s8 + $0x4f0] sm:$0xff]   ;;  %v9437_v28 = vld [vmem:[%s11899_s8 + $0x448] sm:$0xff]  }
 0x695   :  { %v11553_v33 = vpack.c.bf16 %v4738_v39, %v4736_v38  ;;  %v9436_v27 = vld [vmem:[%s11899_s8 + $0x4b0] sm:$0xff]   ;;  %v9439_v38 = vld [vmem:[%s11899_s8 + $0x408] sm:$0xff]   ;;  %v9440_v39 = vld [vmem:[%s11899_s8 + $0x4b8] sm:$0xff]  }
 0x696   :  { %v11555_v34 = vpack.c.bf16 %v4739_v3, %v4737_v2  ;;  %8263 = vmatpush3.bf16.msra.mxu0 %v9399_v29  ;;  %v4590_v35 = vpop.f32.mrb[84].mxu1  ;;  %v9438_v29 = vld [vmem:[%s11899_s8 + $0x4f8] sm:$0xff]   ;;  %v9446_v3 = vld [vmem:[%s11899_s8 + $0x5c8] sm:$0xff]  }
 0x697   :  { %8325 = vmatpush3.bf16.msra.mxu1 %v9400_v7  ;;  %v4696_v44 = vadd.f32 %v11289_v48, %v4590_v35  ;;  %v4592_v47 = vpop.f32.mrb[85].mxu1  ;;  %8292 = vmatprep.subr.bf16.mxu0 %v9401_v42  ;;  %v9441_v7 = vld [vmem:[%s11899_s8 + $0x450] sm:$0xff]   ;;  %v9444_v42 = vld [vmem:[%s11899_s8 + $0x580] sm:$0xff]   ;;  %v9445_v2 = vld [vmem:[%s11899_s8 + $0x458] sm:$0xff]  }
 0x698   :  { %v4697_v15 = vadd.f32 %v11292_v49, %v4592_v47  ;;  %v4594_v55 = vpop.f32.mrb[86].mxu1  ;;  %8326 = vmatprep.subr.bf16.mxu1 %v9402_v5  ;;  %v9447_v5 = vld [vmem:[%s11899_s8 + $0x418] sm:$0xff]   ;;  %v9448_v35 = vld [vmem:[%s11899_s8 + $0x588] sm:$0xff]   ;;  %v9452_v47 = vld [vmem:[%s11899_s8 + $0x590] sm:$0xff]  }
 0x699   :  { %v4698_v19 = vadd.f32 %v11289_v48, %v4594_v55  ;;  %5525 = vmatmul.mubr.bf16.vlgmr.msra.gmra.mrb[100].mxu0 %v11362_v26  ;;  %v4596_v10 = vpop.f32.mrb[87].mxu1  ;;  %v4740_v43 = vmax.f32 %v4696_v44, 0.0  ;;  %v9408_v48 = vld [vmem:[%s11899_s8 + $0x3b8] sm:$0xff]   ;;  %v9409_v26 = vld [vmem:[%s11899_s8 + $0x350] sm:$0xff]   ;;  %v9451_v44 = vld [vmem:[%s11899_s8 + $0x420] sm:$0xff]  }
 0x69a   :  { %v4699_v41 = vadd.f32 %v11292_v49, %v4596_v10  ;;  %8293 = vmatpush3.bf16.msra.mxu0 %v9403_v40  ;;  %5872 = vmatprep.mubr.bf16.mxu0 %v11426_v8  ;;  %v4741_v49 = vmax.f32 %v4697_v15, 0.0  ;;  %v9410_v8 = vld [vmem:[%s11899_s8 + $0x4c0] sm:$0xff]   ;;  %v9455_v15 = vld [vmem:[%s11899_s8 + $0x428] sm:$0xff]   ;;  %v9456_v55 = vld [vmem:[%s11899_s8 + $0x598] sm:$0xff]  }
 0x69b   :  { %v4742_v31 = vmax.f32 %v4698_v19, 0.0  ;;  %8327 = vmatpush3.bf16.msra.mxu1 %v9404_v52  ;;  %8294 = vmatprep.subr.bf16.mxu0 %v9405_v0  ;;  %v9449_v40 = vld [vmem:[%s11899_s8 + $0x460] sm:$0xff]   ;;  %v9453_v52 = vld [vmem:[%s11899_s8 + $0x468] sm:$0xff]   ;;  %v9454_v0 = vld [vmem:[%s11899_s8 + $0x5d8] sm:$0xff]  }
 0x69c   :  { %v4743_v56 = vmax.f32 %v4699_v41, 0.0  ;;  %8328 = vmatprep.subr.bf16.mxu1 %v9406_v63  ;;  %v9457_v63 = vld [vmem:[%s11899_s8 + $0x470] sm:$0xff]   ;;  %v9458_v19 = vld [vmem:[%s11899_s8 + $0x5e0] sm:$0xff]  }
 0x69d   :  { %v11587_v18 = vpack.c.bf16 %v4742_v31, %v4740_v43  ;;  %v9459_v10 = vld [vmem:[%s11899_s8 + $0x430] sm:$0xff]   ;;  %v9460_v41 = vld [vmem:[%s11899_s8 + $0x5a0] sm:$0xff]   ;;  %v9462_v43 = vld [vmem:[%s11899_s8 + $0x5e8] sm:$0xff]  }
 0x69e   :  { %v11589_v53 = vpack.c.bf16 %v4743_v56, %v4741_v49  ;;  %8295 = vmatpush3.bf16.msra.mxu0 %v9407_v12  ;;  %v9461_v12 = vld [vmem:[%s11899_s8 + $0x478] sm:$0xff]   ;;  %v9466_v49 = vld [vmem:[%s11899_s8 + $0x5f0] sm:$0xff]   ;;  %v9467_v56 = vld [vmem:[%s11899_s8 + $0x500] sm:$0xff]  }
 0x69f   :  { %8329 = vmatpush3.bf16.msra.mxu1 %v9408_v48  ;;  %8296 = vmatprep.subr.bf16.mxu0 %v9409_v26  ;;  %v9463_v31 = vld [vmem:[%s11899_s8 + $0x438] sm:$0xff]   ;;  %v9464_v48 = vld [vmem:[%s11899_s8 + $0x5a8] sm:$0xff]   ;;  %v9465_v26 = vld [vmem:[%s11899_s8 + $0x540] sm:$0xff]  }
 0x6a0   :  { %8358 = vmatprep.subr.bf16.mxu1 %v9410_v8  ;;  %v9468_v8 = vld [vmem:[%s11899_s8 + $0x5b0] sm:$0xff]  }
 0x6a2   :  { %6047 = vmatmul.mubr.bf16.vlgmr.msra.gmra.mrb[96].mxu1 %v11458_v4  ;;  %8297 = vmatpush3.bf16.msra.mxu0 %v9411_v23  ;;  %v9418_v4 = vld [vmem:[%s11899_s8 + $0x4d0] sm:$0xff]   ;;  %v9470_v23 = vld [vmem:[%s11899_s8 + $0x5f8] sm:$0xff]  }
 0x6a3   :  { %8359 = vmatpush3.bf16.msra.mxu1 %v9412_v60  ;;  %6394 = vmatprep.mubr.bf16.mxu1 %v11523_v13  ;;  %v9425_v13 = vld [vmem:[%s11899_s8 + $0x370] sm:$0xff]   ;;  %v9471_v60 = vld [vmem:[%s11899_s8 + $0x508] sm:$0xff]  }
 0x6a4   :  { %8298 = vmatprep.subr.bf16.mxu0 %v9413_v36  ;;  %8360 = vmatprep.subr.bf16.mxu1 %v9414_v37  ;;  %v9472_v36 = vld [vmem:[%s11899_s8 + $0x5b8] sm:$0xff]   ;;  %v9473_v37 = vld [vmem:[%s11899_s8 + $0x550] sm:$0xff]  }
 0x6a6   :  { %8299 = vmatpush3.bf16.msra.mxu0 %v9415_v1  ;;  %v9476_v1 = vld [vmem:[%s11899_s8 + $0x518] sm:$0xff]  }
 0x6a7   :  { %8361 = vmatpush3.bf16.msra.mxu1 %v9416_v50  ;;  %8300 = vmatprep.subr.bf16.mxu0 %v9417_v22  ;;  %v9477_v50 = vld [vmem:[%s11899_s8 + $0x560] sm:$0xff]  }
 0x6a8   :  { %8362 = vmatprep.subr.bf16.mxu1 %v9418_v4  ;;  %v9478_v22 = vld [vmem:[%s11899_s8 + $0x520] sm:$0xff]   ;;  %v9480_v4 = vld [vmem:[%s11899_s8 + $0x528] sm:$0xff]  }
 0x6aa   :  { %8301 = vmatpush3.bf16.msra.mxu0 %v9419_v58  ;;  %v9481_v58 = vld [vmem:[%s11899_s8 + $0x570] sm:$0xff]  }
 0x6ab   :  { %8363 = vmatpush3.bf16.msra.mxu1 %v9420_v30  ;;  %8302 = vmatprep.subr.bf16.mxu0 %v9421_v59  ;;  %v9482_v30 = vld [vmem:[%s11899_s8 + $0x530] sm:$0xff]   ;;  %v9483_v59 = vld [vmem:[%s11899_s8 + $0x578] sm:$0xff]  }
 0x6ac   :  { %8364 = vmatprep.subr.bf16.mxu1 %v9422_v24  ;;  %v9484_v24 = vld [vmem:[%s11899_s8 + $0x538] sm:$0xff]  }
 0x6ae   :  { %8303 = vmatpush3.bf16.msra.mxu0 %v9423_v25 }
 0x6af   :  { %8365 = vmatpush3.bf16.msra.mxu1 %v9424_v9  ;;  %8304 = vmatprep.subr.bf16.mxu0 %v9425_v13 }
 0x6b0   :  { %8366 = vmatprep.subr.bf16.mxu1 %v9426_v14 }
 0x6b2   :  { %8305 = vmatpush3.bf16.msra.mxu0 %v9427_v16 }
 0x6b3   :  { %8367 = vmatpush3.bf16.msra.mxu1 %v9428_v17  ;;  %8306 = vmatprep.subr.bf16.mxu0 %v9429_v57 }
 0x6b4   :  { %8368 = vmatprep.subr.bf16.mxu1 %v9430_v20 }
 0x6b6   :  { %8307 = vmatpush3.bf16.msra.mxu0 %v9431_v62 }
 0x6b7   :  { %8369 = vmatpush3.bf16.msra.mxu1 %v9432_v54  ;;  %8336 = vmatprep.subr.bf16.mxu0 %v9433_v21 }
 0x6b8   :  { %8370 = vmatprep.subr.bf16.mxu1 %v9434_v46 }
 0x6b9   :  { %5873 = vmatmul.mubr.bf16.vlgmr.msra.gmra.mrb[104].mxu0 %v11424_v61  ;;  %v9442_v61 = vld [vmem:[%s11899_s8 + $0x5c0] sm:$0xff]  }
 0x6ba   :  { %8337 = vmatpush3.bf16.msra.mxu0 %v9435_v6  ;;  %6220 = vmatprep.mubr.bf16.mxu0 %v11491_v11  ;;  %v9443_v11 = vld [vmem:[%s11899_s8 + $0x410] sm:$0xff]  }
 0x6bb   :  { %8371 = vmatpush3.bf16.msra.mxu1 %v9436_v27  ;;  %8338 = vmatprep.subr.bf16.mxu0 %v9437_v28 }
 0x6bc   :  { %8372 = vmatprep.subr.bf16.mxu1 %v9438_v29 }
 0x6be   :  { %8339 = vmatpush3.bf16.msra.mxu0 %v9439_v38 }
 0x6bf   :  { %8373 = vmatpush3.bf16.msra.mxu1 %v9440_v39  ;;  %8340 = vmatprep.subr.bf16.mxu0 %v9441_v7 }
 0x6c0   :  { %8402 = vmatprep.subr.bf16.mxu1 %v9442_v61 }
 0x6c2   :  { %6395 = vmatmul.mubr.bf16.vlgmr.msra.gmra.mrb[100].mxu1 %v11521_v45  ;;  %8341 = vmatpush3.bf16.msra.mxu0 %v9443_v11  ;;  %v9450_v45 = vld [vmem:[%s11899_s8 + $0x5d0] sm:$0xff]  }
 0x6c3   :  { %8403 = vmatpush3.bf16.msra.mxu1 %v9444_v42  ;;  %6742 = vmatprep.mubr.bf16.mxu1 %v11589_v53  ;;  %v9469_v53 = vld [vmem:[%s11899_s8 + $0x548] sm:$0xff]  }
 0x6c4   :  { %8342 = vmatprep.subr.bf16.mxu0 %v9445_v2  ;;  %8404 = vmatprep.subr.bf16.mxu1 %v9446_v3 }
 0x6c6   :  { %8343 = vmatpush3.bf16.msra.mxu0 %v9447_v5 }
 0x6c7   :  { %8405 = vmatpush3.bf16.msra.mxu1 %v9448_v35  ;;  %8344 = vmatprep.subr.bf16.mxu0 %v9449_v40 }
 0x6c8   :  { %8406 = vmatprep.subr.bf16.mxu1 %v9450_v45  ;;  %v9485_v45 = vld [vmem:[%s11902_s11] sm:$0xff]  }
 0x6ca   :  { %8345 = vmatpush3.bf16.msra.mxu0 %v9451_v44 }
 0x6cb   :  { %8407 = vmatpush3.bf16.msra.mxu1 %v9452_v47  ;;  %8346 = vmatprep.subr.bf16.mxu0 %v9453_v52 }
 0x6cc   :  { %8408 = vmatprep.subr.bf16.mxu1 %v9454_v0 }
 0x6ce   :  { %8347 = vmatpush3.bf16.msra.mxu0 %v9455_v15 }
 0x6cf   :  { %8409 = vmatpush3.bf16.msra.mxu1 %v9456_v55  ;;  %8348 = vmatprep.subr.bf16.mxu0 %v9457_v63  ;;  %v9486_v55 = vld [vmem:[%s11902_s11 + $0x8] sm:$0xff]  }
 0x6d0   :  { %8410 = vmatprep.subr.bf16.mxu1 %v9458_v19  ;;  %v8175_v19 = vld [vmem:[%s11904_s14] ss:$0 sm:$0xff] }
 0x6d1   :  { %6914 = vrot.lane.b32.xlu0 %v8175_v19, %s9506_s26 }
 0x6d2   :  { %8349 = vmatpush3.bf16.msra.mxu0 %v9459_v10 }
 0x6d3   :  { %8411 = vmatpush3.bf16.msra.mxu1 %v9460_v41  ;;  %8350 = vmatprep.subr.bf16.mxu0 %v9461_v12 }
 0x6d4   :  { %8412 = vmatprep.subr.bf16.mxu1 %v9462_v43 }
 0x6d6   :  { %8351 = vmatpush3.bf16.msra.mxu0 %v9463_v31 }
 0x6d7   :  { %8413 = vmatpush3.bf16.msra.mxu1 %v9464_v48  ;;  %8380 = vmatprep.subr.bf16.mxu0 %v9465_v26 }
 0x6d8   :  { %8414 = vmatprep.subr.bf16.mxu1 %v9466_v49 }
 0x6d9   :  { %6221 = vmatmul.mubr.bf16.vlgmr.msra.gmra.mrb[108].mxu0 %v11489_v32  ;;  %v9474_v32 = vld [vmem:[%s11899_s8 + $0x510] sm:$0xff]  }
 0x6da   :  { %8381 = vmatpush3.bf16.msra.mxu0 %v9467_v56  ;;  %6568 = vmatprep.mubr.bf16.mxu0 %v11555_v34  ;;  %v9475_v34 = vld [vmem:[%s11899_s8 + $0x558] sm:$0xff]  }
 0x6db   :  { %8415 = vmatpush3.bf16.msra.mxu1 %v9468_v8  ;;  %8382 = vmatprep.subr.bf16.mxu0 %v9469_v53 }
 0x6dc   :  { %8416 = vmatprep.subr.bf16.mxu1 %v9470_v23 }
 0x6de   :  { %8383 = vmatpush3.bf16.msra.mxu0 %v9471_v60 }
 0x6df   :  { %8417 = vmatpush3.bf16.msra.mxu1 %v9472_v36  ;;  %8384 = vmatprep.subr.bf16.mxu0 %v9473_v37 }
 0x6e0   :  { %8455 = vmatprep.subr.bf16.mxu1 %v9504_v51 }
 0x6e2   :  { %6743 = vmatmul.mubr.bf16.vlgmr.msra.gmra.mrb[104].mxu1 %v11587_v18  ;;  %8385 = vmatpush3.bf16.msra.mxu0 %v9474_v32  ;;  %v9479_v18 = vld [vmem:[%s11899_s8 + $0x568] sm:$0xff]  }
 0x6e3   :  { %8386 = vmatprep.subr.bf16.mxu0 %v9475_v34  ;;  %8459 = vmatprep.mubr.msk.bf16.mxu1 %vm9505_vm3, %v9504_v51 }
 0x6e6   :  { %8387 = vmatpush3.bf16.msra.mxu0 %v9476_v1 }
 0x6e7   :  { %8388 = vmatprep.subr.bf16.mxu0 %v9477_v50 }
 0x6ea   :  { %8389 = vmatpush3.bf16.msra.mxu0 %v9478_v22 }
 0x6eb   :  { %8390 = vmatprep.subr.bf16.mxu0 %v9479_v18 }
 0x6ee   :  { %8391 = vmatpush3.bf16.msra.mxu0 %v9480_v4 }
 0x6ef   :  { %8392 = vmatprep.subr.bf16.mxu0 %v9481_v58 }
 0x6f2   :  { %8393 = vmatpush3.bf16.msra.mxu0 %v9482_v30 }
 0x6f3   :  { %8394 = vmatprep.subr.bf16.mxu0 %v9483_v59 }
 0x6f6   :  { %8395 = vmatpush3.bf16.msra.mxu0 %v9484_v24 }
 0x6f7   :  { %8439 = vmatprep.subr.bf16.mxu0 %v9504_v51 }
 0x6f9   :  { %6569 = vmatmul.mubr.bf16.vlgmr.msra.gmra.mrb[112].mxu0 %v11553_v33 }
 0x6fa   :  { %8443 = vmatprep.mubr.msk.bf16.mxu0 %vm9505_vm3, %v9504_v51  ;;  %8440 = vmatpush3.bf16.msra.mxu0 %v9485_v45 }
 0x6fb   :  { %8441 = vmatprep.subr.bf16.mxu0 %v9504_v51 }
 0x6fe   :  { %8442 = vmatpush3.bf16.msra.mxu0 %v9486_v55 }
 0x6ff   :  { %8447 = vmatprep.subr.bf16.mxu0 %v9504_v51 }
 0x724   :  { %v8196_v25 = vpop.f32.mrb[88].mxu0 }
 0x725   :  { %v8197_v9 = vpop.f32.mrb[89].mxu0 }
 0x726   :  { %v8198_v13 = vadd.f32 %v8197_v9, %v8196_v25  ;;  %v8199_v14 = vpop.f32.mrb[90].mxu0 }
 0x727   :  { %v8200_v16 = vpop.f32.mrb[91].mxu0 }
 0x728   :  { %v8201_v17 = vadd.f32 %v8200_v16, %v8199_v14 }
 0x72c   :  { %v5006_v57 = vpop.f32.mrb[92].mxu0 }
 0x72d   :  { %v5007_v20 = vadd.f32 %v8198_v13, %v5006_v57  ;;  %v8437_v62 = vpop.f32.mrb[93].mxu0 }
 0x72e   :  { %v5009_v54 = vpop.f32.mrb[94].mxu0 }
 0x72f   :  { %v5010_v21 = vadd.f32 %v8201_v17, %v5009_v54  ;;  %v8438_v46 = vpop.f32.mrb[95].mxu0 }
 0x734   :  { %v8242_v6 = vpop.f32.mrb[88].mxu1 }
 0x735   :  { %v8243_v27 = vpop.f32.mrb[89].mxu1 }
 0x736   :  { %v8244_v28 = vadd.f32 %v8243_v27, %v8242_v6  ;;  %v8245_v29 = vpop.f32.mrb[90].mxu1 }
 0x737   :  { %v8246_v33 = vpop.f32.mrb[91].mxu1 }
 0x738   :  { %v8247_v38 = vadd.f32 %v8246_v33, %v8245_v29 }
 0x74c   :  { %v8220_v39 = vpop.f32.mrb[96].mxu0 }
 0x74d   :  { %v8221_v7 = vpop.f32.mrb[97].mxu0 }
 0x74e   :  { %v8222_v61 = vadd.f32 %v8221_v7, %v8220_v39  ;;  %v8223_v11 = vpop.f32.mrb[98].mxu0 }
 0x74f   :  { %v8224_v42 = vpop.f32.mrb[99].mxu0 }
 0x750   :  { %v5185_v2 = vadd.f32 %v8222_v61, %v5007_v20  ;;  %v8225_v3 = vadd.f32 %v8224_v42, %v8223_v11 }
 0x752   :  { %v5186_v5 = vadd.f32 %v8225_v3, %v5010_v21  ;;  %v5359_v35 = vadd.f32 %v8244_v28, %v5185_v2 }
 0x754   :  { %v5360_v40 = vadd.f32 %v8247_v38, %v5186_v5 }
 0x755   :  { %v8286_v44 = vpop.f32.mrb[92].mxu1 }
 0x756   :  { %v8287_v47 = vpop.f32.mrb[93].mxu1 }
 0x757   :  { %v8288_v52 = vadd.f32 %v8287_v47, %v8286_v44  ;;  %v8289_v0 = vpop.f32.mrb[94].mxu1  ;;  %v8167_v44 = vld [vmem:[%s11905_s10] ss:$0 sm:$0xff] }
 0x758   :  { %v8290_v15 = vpop.f32.mrb[95].mxu1 }
 0x759   :  { %v8291_v63 = vadd.f32 %v8290_v15, %v8289_v0 }
 0x76c   :  { %v8264_v10 = vpop.f32.mrb[100].mxu0 }
 0x76d   :  { %v8265_v41 = vpop.f32.mrb[101].mxu0 }
 0x76e   :  { %v8266_v12 = vadd.f32 %v8265_v41, %v8264_v10  ;;  %v8267_v43 = vpop.f32.mrb[102].mxu0  ;;  %v9487_v10 = vld [vmem:[%s11903_s12] sm:$0xff]  }
 0x76f   :  { %v8268_v31 = vpop.f32.mrb[103].mxu0 }
 0x770   :  { %v5533_v48 = vadd.f32 %v8266_v12, %v5359_v35  ;;  %v8269_v26 = vadd.f32 %v8268_v31, %v8267_v43  ;;  %v9488_v12 = vld [vmem:[%s11903_s12 + $0x8] sm:$0xff]   ;;  %v6764_v43 = vld [vmem:[%s11906_s2] sm:$0xff] }
 0x771   :  { %v6765_v31 = vld [vmem:[%s11906_s2 + $0x8] sm:$0xff] }
 0x772   :  { %v5534_v49 = vadd.f32 %v8269_v26, %v5360_v40  ;;  %v5707_v56 = vadd.f32 %v8288_v52, %v5533_v48  ;;  %v6835_v48 = vpack.c.bf16 %v6765_v31, %v6764_v43 }
 0x774   :  { %v5708_v8 = vadd.f32 %v8291_v63, %v5534_v49 }
 0x775   :  { %v8330_v53 = vpop.f32.mrb[96].mxu1 }
 0x776   :  { %v8331_v23 = vpop.f32.mrb[97].mxu1 }
 0x777   :  { %v8332_v60 = vadd.f32 %v8331_v23, %v8330_v53  ;;  %v8333_v36 = vpop.f32.mrb[98].mxu1  ;;  %v6915_v53 = vpop.permute.xlu0 %6914 }
 0x778   :  { %v8334_v37 = vpop.f32.mrb[99].mxu1 }
 0x779   :  { %v8335_v32 = vadd.f32 %v8334_v37, %v8333_v36 }
 0x78c   :  { %v8308_v34 = vpop.f32.mrb[104].mxu0 }
 0x78d   :  { %v8309_v1 = vpop.f32.mrb[105].mxu0 }
 0x78e   :  { %v8310_v50 = vadd.f32 %v8309_v1, %v8308_v34  ;;  %v8311_v22 = vpop.f32.mrb[106].mxu0  ;;  %v8168_v1 = vld [vmem:[%s11907_s13] ss:$0 sm:$0xff]  ;;  %s9507_s13 = smov 96  }
 0x78f   :  { %v8312_v18 = vpop.f32.mrb[107].mxu0 }
 0x790   :  { %v5881_v4 = vadd.f32 %v8310_v50, %v5707_v56  ;;  %v8313_v58 = vadd.f32 %v8312_v18, %v8311_v22 }
 0x792   :  { %v5882_v30 = vadd.f32 %v8313_v58, %v5708_v8  ;;  %v6055_v59 = vadd.f32 %v8332_v60, %v5881_v4 }
 0x794   :  { %v6056_v24 = vadd.f32 %v8335_v32, %v5882_v30 }
 0x795   :  { %v8374_v25 = vpop.f32.mrb[100].mxu1 }
 0x796   :  { %v8375_v9 = vpop.f32.mrb[101].mxu1 }
 0x797   :  { %v8376_v13 = vadd.f32 %v8375_v9, %v8374_v25  ;;  %v8377_v14 = vpop.f32.mrb[102].mxu1 }
 0x798   :  { %v8378_v16 = vpop.f32.mrb[103].mxu1 }
 0x799   :  { %v8379_v17 = vadd.f32 %v8378_v16, %v8377_v14 }
 0x7ac   :  { %v8352_v57 = vpop.f32.mrb[108].mxu0 }
 0x7ad   :  { %v8353_v20 = vpop.f32.mrb[109].mxu0 }
 0x7ae   :  { %v8354_v62 = vadd.f32 %v8353_v20, %v8352_v57  ;;  %v8355_v54 = vpop.f32.mrb[110].mxu0 }
 0x7af   :  { %v8356_v21 = vpop.f32.mrb[111].mxu0 }
 0x7b0   :  { %v6229_v46 = vadd.f32 %v8354_v62, %v6055_v59  ;;  %v8357_v6 = vadd.f32 %v8356_v21, %v8355_v54 }
 0x7b2   :  { %v6230_v27 = vadd.f32 %v8357_v6, %v6056_v24  ;;  %v6403_v28 = vadd.f32 %v8376_v13, %v6229_v46 }
 0x7b4   :  { %v6404_v29 = vadd.f32 %v8379_v17, %v6230_v27 }
 0x7b5   :  { %v8418_v33 = vpop.f32.mrb[104].mxu1 }
 0x7b6   :  { %v8419_v38 = vpop.f32.mrb[105].mxu1 }
 0x7b7   :  { %v8420_v39 = vadd.f32 %v8419_v38, %v8418_v33  ;;  %v8421_v7 = vpop.f32.mrb[106].mxu1  ;;  %v9489_v33 = vld [vmem:[%s11908_s15] sm:$0xff]   ;;  %v9490_v38 = vld [vmem:[%s11908_s15 + $0x8] sm:$0xff]  }
 0x7b8   :  { %v8422_v61 = vpop.f32.mrb[107].mxu1  ;;  %8456 = vmatpush3.bf16.msra.mxu1 %v9489_v33 }
 0x7b9   :  { %v8423_v11 = vadd.f32 %v8422_v61, %v8421_v7  ;;  %8457 = vmatprep.subr.bf16.mxu1 %v9504_v51 }
 0x7bc   :  { %8458 = vmatpush3.bf16.msra.mxu1 %v9490_v38 }
 0x7cc   :  { %v8396_v42 = vpop.f32.mrb[112].mxu0 }
 0x7cd   :  { %v8397_v2 = vpop.f32.mrb[113].mxu0 }
 0x7ce   :  { %v8398_v3 = vadd.f32 %v8397_v2, %v8396_v42  ;;  %v8399_v5 = vpop.f32.mrb[114].mxu0 }
 0x7cf   :  { %v8400_v35 = vpop.f32.mrb[115].mxu0 }
 0x7d0   :  { %v6577_v40 = vadd.f32 %v8398_v3, %v6403_v28  ;;  %v8401_v45 = vadd.f32 %v8400_v35, %v8399_v5 }
 0x7d2   :  { %v6751_v47 = vadd.f32 %v8420_v39, %v6577_v40  ;;  %v6578_v52 = vadd.f32 %v8401_v45, %v6404_v29 }
 0x7d4   :  { %v6760_v0 = vadd.f32 %v8167_v44, %v6751_v47  ;;  %v6752_v15 = vadd.f32 %v8423_v11, %v6578_v52 }
 0x7d6   :  { %v6761_v55 = vadd.f32 %v8167_v44, %v6752_v15  ;;  %v6762_v63 = vmax.f32 %v6760_v0, 0.0 }
 0x7d8   :  { %v6763_v19 = vmax.f32 %v6761_v55, 0.0 }
 0x7da   :  { %v6766_v41 = vpack.c.bf16 %v6763_v19, %v6762_v63  ;;  %v8176_v63 = vld [vmem:[%s11910_s16] ss:$0 sm:$0xff] }
 0x7dc   :  { %8444 = vmatmul.mubr.msk.bf16.vlgmr.msra.gmra.mrb[116].mxu0 %vm6790_vm5, %v6766_v41 }
 0x7dd   :  { %8448 = vmatpush3.bf16.msra.mxu0 %v9487_v10  ;;  %8451 = vmatprep.mubr.msk.bf16.mxu0 %vm9505_vm3, %v9504_v51 }
 0x7de   :  { %8449 = vmatprep.subr.bf16.mxu0 %v9504_v51 }
 0x7e1   :  { %8450 = vmatpush3.bf16.msra.mxu0 %v9488_v12 }
 0x7e4   :  { %8452 = vmatmul.mubr.msk.bf16.vlgmr.msra.gmra.mrb[120].mxu0 %vm6790_vm5, %v6835_v48 }
 0x8af   :  { %v6828_v26 = vpop.f32.mrb[116].mxu0 }
 0x8b0   :  { %v8445_v49 = vpop.f32.mrb[117].mxu0  ;;  %v6829_v50 = vadd.f32 %v8168_v1, %v6828_v26 }
 0x8b1   :  { %v6831_v56 = vpop.f32.mrb[118].mxu0 }
 0x8b2   :  { %v8446_v8 = vpop.f32.mrb[119].mxu0  ;;  %v6832_v22 = vadd.f32 %v8168_v1, %v6831_v56 }
 0x8b7   :  { %v6889_v23 = vpop.f32.mrb[120].mxu0 }
 0x8b8   :  { %v6917_v60 = vadd.f32 %v6915_v53, %v6889_v23  ;;  %v8453_v36 = vpop.f32.mrb[121].mxu0  ;;  %v6896_v18 = vadd.f32 %v6889_v23, %v6829_v50 }
 0x8b9   :  { %v6892_v37 = vpop.f32.mrb[122].mxu0 }
 0x8ba   :  { %6921 = vrot.lane.b32.xlu0 %v6917_v60, %s9506_s26  ;;  %v8454_v32 = vpop.f32.mrb[123].mxu0  ;;  %v6918_v34 = vadd.f32 %v6915_v53, %v6892_v37  ;;  %v6897_v4 = vadd.f32 %v6892_v37, %v6832_v22  ;;  %v6898_v58 = vsub.f32 0.0, %v6896_v18 }
 0x8bc   :  { %6923 = vrot.lane.b32.xlu1 %v6918_v34, %s9506_s26  ;;  %v6899_v30 = vsub.f32 0.0, %v6897_v4  ;;  %v6900_v59 = vmul.f32 1.442695, %v6898_v58 }
 0x8be   :  { %v6902_v24 = vmul.f32 1.442695, %v6899_v30  ;;  %9491 = vpow2.f32 %v6900_v59 }
 0x8c0   :  { %9493 = vpow2.f32 %v6902_v24 }
 0x8c8   :  { %v9492_v25 = vpop.eup %9491 }
 0x8c9   :  { %v6904_v13 = vadd.f32 1.0, %v9492_v25 }
 0x8ca   :  { %v9494_v9 = vpop.eup %9493 }
 0x8cb   :  { %v6905_v14 = vadd.f32 1.0, %v9494_v9  ;;  %9495 = vrcp.f32 %v6904_v13 }
 0x8cd   :  { %9497 = vrcp.f32 %v6905_v14 }
 0x8d5   :  { %v9496_v16 = vpop.eup %9495 }
 0x8d6   :  { %v6941_v61 = vsub.f32 1.0, %v9496_v16 }
 0x8d7   :  { %v9498_v20 = vpop.eup %9497 }
 0x8d8   :  { %v6942_v2 = vsub.f32 1.0, %v9498_v20 }
 0x92c   :  { %v6922_v17 = vpop.permute.xlu0 %6921 }
 0x92d   :  { %v6927_v57 = vmul.f32 %v9496_v16, %v6922_v17 }
 0x92e   :  { %v6924_v62 = vpop.permute.xlu1 %6923 }
 0x92f   :  { %v6928_v54 = vmul.f32 %v9498_v20, %v6924_v62  ;;  %6931 = vrot.lane.b32.xlu1 %v6927_v57, %s9506_s26 }
 0x931   :  { %6933 = vrot.lane.b32.xlu0 %v6928_v54, %s9506_s26 }
 0x9a1   :  { %v6932_v21 = vpop.permute.xlu1 %6931 }
 0x9a2   :  { %v6937_v46 = vadd.f32 %v6932_v21, %v6829_v50 }
 0x9a3   :  { %v6934_v6 = vpop.permute.xlu0 %6933 }
 0x9a4   :  { %9499 = vtanh.f32 %v6937_v46  ;;  %v6938_v27 = vadd.f32 %v6934_v6, %v6832_v22 }
 0x9a6   :  { %9501 = vtanh.f32 %v6938_v27 }
 0x9ae   :  { %v9500_v28 = vpop.eup %9499 }
 0x9af   :  { %6945 = vrot.lane.b32.xlu1 %v9500_v28, %s9507_s13 }
 0x9b0   :  { %v9502_v29 = vpop.eup %9501 }
 0x9b1   :  { %6947 = vrot.lane.b32.xlu0 %v9502_v29, %s9507_s13 }
 0x9b3   :  { %6955 = vrot.lane.b32.xlu1 %v6764_v43, %s9508_s20 }
 0x9b5   :  { %6957 = vrot.lane.b32.xlu0 %v6765_v31, %s9508_s20 }
 0xa21   :  { %v6946_v39 = vpop.permute.xlu1 %6945 }
 0xa22   :  { %v6951_v42 = vmul.f32 %v6946_v39, %v6941_v61 }
 0xa23   :  { %v6948_v7 = vpop.permute.xlu0 %6947 }
 0xa24   :  { %v6952_v35 = vmul.f32 %v6948_v7, %v6942_v2 }
 0xa25   :  { %v6956_v11 = vpop.permute.xlu1 %6955 }
 0xa26   :  { %v6961_v3 = vmul.f32 %v9496_v16, %v6956_v11 }
 0xa27   :  { %v6958_v5 = vpop.permute.xlu0 %6957 }
 0xa28   :  { %v6963_v40 = vadd.f32 %v6961_v3, %v6951_v42  ;;  %v6962_v45 = vmul.f32 %v9498_v20, %v6958_v5 }
 0xa2a   :  { %v6964_v44 = vadd.f32 %v6962_v45, %v6952_v35  ;;  %7040 = vrot.lane.b32.xlu0 %v6963_v40, %s9507_s13 }
 0xa2c   :  { %v6965_v47 = vpack.c.bf16 %v6964_v44, %v6963_v40 }
 0xa2e   :  { %6978 = vrot.lane.b32.xlu1 %v6965_v47, %s9507_s13 }
 0xa32   :  { %7042 = vrot.lane.b32.xlu1 %v6964_v44, %s9507_s13 }
 0xa9c   :  { %v7041_v51 = vpop.permute.xlu0 %7040 }
 0xa9d   :  { %v7046_v52 = vsel %vm6790_vm5, %v7041_v51, 0.0 }
 0xa9e   :  { %7048 = vst [vmem:[%s11909_s18] sm:$0xff] %v7046_v52 }
 0xaa0   :  { %v6979_v0 = vpop.permute.xlu1 %6978 }
 0xaa1   :  { %8460 = vmatmul.mubr.msk.bf16.vlgmr.msra.gmra.mrb[108].mxu1 %vm6790_vm5, %v6979_v0 }
 0xaa4   :  { %v7043_v15 = vpop.permute.xlu1 %7042 }
 0xaa5   :  { %v7047_v55 = vsel %vm6790_vm5, %v7043_v15, 0.0 }
 0xaa6   :  { %7049 = vst [vmem:[%s11909_s18 + $0x8] sm:$0xff] %v7047_v55 }
 0xb74   :  { %v7029_v19 = vpop.f32.mrb[108].mxu1 }
 0xb75   :  { %v7030_v10 = vadd.f32 %v8176_v63, %v7029_v19  ;;  %v8461_v41 = vpop.f32.mrb[109].mxu1 }
 0xb76   :  { %v7032_v12 = vpop.f32.mrb[110].mxu1 }
 0xb77   :  { %7036 = vst [vmem:[%s11911_s17] sm:$0xff] %v7030_v10  ;;  %v7033_v43 = vadd.f32 %v8176_v63, %v7032_v12  ;;  %v8462_v31 = vpop.f32.mrb[111].mxu1 }
 0xb79   :  { %7037 = vst [vmem:[%s11911_s17 + $0x8] sm:$0xff] %v7033_v43 }

</bundles_post_ra>
